<compile_context>
chip_gen: v7x
topology: tpu7x:2x2x1
jax: 0.10.0
libtpu: 0.0.40
codegen_flags: <defaults>
</compile_context>

<pallas_src>
import jax
import jax.numpy as jnp
from jax.experimental import pallas as pl
from jax.experimental.pallas import tpu as pltpu

TEMPERATURE = 0.07          # ContrastiveHead default
INV_T = 1.0 / TEMPERATURE   # divide-by-T -> multiply
MOMENTUM = 0.5              # memory bank momentum


def _batch_block(n, target=8):
    """Largest batch block <= target that keeps (8,128) block rules satisfied."""
    if n <= target:
        return n
    for b in range(target, 0, -1):
        if n % b == 0 and b % 8 == 0:
            return b
    return n


def _k_tile(k, target=512):
    """Largest K tile <= target dividing K; prefer multiples of 128 (lane-dense)."""
    if k <= target:
        return k
    for t in range(target, 127, -1):
        if k % t == 0 and t % 128 == 0:
            return t
    for t in range(target, 0, -1):
        if k % t == 0 and t % 8 == 0:
            return t
    return k


# ---------------------------------------------------------------------------
# Fused backbone + neck:
#   conv3x3(s1,p1) + bias + ReLU + global-avg-pool + linear, NB images/step.
# ---------------------------------------------------------------------------
def _backbone_neck_kernel(x_ref, wc_ref, bc_ref, pool_ref, wn_ref, bn_ref,
                          feat_ref):
    # x_ref:    (NB, H+2, W+2, C)  bf16   padded images (NHWC)
    # wc_ref:   (9*C, Cout)        bf16   im2col conv weights
    # bc_ref:   (1, Cout)          f32
    # pool_ref: (NB, NB*H*W)       f32    block-diagonal 1/(H*W) pooling matrix
    # wn_ref:   (Cout, D)          bf16   neck linear weights
    # bn_ref:   (1, D)             f32
    # feat_ref out: (NB, D)        f32
    xp = x_ref[...]                                    # keep bf16, no upcast
    NB, Hp, Wp, C = xp.shape
    H, W = Hp - 2, Wp - 2

    # im2col assembled in VMEM (never written to HBM): 9 shifted windows.
    taps = [xp[:, t // 3:t // 3 + H, t % 3:t % 3 + W, :].reshape(NB * H * W, C)
            for t in range(9)]
    im2col = jnp.concatenate(taps, axis=-1)            # (NB*H*W, 9*C) bf16

    # Single fused conv matmul (f32 accumulation) + bias + ReLU.
    conv = jnp.dot(im2col, wc_ref[...], preferred_element_type=jnp.float32)
    conv = jnp.maximum(conv + bc_ref[...], 0.0)        # (NB*H*W, Cout)

    # Global average pool on the MXU (ones-matrix matmul, no XLU reduction).
    pooled = jnp.dot(pool_ref[...], conv,
                     preferred_element_type=jnp.float32)   # (NB, Cout)

    # Batched neck linear.
    feat = jnp.dot(pooled.astype(jnp.bfloat16), wn_ref[...],
                   preferred_element_type=jnp.float32) + bn_ref[...]
    feat_ref[...] = feat


def backbone_neck(img, params, *, nb_target=8):
    """img: (N, C, H, W) f32 -> features (N, D) f32."""
    N, C, H, W = img.shape
    Cout = params["w_conv"].shape[0]
    D = params["w_neck"].shape[1]
    NB = _batch_block(N, nb_target)

    # NCHW -> NHWC (channels last = lanes), halo pad, one host-side bf16 cast.
    x = jnp.transpose(img, (0, 2, 3, 1))
    xp = jnp.pad(x, ((0, 0), (1, 1), (1, 1), (0, 0))).astype(jnp.bfloat16)

    # (Cout, C, 3, 3) -> (9*C, Cout): tap-major, channel-minor (matches im2col).
    wc = jnp.transpose(params["w_conv"], (2, 3, 1, 0)).reshape(9 * C, Cout)
    wc = wc.astype(jnp.bfloat16)
    bc = params["b_conv"].reshape(1, Cout).astype(jnp.float32)
    wn = params["w_neck"].astype(jnp.bfloat16)
    bn = params["b_neck"].reshape(1, D).astype(jnp.float32)
    # Block-diagonal mean-pool matrix for the NB images of one grid step.
    pool = jnp.kron(jnp.eye(NB, dtype=jnp.float32),
                    jnp.full((1, H * W), 1.0 / (H * W), jnp.float32))

    # TODO(synk): for large H*W (224x224) the (NB*H*W, Cout) activation must be
    # blocked spatially with the pooled sum accumulated in scratch (v7x 64 MiB).
    return pl.pallas_call(
        _backbone_neck_kernel,
        out_shape=jax.ShapeDtypeStruct((N, D), jnp.float32),
        grid=(N // NB,),
        in_specs=[
            pl.BlockSpec((NB, H + 2, W + 2, C), lambda i: (i, 0, 0, 0)),
            pl.BlockSpec((9 * C, Cout), lambda i: (0, 0)),
            pl.BlockSpec((1, Cout), lambda i: (0, 0)),
            pl.BlockSpec((NB, NB * H * W), lambda i: (0, 0)),
            pl.BlockSpec((Cout, D), lambda i: (0, 0)),
            pl.BlockSpec((1, D), lambda i: (0, 0)),
        ],
        out_specs=pl.BlockSpec((NB, D), lambda i: (i, 0)),
        compiler_params=pltpu.CompilerParams(
            dimension_semantics=("parallel",),
            vmem_limit_bytes=32 * 1024 * 1024),
    )(xp, wc, bc, pool, wn, bn)


# ---------------------------------------------------------------------------
# NPID hot path: L2-normalize, pos logit, K-tiled streaming neg logits (MXU),
# per-image contrastive CE loss via an online log-sum-exp.
# ---------------------------------------------------------------------------
def _npid_kernel(feat_ref, pos_ref, neg_ref,
                 pos_out, neg_out, loss_out, fn_out,
                 fnb_sc, posl_sc, m_sc, l_sc):
    # feat_ref: (NB, D)      f32   backbone features (one batch block)
    # pos_ref:  (NB, D)      f32   positive bank rows
    # neg_ref:  (NB, tk, D)  bf16  negative bank rows for this K tile
    k = pl.program_id(1)

    @pl.when(k == 0)
    def _init():
        f = feat_ref[...]
        ssq = jnp.sum(f * f, axis=-1, keepdims=True)
        fn = f * jax.lax.rsqrt(jnp.maximum(ssq, 1e-24))            # F.normalize
        fn_out[...] = fn
        fnb_sc[...] = fn.astype(fnb_sc.dtype)                      # cached bf16 copy
        pos = jnp.sum(pos_ref[...] * fn, axis=-1, keepdims=True)   # (NB, 1)
        pos_out[...] = pos
        pos_l = pos * INV_T
        posl_sc[...] = pos_l
        m_sc[...] = pos_l                   # LSE seeded with the positive logit
        l_sc[...] = jnp.ones_like(pos_l)

    # Batched neg logits on the MXU, contracting the trailing D (no transpose):
    #   (NB, 1, D) x (NB, tk, D) -> (NB, 1, tk) -> (NB, tk)
    neg = jnp.einsum('nqd,nkd->nqk', fnb_sc[...][:, None, :], neg_ref[...],
                     preferred_element_type=jnp.float32)[:, 0, :]
    neg_out[...] = neg

    # Online (flash-style) log-sum-exp over [pos, all negatives] / T.
    neg_l = neg * INV_T
    m_prev = m_sc[...]
    m_new = jnp.maximum(m_prev, jnp.max(neg_l, axis=-1, keepdims=True))
    l_sc[...] = (l_sc[...] * jnp.exp(m_prev - m_new)
                 + jnp.sum(jnp.exp(neg_l - m_new), axis=-1, keepdims=True))
    m_sc[...] = m_new

    @pl.when(k == pl.num_programs(1) - 1)
    def _fin():
        # Per-image contrastive CE: LSE - pos/T (batch mean taken in glue).
        loss_out[...] = m_sc[...] + jnp.log(l_sc[...]) - posl_sc[...]


def npid_logits_loss(feature, pos_feat, neg_feat, *, tk_target=512, nb_target=8):
    """feature, pos_feat: (N, D) f32;  neg_feat: (N, K, D) bf16.

    Returns pos_logits (N,1), neg_logits (N,K), per-image loss (N,1),
    and the L2-normalized feature (N,D)."""
    N, D = feature.shape
    K = neg_feat.shape[1]
    # TODO(synk): halve tk_target on v7x (64 MiB VMEM vs 128 MiB on v5e/v6e).
    tk = _k_tile(K, tk_target)
    NB = _batch_block(N, nb_target)

    return pl.pallas_call(
        _npid_kernel,
        out_shape=(
            jax.ShapeDtypeStruct((N, 1), jnp.float32),    # pos logits
            jax.ShapeDtypeStruct((N, K), jnp.float32),    # neg logits
            jax.ShapeDtypeStruct((N, 1), jnp.float32),    # per-image loss
            jax.ShapeDtypeStruct((N, D), jnp.float32),    # normalized feature
        ),
        grid=(N // NB, K // tk),
        in_specs=[
            pl.BlockSpec((NB, D), lambda i, k: (i, 0)),
            pl.BlockSpec((NB, D), lambda i, k: (i, 0)),
            pl.BlockSpec((NB, tk, D), lambda i, k: (i, k, 0)),
        ],
        out_specs=[
            pl.BlockSpec((NB, 1), lambda i, k: (i, 0)),
            pl.BlockSpec((NB, tk), lambda i, k: (i, k)),
            pl.BlockSpec((NB, 1), lambda i, k: (i, 0)),
            pl.BlockSpec((NB, D), lambda i, k: (i, 0)),
        ],
        scratch_shapes=[
            pltpu.VMEM((NB, D), jnp.bfloat16),   # cached bf16 normalized feature
            pltpu.VMEM((NB, 1), jnp.float32),    # pos / T
            pltpu.VMEM((NB, 1), jnp.float32),    # running max
            pltpu.VMEM((NB, 1), jnp.float32),    # running sum
        ],
        compiler_params=pltpu.CompilerParams(
            dimension_semantics=("parallel", "arbitrary"),
            vmem_limit_bytes=32 * 1024 * 1024),
    )(feature.astype(jnp.float32), pos_feat.astype(jnp.float32), neg_feat)


# ---------------------------------------------------------------------------
# Full NPID.forward_train
# ---------------------------------------------------------------------------
def npid_forward_train(img, idx, params, bank, neg_key, neg_num):
    N = img.shape[0]
    BANK, D = bank.shape

    # Fused backbone + neck (single Pallas kernel over batched image blocks).
    feature = backbone_neck(img, params)                          # (N, D) f32

    # memory_bank.multinomial.draw -> negative index sampling
    # TODO(synk): alias-method multinomial sampler not ported; uniform draw used.
    neg_idx = jax.random.randint(neg_key, (N * neg_num,), 0, BANK, dtype=jnp.int32)

    # Bank gathers (plain-JAX glue). Negatives stay (N, K, D): no pad/transpose.
    # TODO(synk): at paper-scale K the gather should move in-kernel (scalar-
    # prefetched neg_idx, bank in HBM via memory_space=pl.ANY, async-copy gather).
    pos_feat = bank[idx]                                          # (N, D)
    neg_feat = bank[neg_idx].reshape(N, neg_num, D).astype(jnp.bfloat16)

    pos_logits, neg_logits, per_img_loss, fn = npid_logits_loss(
        feature, pos_feat, neg_feat)
    loss = jnp.mean(per_img_loss)          # CrossEntropyLoss reduction='mean'

    # Memory-bank momentum update (torch.no_grad block; plain-JAX glue),
    # reusing the in-kernel normalized feature (no re-normalization).
    upd = MOMENTUM * bank[idx] + (1.0 - MOMENTUM) * fn
    upd = upd / jnp.maximum(jnp.linalg.norm(upd, axis=1, keepdims=True), 1e-12)
    new_bank = bank.at[idx].set(upd)

    losses = {"loss": loss}
    return losses, pos_logits, neg_logits, new_bank


if __name__ == "__main__":
    key = jax.random.PRNGKey(0)
    ks = jax.random.split(key, 8)

    # small synthetic shapes
    N, C, H, W = 2, 4, 16, 16     # images (NCHW)
    COUT = 32                     # backbone output channels
    D = 32                        # neck feature dim
    NEG_NUM = 256                 # negatives per image (65536 in the paper)
    BANK_SIZE = 64                # memory bank entries

    img = jax.random.normal(ks[0], (N, C, H, W), jnp.float32)
    idx = jnp.array([3, 17], dtype=jnp.int32)

    # deterministic parameter init (kaiming-style scaling)
    params = {
        "w_conv": jax.random.normal(ks[1], (COUT, C, 3, 3), jnp.float32)
                  * (2.0 / (C * 9)) ** 0.5,
        "b_conv": jnp.zeros((COUT,), jnp.float32),
        "w_neck": jax.random.normal(ks[2], (COUT, D), jnp.float32)
                  * (2.0 / COUT) ** 0.5,
        "b_neck": jnp.zeros((D,), jnp.float32),
    }

    bank = jax.random.normal(ks[3], (BANK_SIZE, D), jnp.float32)
    bank = bank / jnp.linalg.norm(bank, axis=1, keepdims=True)

    losses, pos_logits, neg_logits, new_bank = npid_forward_train(
        img, idx, params, bank, ks[4], NEG_NUM)

    jax.block_until_ready((losses["loss"], pos_logits, neg_logits, new_bank))
    assert pos_logits.shape == (N, 1)
    assert neg_logits.shape == (N, NEG_NUM)
    assert new_bank.shape == bank.shape
    assert bool(jnp.isfinite(losses["loss"]))
    print("KERNEL_OK")
</pallas_src>

<mosaic_0001>
module attributes {stable_mosaic.version = 11 : i64} {
  func.func @_backbone_neck_kernel(%arg0: i32, %arg1: memref<2x18x18x4xbf16, #tpu.memory_space<vmem>>, %arg2: memref<36x32xbf16, #tpu.memory_space<vmem>>, %arg3: memref<1x32xf32, #tpu.memory_space<vmem>>, %arg4: memref<2x512xf32, #tpu.memory_space<vmem>>, %arg5: memref<32x32xbf16, #tpu.memory_space<vmem>>, %arg6: memref<1x32xf32, #tpu.memory_space<vmem>>, %arg7: memref<2x32xf32, #tpu.memory_space<vmem>>) attributes {dimension_semantics = [#tpu.dimension_semantics<parallel>], iteration_bounds = array<i64: 1>, scalar_prefetch = 0 : i64, scratch_operands = 0 : i64, tpu.core_type = #tpu.core_type<tc>, window_params = [{transform_indices = @transform_0, window_bounds = array<i64: 2, 18, 18, 4>}, {pipeline_mode = #tpu.pipeline_mode<synchronous>, transform_indices = @transform_1, window_bounds = array<i64: 36, 32>}, {pipeline_mode = #tpu.pipeline_mode<synchronous>, transform_indices = @transform_2, window_bounds = array<i64: 1, 32>}, {pipeline_mode = #tpu.pipeline_mode<synchronous>, transform_indices = @transform_3, window_bounds = array<i64: 2, 512>}, {pipeline_mode = #tpu.pipeline_mode<synchronous>, transform_indices = @transform_4, window_bounds = array<i64: 32, 32>}, {pipeline_mode = #tpu.pipeline_mode<synchronous>, transform_indices = @transform_5, window_bounds = array<i64: 1, 32>}, {transform_indices = @transform_6, window_bounds = array<i64: 2, 32>}]} {
    %c0 = arith.constant 0 : index
    %c0_0 = arith.constant 0 : index
    %c0_1 = arith.constant 0 : index
    %c0_2 = arith.constant 0 : index
    %0 = vector.load %arg1[%c0, %c0_0, %c0_1, %c0_2] : memref<2x18x18x4xbf16, #tpu.memory_space<vmem>>, vector<2x18x18x4xbf16>
    %1 = vector.extract_strided_slice %0 {offsets = [0, 0, 0, 0], sizes = [2, 16, 16, 4], strides = [1, 1, 1, 1]} : vector<2x18x18x4xbf16> to vector<2x16x16x4xbf16>
    %2 = vector.shape_cast %1 : vector<2x16x16x4xbf16> to vector<512x4xbf16>
    %3 = vector.extract_strided_slice %0 {offsets = [0, 0, 1, 0], sizes = [2, 16, 16, 4], strides = [1, 1, 1, 1]} : vector<2x18x18x4xbf16> to vector<2x16x16x4xbf16>
    %4 = vector.shape_cast %3 : vector<2x16x16x4xbf16> to vector<512x4xbf16>
    %5 = vector.extract_strided_slice %0 {offsets = [0, 0, 2, 0], sizes = [2, 16, 16, 4], strides = [1, 1, 1, 1]} : vector<2x18x18x4xbf16> to vector<2x16x16x4xbf16>
    %6 = vector.shape_cast %5 : vector<2x16x16x4xbf16> to vector<512x4xbf16>
    %7 = vector.extract_strided_slice %0 {offsets = [0, 1, 0, 0], sizes = [2, 16, 16, 4], strides = [1, 1, 1, 1]} : vector<2x18x18x4xbf16> to vector<2x16x16x4xbf16>
    %8 = vector.shape_cast %7 : vector<2x16x16x4xbf16> to vector<512x4xbf16>
    %9 = vector.extract_strided_slice %0 {offsets = [0, 1, 1, 0], sizes = [2, 16, 16, 4], strides = [1, 1, 1, 1]} : vector<2x18x18x4xbf16> to vector<2x16x16x4xbf16>
    %10 = vector.shape_cast %9 : vector<2x16x16x4xbf16> to vector<512x4xbf16>
    %11 = vector.extract_strided_slice %0 {offsets = [0, 1, 2, 0], sizes = [2, 16, 16, 4], strides = [1, 1, 1, 1]} : vector<2x18x18x4xbf16> to vector<2x16x16x4xbf16>
    %12 = vector.shape_cast %11 : vector<2x16x16x4xbf16> to vector<512x4xbf16>
    %13 = vector.extract_strided_slice %0 {offsets = [0, 2, 0, 0], sizes = [2, 16, 16, 4], strides = [1, 1, 1, 1]} : vector<2x18x18x4xbf16> to vector<2x16x16x4xbf16>
    %14 = vector.shape_cast %13 : vector<2x16x16x4xbf16> to vector<512x4xbf16>
    %15 = vector.extract_strided_slice %0 {offsets = [0, 2, 1, 0], sizes = [2, 16, 16, 4], strides = [1, 1, 1, 1]} : vector<2x18x18x4xbf16> to vector<2x16x16x4xbf16>
    %16 = vector.shape_cast %15 : vector<2x16x16x4xbf16> to vector<512x4xbf16>
    %17 = vector.extract_strided_slice %0 {offsets = [0, 2, 2, 0], sizes = [2, 16, 16, 4], strides = [1, 1, 1, 1]} : vector<2x18x18x4xbf16> to vector<2x16x16x4xbf16>
    %18 = vector.shape_cast %17 : vector<2x16x16x4xbf16> to vector<512x4xbf16>
    %19 = tpu.concatenate %2, %4, %6, %8, %10, %12, %14, %16, %18 in 1 : vector<512x4xbf16>, vector<512x4xbf16>, vector<512x4xbf16>, vector<512x4xbf16>, vector<512x4xbf16>, vector<512x4xbf16>, vector<512x4xbf16>, vector<512x4xbf16>, vector<512x4xbf16> -> vector<512x36xbf16>
    %c0_3 = arith.constant 0 : index
    %c0_4 = arith.constant 0 : index
    %20 = vector.load %arg2[%c0_3, %c0_4] : memref<36x32xbf16, #tpu.memory_space<vmem>>, vector<36x32xbf16>
    %cst = arith.constant dense<0.000000e+00> : vector<512x32xf32>
    %21 = tpu.matmul %19, %20, %cst {dimension_numbers = #tpu.dot_dimension_numbers<[1], [0], [0], [1], [0, 0, 1, 1], [], []>} : vector<512x36xbf16>, vector<36x32xbf16>, vector<512x32xf32> -> vector<512x32xf32>
    %c0_5 = arith.constant 0 : index
    %c0_6 = arith.constant 0 : index
    %22 = vector.load %arg3[%c0_5, %c0_6] : memref<1x32xf32, #tpu.memory_space<vmem>>, vector<1x32xf32>
    %23 = vector.broadcast %22 : vector<1x32xf32> to vector<512x32xf32>
    %24 = arith.addf %21, %23 : vector<512x32xf32>
    %cst_7 = arith.constant 0.000000e+00 : f32
    %25 = vector.broadcast %cst_7 : f32 to vector<512x32xf32>
    %26 = arith.maximumf %24, %25 : vector<512x32xf32>
    %c0_8 = arith.constant 0 : index
    %c0_9 = arith.constant 0 : index
    %27 = vector.load %arg4[%c0_8, %c0_9] : memref<2x512xf32, #tpu.memory_space<vmem>>, vector<2x512xf32>
    %cst_10 = arith.constant dense<0.000000e+00> : vector<2x32xf32>
    %28 = tpu.matmul %27, %26, %cst_10 {dimension_numbers = #tpu.dot_dimension_numbers<[1], [0], [0], [1], [0, 0, 1, 1], [], []>} : vector<2x512xf32>, vector<512x32xf32>, vector<2x32xf32> -> vector<2x32xf32>
    %29 = arith.truncf %28 : vector<2x32xf32> to vector<2x32xbf16>
    %c0_11 = arith.constant 0 : index
    %c0_12 = arith.constant 0 : index
    %30 = vector.load %arg5[%c0_11, %c0_12] : memref<32x32xbf16, #tpu.memory_space<vmem>>, vector<32x32xbf16>
    %cst_13 = arith.constant dense<0.000000e+00> : vector<2x32xf32>
    %31 = tpu.matmul %29, %30, %cst_13 {dimension_numbers = #tpu.dot_dimension_numbers<[1], [0], [0], [1], [0, 0, 1, 1], [], []>} : vector<2x32xbf16>, vector<32x32xbf16>, vector<2x32xf32> -> vector<2x32xf32>
    %c0_14 = arith.constant 0 : index
    %c0_15 = arith.constant 0 : index
    %32 = vector.load %arg6[%c0_14, %c0_15] : memref<1x32xf32, #tpu.memory_space<vmem>>, vector<1x32xf32>
    %33 = vector.broadcast %32 : vector<1x32xf32> to vector<2x32xf32>
    %34 = arith.addf %31, %33 : vector<2x32xf32>
    %c0_16 = arith.constant 0 : index
    %c0_17 = arith.constant 0 : index
    %35 = vector.load %arg7[%c0_16, %c0_17] : memref<2x32xf32, #tpu.memory_space<vmem>>, vector<2x32xf32>
    tpu.vector_store %arg7[%c0_16, %c0_17], %34 {strides = array<i32>} : memref<2x32xf32, #tpu.memory_space<vmem>>, vector<2x32xf32>,
    return
  }
  func.func @transform_0(%arg0: i32) -> (i32, i32, i32, i32) {
    %c0_i32 = arith.constant 0 : i32
    %c0_i32_0 = arith.constant 0 : i32
    %c0_i32_1 = arith.constant 0 : i32
    %c0_i32_2 = arith.constant 0 : i32
    return %arg0, %c0_i32, %c0_i32_0, %c0_i32_1 : i32, i32, i32, i32
  }
  func.func @transform_1(%arg0: i32) -> (i32, i32) {
    %c0_i32 = arith.constant 0 : i32
    %c0_i32_0 = arith.constant 0 : i32
    %c0_i32_1 = arith.constant 0 : i32
    return %c0_i32, %c0_i32_0 : i32, i32
  }
  func.func @transform_2(%arg0: i32) -> (i32, i32) {
    %c0_i32 = arith.constant 0 : i32
    %c0_i32_0 = arith.constant 0 : i32
    %c0_i32_1 = arith.constant 0 : i32
    return %c0_i32, %c0_i32_0 : i32, i32
  }
  func.func @transform_3(%arg0: i32) -> (i32, i32) {
    %c0_i32 = arith.constant 0 : i32
    %c0_i32_0 = arith.constant 0 : i32
    %c0_i32_1 = arith.constant 0 : i32
    return %c0_i32, %c0_i32_0 : i32, i32
  }
  func.func @transform_4(%arg0: i32) -> (i32, i32) {
    %c0_i32 = arith.constant 0 : i32
    %c0_i32_0 = arith.constant 0 : i32
    %c0_i32_1 = arith.constant 0 : i32
    return %c0_i32, %c0_i32_0 : i32, i32
  }
  func.func @transform_5(%arg0: i32) -> (i32, i32) {
    %c0_i32 = arith.constant 0 : i32
    %c0_i32_0 = arith.constant 0 : i32
    %c0_i32_1 = arith.constant 0 : i32
    return %c0_i32, %c0_i32_0 : i32, i32
  }
  func.func @transform_6(%arg0: i32) -> (i32, i32) {
    %c0_i32 = arith.constant 0 : i32
    %c0_i32_0 = arith.constant 0 : i32
    return %arg0, %c0_i32 : i32, i32
  }
}

</mosaic_0001>

<bundles_post_ra>
// kernel: tpu_custom_call.1
= control target key start
LH: loop header
LB: loop body
LE: loop exit
PB: predicated region body
PF: predicated region fallthrough
CT: control target
= control target key end

     0   :  { %vm1000_vm0 = vcmask 1042432   ;;  %s3971_s7 = smov 12   ;;  %vm1001_vm1 = vcmask 1046532   ;;  %vm133_vm3 = vsmask.f32 3328  ;;  %s3972_s16 = smov 8   ;;  %s6647_s0 = inlined_call_operand.vmem [shape: bf16[2,18,18,4], index: 0, kind: input, shape index: {}]   ;;  %s6648_s1 = inlined_call_operand.vmem [shape: bf16[36,32], index: 1, kind: input, shape index: {}]   ;;  %s6649_s2 = inlined_call_operand.vmem [shape: f32[1,32], index: 2, kind: input, shape index: {}]   ;;  %s6650_s3 = inlined_call_operand.vmem [shape: f32[2,512], index: 3, kind: input, shape index: {}]   ;;  %s6651_s4 = inlined_call_operand.vmem [shape: bf16[32,32], index: 4, kind: input, shape index: {}]   ;;  %s6652_s5 = inlined_call_operand.vmem [shape: f32[1,32], index: 5, kind: input, shape index: {}]   ;;  %s6653_s6 = inlined_call_operand.hbm [shape: f32[2,32], index: 6, kind: output, shape index: {}]  }
   0x1   :  { %v4021_v0 = vld [vmem:[%s6647_s0 + $0x18] sm:$0xf]  ;;  %v4026_v1 = vld [vmem:[%s6647_s0 + $0x1c] sm:$0xf]  ;;  %v28_v6 = vld [vmem:[%s6647_s0 + $0xc] sm:$0xf] }
   0x2   :  { %v198_v2 = vshrl.u32 %v4026_v1, 16  ;;  %v4031_v3 = vcombine.low %v4021_v0, %v4026_v1  ;;  %v185_v4 = vshrl.u32 %v4021_v0, 16  ;;  %v188_v5 = vshll.u32 %v4021_v0, 16  ;;  %v29_v7 = vld [vmem:[%s6647_s0 + $0x10] sm:$0xf]  ;;  %vm4065_vm2 = vmor %vm1000_vm0, %vm1001_vm1  ;;  %s3973_s21 = smov 4  }
   0x3   :  { %v161_v8 = vshrl.u32 %v28_v6, 16  ;;  %v164_v9 = vshll.u32 %v28_v6, 16  ;;  %v4044_v10 = vld [vmem:[%s6647_s0] sm:$0xf]  ;;  %v170_v11 = vshll.u32 %v29_v7, 16  ;;  %v174_v12 = vshrl.u32 %v29_v7, 16 }
   0x4   :  { %1787 = vrot.lane.b32.xlu1 %v4031_v3, %s3971_s7  ;;  %v4048_v13 = vcombine.low %v28_v6, %v29_v7  ;;  %v4053_v14 = vld [vmem:[%s6647_s0 + $0x4] sm:$0xf]  ;;  %v27_v15 = vld [vmem:[%s6647_s0 + $0x8] sm:$0x1]  ;;  %v3446_v18 = vrot.slane %v4044_v10, 9  ;;  %v3447_v24 = vrot.slane %v28_v6, 9 }
   0x5   :  { %v163_v16 = vrot.slane %v161_v8, 4  ;;  %v166_v17 = vrot.slane %v164_v9, 5  ;;  %v30_v19 = vld [vmem:[%s6647_s0 + $0x14] sm:$0x1]  ;;  %v176_v20 = vrot.slane %v174_v12, 4  ;;  %v1005_v22 = vrot.slane %v4053_v14, 5 }
   0x6   :  { %1785 = vrot.lane.b32.xlu0 %v4048_v13, %s3971_s7  ;;  %v1008_v23 = vrot.slane %v27_v15, 5  ;;  %v1012_v25 = vrot.slane %v29_v7, 5  ;;  %v1015_v26 = vrot.slane %v30_v19, 5  ;;  %vm134_vm4 = vsmask.f32 7440  ;;  %s3974_s26 = smov 16  }
   0x7   :  { %v1006_v27 = vsel %vm4065_vm2, %v3446_v18, %v1005_v22  ;;  %v1007_v28 = vrot.slane %v1005_v22, 4  ;;  %v137_v29 = vshrl.u32 %v4044_v10, 16  ;;  %v140_v30 = vshll.u32 %v4044_v10, 16  ;;  %v33_v43 = vld [vmem:[%s6647_s0 + $0x20] sm:$0x1]  ;;  %vm4090_vm5 = vmor %vm133_vm3, %vm134_vm4  ;;  %s3975_s29 = smov 20  }
   0x8   :  { %v1013_v31 = vsel %vm4065_vm2, %v3447_v24, %v1012_v25  ;;  %v1014_v32 = vrot.slane %v1012_v25, 4  ;;  %v146_v33 = vshll.u32 %v4053_v14, 16  ;;  %v150_v34 = vshrl.u32 %v4053_v14, 16  ;;  %v4104_v8 = vld [vmem:[%s6647_s0 + $0x24] sm:$0xf]  ;;  %s3976_s11 = smov 24  }
   0x9   :  { %v1009_v35 = vsel %vm4065_vm2, %v1007_v28, %v1008_v23  ;;  %v139_v36 = vrot.slane %v137_v29, 4  ;;  %v142_v37 = vrot.slane %v140_v30, 5  ;;  %v156_v38 = vshll.u32 %v27_v15, 16  ;;  %v4109_v9 = vld [vmem:[%s6647_s0 + $0x28] sm:$0xf]  ;;  %s3977_s12 = smov 28  }
   0xa   :  { %v3546_v39 = vcombine.low %v1006_v27, %v1009_v35  ;;  %v1016_v40 = vsel %vm4065_vm2, %v1014_v32, %v1015_v26  ;;  %v148_v41 = vrot.slane %v146_v33, 5  ;;  %v152_v42 = vrot.slane %v150_v34, 4 }
   0xb   :  { %v4085_v44 = vcombine.low %v1013_v31, %v1016_v40  ;;  %v143_v45 = vor.u32 %v142_v37, %v139_v36  ;;  %v158_v46 = vrot.slane %v156_v38, 5  ;;  %v187_v47 = vrot.slane %v185_v4, 4  ;;  %v3911_v36 = vld [vmem:[%s6648_s1] sm:$0xff]  }
   0xc   :  { %1715 = vrot.lane.b32.xlu1 %v3546_v39, %s3972_s16  ;;  %v153_v49 = vor.u32 %v152_v42, %v148_v41  ;;  %v190_v50 = vrot.slane %v188_v5, 5  ;;  %v194_v51 = vshll.u32 %v4026_v1, 16  ;;  %v200_v52 = vrot.slane %v198_v2, 4  ;;  %3738 = vmatprep.subr.bf16.mxu0 %v3911_v36 }
   0xd   :  { %v144_v53 = vrot.slane %v143_v45, 4  ;;  %v204_v54 = vshll.u32 %v33_v43, 16  ;;  %v167_v55 = vor.u32 %v166_v17, %v163_v16  ;;  %v172_v56 = vrot.slane %v170_v11, 5  ;;  %3880 = vmatprep.subr.bf16.mxu1 %v3911_v36  ;;  %3739 = vmatpush3.bf16.msra.mxu0 %v3911_v36 }
   0xe   :  { %v154_v57 = vrot.slane %v153_v49, 4  ;;  %v191_v58 = vor.u32 %v190_v50, %v187_v47  ;;  %v196_v59 = vrot.slane %v194_v51, 5  ;;  %v180_v60 = vshll.u32 %v30_v19, 16  ;;  %3883 = vmatpush3.bf16.msra.mxu1 %v3911_v36  ;;  %v4158_v49 = vld [vmem:[%s6647_s0 + $0x30] sm:$0xf] }
   0xf   :  { %v149_v61 = vsel %vm4090_vm5, %v144_v53, %v148_v41  ;;  %v206_v62 = vrot.slane %v204_v54, 5  ;;  %v168_v63 = vrot.slane %v167_v55, 4  ;;  %v177_v4 = vor.u32 %v176_v20, %v172_v56  ;;  %v3912_v41 = vld [vmem:[%s6648_s1 + $0x8] sm:$0xff]   ;;  %v4163_v50 = vld [vmem:[%s6647_s0 + $0x34] sm:$0xf] }
  0x10   :  { %1717 = vrot.lane.b32.xlu1 %v4085_v44, %s3972_s16  ;;  %v159_v2 = vsel %vm4090_vm5, %v154_v57, %v158_v46  ;;  %v192_v5 = vrot.slane %v191_v58, 4  ;;  %v201_v6 = vor.u32 %v200_v52, %v196_v59  ;;  %v182_v7 = vrot.slane %v180_v60, 5  ;;  %3740 = vmatprep.subr.bf16.mxu0 %v3912_v41 }
  0x11   :  { %v3514_v11 = vcombine.low %v149_v61, %v159_v2  ;;  %v173_v12 = vsel %vm4090_vm5, %v168_v63, %v172_v56  ;;  %v178_v15 = vrot.slane %v177_v4, 4  ;;  %v3448_v16 = vrot.slane %v4021_v0, 9  ;;  %v4126_v0 = vld [vmem:[%s6647_s0 + $0x2c] sm:$0x1]  ;;  %3881 = vmatprep.subr.bf16.mxu1 %v3912_v41  ;;  %3741 = vmatpush3.bf16.msra.mxu0 %v3912_v41 }
  0x12   :  { %v197_v17 = vsel %vm4090_vm5, %v192_v5, %v196_v59  ;;  %v202_v18 = vrot.slane %v201_v6, 4  ;;  %v1019_v19 = vrot.slane %v4026_v1, 5  ;;  %v1022_v20 = vrot.slane %v33_v43, 5  ;;  %3884 = vmatpush3.bf16.msra.mxu1 %v3912_v41 }
  0x13   :  { %1555 = vrot.lane.b32.xlu0 %v3514_v11, %s3973_s21  ;;  %v183_v22 = vsel %vm4090_vm5, %v178_v15, %v182_v7  ;;  %v209_v23 = vshrl.u32 %v4104_v8, 16  ;;  %v212_v24 = vshll.u32 %v4104_v8, 16  ;;  %v222_v25 = vshrl.u32 %v4109_v9, 16 }
  0x14   :  { %v207_v1 = vsel %vm4090_vm5, %v202_v18, %v206_v62  ;;  %v3515_v26 = vcombine.low %v173_v12, %v183_v22  ;;  %v1020_v27 = vsel %vm4065_vm2, %v3448_v16, %v1019_v19  ;;  %v1021_v28 = vrot.slane %v1019_v19, 4 }
  0x15   :  { %v3516_v29 = vcombine.low %v197_v17, %v207_v1  ;;  %v211_v30 = vrot.slane %v209_v23, 4  ;;  %v214_v31 = vrot.slane %v212_v24, 5  ;;  %v218_v33 = vshll.u32 %v4109_v9, 16 }
  0x16   :  { %v1023_v32 = vsel %vm4065_vm2, %v1021_v28, %v1022_v20  ;;  %v224_v34 = vrot.slane %v222_v25, 4  ;;  %v228_v35 = vshll.u32 %v4126_v0, 16  ;;  %v4151_v45 = vcombine.low %v4104_v8, %v4109_v9 }
  0x17   :  { %1857 = vrot.lane.b32.xlu1 %v3516_v29, %s3974_s26  ;;  %1557 = vrot.lane.b32.xlu0 %v3515_v26, %s3973_s21  ;;  %v4141_v37 = vcombine.low %v1020_v27, %v1023_v32  ;;  %v215_v38 = vor.u32 %v214_v31, %v211_v30  ;;  %v220_v39 = vrot.slane %v218_v33, 5  ;;  %v1026_v53 = vrot.slane %v4109_v9, 5 }
  0x18   :  { %v230_v43 = vrot.slane %v228_v35, 5  ;;  %v233_v54 = vshrl.u32 %v4158_v49, 16  ;;  %v236_v55 = vshll.u32 %v4158_v49, 16  ;;  %v246_v56 = vshrl.u32 %v4163_v50, 16 }
  0x19   :  { %v216_v40 = vrot.slane %v215_v38, 4  ;;  %v225_v42 = vor.u32 %v224_v34, %v220_v39  ;;  %v242_v57 = vshll.u32 %v4163_v50, 16  ;;  %v3449_v58 = vrot.slane %v4104_v8, 9 }
  0x1a   :  { %v1029_v59 = vrot.slane %v4126_v0, 5  ;;  %v235_v60 = vrot.slane %v233_v54, 4  ;;  %v238_v61 = vrot.slane %v236_v55, 5 }
  0x1b   :  { %1927 = vrot.lane.b32.xlu1 %v4141_v37, %s3975_s29  ;;  %1855 = vrot.lane.b32.xlu0 %v3515_v26, %s3974_s26  ;;  %v221_v46 = vsel %vm4090_vm5, %v216_v40, %v220_v39  ;;  %v226_v47 = vrot.slane %v225_v42, 4 }
  0x1d   :  { %v231_v51 = vsel %vm4090_vm5, %v226_v47, %v230_v43 }
  0x1e   :  { %v4171_v52 = vcombine.low %v221_v46, %v231_v51 }
  0x1f   :  { %1997 = vrot.lane.b32.xlu1 %v4151_v45, %s3976_s11  ;;  %1925 = vrot.lane.b32.xlu0 %v4085_v44, %s3975_s29  ;;  %v1028_v44 = vrot.slane %v1026_v53, 4 }
  0x23   :  { %2067 = vrot.lane.b32.xlu1 %v4171_v52, %s3977_s12  ;;  %1995 = vrot.lane.b32.xlu0 %v4031_v3, %s3976_s11 }
  0x24   :  { %11 = vsyncpa [#allocation3], 0  ;;  %v39_v62 = vld [vmem:[%s6647_s0 + $0x38] sm:$0x1]  ;;  %v244_v63 = vrot.slane %v242_v57, 5  ;;  %v248_v4 = vrot.slane %v246_v56, 4  ;;  %v1027_v2 = vsel %vm4065_vm2, %v3449_v58, %v1026_v53  ;;  %v1030_v5 = vsel %vm4065_vm2, %v1028_v44, %v1029_v59 }
  0x25   :  { %v239_v6 = vor.u32 %v238_v61, %v235_v60  ;;  %v252_v7 = vshll.u32 %v39_v62, 16  ;;  %v4196_v9 = vld [vmem:[%s6647_s0 + $0x3c] sm:$0xf]  ;;  %v4201_v11 = vld [vmem:[%s6647_s0 + $0x40] sm:$0xf]  ;;  %v3549_v12 = vcombine.low %v1027_v2, %v1030_v5  ;;  %s3978_s20 = smov 32   ;;  %v4214_v24 = vcombine.low %v4158_v49, %v4163_v50 }
  0x26   :  { %v249_v8 = vor.u32 %v248_v4, %v244_v63  ;;  %v1033_v17 = vrot.slane %v4163_v50, 5  ;;  %v257_v18 = vshrl.u32 %v4196_v9, 16  ;;  %v260_v20 = vshll.u32 %v4196_v9, 16  ;;  %v42_v32 = vld [vmem:[%s6647_s0 + $0x44] sm:$0x1] }
  0x27   :  { %1559 = vrot.lane.b32.xlu1 %v3516_v29, %s3973_s21  ;;  %2065 = vrot.lane.b32.xlu0 %v3516_v29, %s3977_s12  ;;  %v240_v15 = vrot.slane %v239_v6, 4  ;;  %v254_v16 = vrot.slane %v252_v7, 5  ;;  %v270_v22 = vshrl.u32 %v4201_v11, 16  ;;  %v266_v23 = vshll.u32 %v4201_v11, 16  ;;  %v4261_v51 = vld [vmem:[%s6647_s0 + $0x4c] sm:$0xf] }
  0x28   :  { %v250_v19 = vrot.slane %v249_v8, 4  ;;  %v3450_v25 = vrot.slane %v4158_v49, 9  ;;  %v1035_v1 = vrot.slane %v1033_v17, 4  ;;  %v1036_v26 = vrot.slane %v39_v62, 5  ;;  %v4254_v49 = vld [vmem:[%s6647_s0 + $0x48] sm:$0xf] }
  0x29   :  { %v245_v0 = vsel %vm4090_vm5, %v240_v15, %v244_v63  ;;  %v259_v27 = vrot.slane %v257_v18, 4  ;;  %v262_v29 = vrot.slane %v260_v20, 5  ;;  %v268_v30 = vrot.slane %v266_v23, 5  ;;  %v45_v60 = vld [vmem:[%s6647_s0 + $0x50] sm:$0x1] }
  0x2a   :  { %v255_v28 = vsel %vm4090_vm5, %v250_v19, %v254_v16  ;;  %v272_v31 = vrot.slane %v270_v22, 4  ;;  %v1034_v34 = vsel %vm4065_vm2, %v3450_v25, %v1033_v17  ;;  %v1037_v35 = vsel %vm4065_vm2, %v1035_v1, %v1036_v26  ;;  %v3913_v2 = vld [vmem:[%s6648_s1 + $0x10] ss:$0 sps:$4 sm:$0x33]  }
  0x2b   :  { %1561 = vrot.lane.b32.xlu1 %v4171_v52, %s3973_s21  ;;  %2135 = vrot.lane.b32.xlu0 %v4141_v37, %s3978_s20  ;;  %v3518_v33 = vcombine.low %v245_v0, %v255_v28  ;;  %v263_v36 = vor.u32 %v262_v29, %v259_v27  ;;  %v276_v39 = vshll.u32 %v42_v32, 16  ;;  %v4237_v40 = vcombine.low %v1034_v34, %v1037_v35  ;;  %v48_v35 = vld [vmem:[%s6647_s0 + $0x5c] sm:$0x1] }
  0x2c   :  { %v273_v38 = vor.u32 %v272_v31, %v268_v30  ;;  %v4245_v43 = vcombine.low %v4196_v9, %v4201_v11  ;;  %v3482_v50 = vcombine.low %v4044_v10, %v4053_v14  ;;  %v1040_v53 = vrot.slane %v4201_v11, 5  ;;  %v4293_v11 = vld [vmem:[%s6647_s0 + $0x54] sm:$0xf] }
  0x2d   :  { %v264_v41 = vrot.slane %v263_v36, 4  ;;  %v281_v54 = vshrl.u32 %v4254_v49, 16  ;;  %v284_v55 = vshll.u32 %v4254_v49, 16  ;;  %v294_v56 = vshrl.u32 %v4261_v51, 16 }
  0x2e   :  { %v274_v42 = vrot.slane %v273_v38, 4  ;;  %v290_v57 = vshll.u32 %v4261_v51, 16  ;;  %v3451_v58 = vrot.slane %v4196_v9, 9  ;;  %v1042_v44 = vrot.slane %v1040_v53, 4 }
  0x2f   :  { %1721 = vrot.lane.b32.xlu1 %v3549_v12, %s3972_s16  ;;  %2137 = vrot.lane.b32.xlu0 %v3549_v12, %s3978_s20  ;;  %v269_v46 = vsel %vm4090_vm5, %v264_v41, %v268_v30  ;;  %v1043_v59 = vrot.slane %v42_v32, 5  ;;  %v283_v61 = vrot.slane %v281_v54, 4  ;;  %v286_v62 = vrot.slane %v284_v55, 5  ;;  %v49_v55 = vld [vmem:[%s6647_s0 + $0x60] sm:$0xf] }
  0x30   :  { %v292_v63 = vrot.slane %v290_v57, 5  ;;  %v296_v4 = vrot.slane %v294_v56, 4  ;;  %vm2843_vm6 = vcmask 1041408   ;;  %v1041_v5 = vsel %vm4065_vm2, %v3451_v58, %v1040_v53  ;;  %v50_v56 = vld [vmem:[%s6647_s0 + $0x64] sm:$0xf] }
  0x31   :  { %v1044_v6 = vsel %vm4065_vm2, %v1042_v44, %v1043_v59  ;;  %v287_v7 = vor.u32 %v286_v62, %v283_v61  ;;  %v300_v8 = vshll.u32 %v45_v60, 16  ;;  %3886 = vmatprep.subr.msk.bf16.mxu0 %vm2843_vm6, %v3913_v2  ;;  %3887 = vmatprep.subr.msk.bf16.mxu1 %vm2843_vm6, %v3913_v2  ;;  %v2845_v15 = vsel %vm2843_vm6, %v3913_v2, 0 }
  0x32   :  { %v297_v9 = vor.u32 %v296_v4, %v292_v63  ;;  %v3551_v16 = vcombine.low %v1041_v5, %v1044_v6  ;;  %3743 = vmatpush3.bf16.msra.mxu0 %v2845_v15  ;;  %3885 = vmatpush3.bf16.msra.mxu1 %v2845_v15  ;;  %v1047_v19 = vrot.slane %v4261_v51, 5  ;;  %v305_v20 = vshrl.u32 %v4293_v11, 16  ;;  %v51_v5 = vld [vmem:[%s6647_s0 + $0x68] sm:$0x1] }
  0x33   :  { %1791 = vrot.lane.b32.xlu1 %v4214_v24, %s3971_s7  ;;  %1719 = vrot.lane.b32.xlu0 %v4141_v37, %s3972_s16  ;;  %v278_v37 = vrot.slane %v276_v39, 5  ;;  %v288_v17 = vrot.slane %v287_v7, 4  ;;  %v302_v18 = vrot.slane %v300_v8, 5  ;;  %v308_v23 = vshll.u32 %v4293_v11, 16 }
  0x34   :  { %v298_v22 = vrot.slane %v297_v9, 4  ;;  %v4311_v1 = vcombine.low %v4254_v49, %v4261_v51  ;;  %v3452_v26 = vrot.slane %v4254_v49, 9  ;;  %v1049_v28 = vrot.slane %v1047_v19, 4 }
  0x35   :  { %v279_v47 = vsel %vm4090_vm5, %v274_v42, %v278_v37  ;;  %v293_v27 = vsel %vm4090_vm5, %v288_v17, %v292_v63  ;;  %v1050_v29 = vrot.slane %v45_v60, 5  ;;  %v307_v30 = vrot.slane %v305_v20, 4  ;;  %v4379_v17 = vld [vmem:[%s6647_s0 + $0x70] sm:$0xf] }
  0x36   :  { %v303_v31 = vsel %vm4090_vm5, %v298_v22, %v302_v18  ;;  %v310_v32 = vrot.slane %v308_v23, 5  ;;  %v1048_v38 = vsel %vm4065_vm2, %v3452_v26, %v1047_v19  ;;  %v324_v37 = vshll.u32 %v48_v35, 16 }
  0x37   :  { %1861 = vrot.lane.b32.xlu1 %v3518_v33, %s3974_s26  ;;  %1789 = vrot.lane.b32.xlu0 %v4151_v45, %s3971_s7  ;;  %v3520_v36 = vcombine.low %v293_v27, %v303_v31  ;;  %v1051_v39 = vsel %vm4065_vm2, %v1049_v28, %v1050_v29  ;;  %v329_v58 = vshrl.u32 %v49_v55, 16  ;;  %v332_v44 = vshll.u32 %v49_v55, 16 }
  0x38   :  { %v311_v41 = vor.u32 %v310_v32, %v307_v30  ;;  %v326_v51 = vrot.slane %v324_v37, 5  ;;  %v342_v59 = vshrl.u32 %v50_v56, 16  ;;  %v338_v60 = vshll.u32 %v50_v56, 16 }
  0x39   :  { %v3453_v61 = vrot.slane %v4293_v11, 9  ;;  %v1057_v63 = vrot.slane %v48_v35, 5  ;;  %v331_v4 = vrot.slane %v329_v58, 4  ;;  %v334_v2 = vrot.slane %v332_v44, 5 }
  0x3a   :  { %v340_v6 = vrot.slane %v338_v60, 5  ;;  %v344_v7 = vrot.slane %v342_v59, 4  ;;  %v1061_v22 = vrot.slane %v50_v56, 5  ;;  %v366_v26 = vshrl.u32 %v4379_v17, 16  ;;  %v4428_v59 = vld [vmem:[%s6647_s0 + $0x78] sm:$0xf] }
  0x3b   :  { %1931 = vrot.lane.b32.xlu1 %v4237_v40, %s3975_s29  ;;  %1859 = vrot.lane.b32.xlu0 %v4171_v52, %s3974_s26  ;;  %v4266_v52 = vcombine.low %v269_v46, %v279_v47  ;;  %v3552_v46 = vcombine.low %v1048_v38, %v1051_v39  ;;  %v312_v47 = vrot.slane %v311_v41, 4  ;;  %v362_v27 = vshll.u32 %v4379_v17, 16  ;;  %v54_v39 = vld [vmem:[%s6647_s0 + $0x74] sm:$0x1]  ;;  %v4433_v60 = vld [vmem:[%s6647_s0 + $0x7c] sm:$0xf] }
  0x3c   :  { %v345_v15 = vor.u32 %v344_v7, %v340_v6  ;;  %v4388_v28 = vcombine.low %v49_v55, %v50_v56  ;;  %v3454_v29 = vrot.slane %v49_v55, 9  ;;  %v1063_v31 = vrot.slane %v1061_v22, 4 }
  0x3d   :  { %v1064_v32 = vrot.slane %v51_v5, 5  ;;  %v368_v38 = vrot.slane %v366_v26, 4  ;;  %v4468_v26 = vld [vmem:[%s6647_s0 + $0x84] sm:$0xf]  ;;  %vm2199_vm7 = vcmask 31744   ;;  %vm2296_vm8 = vcmask 64512  }
  0x3e   :  { %vm2361_vm9 = vcmask 97280   ;;  %vm2426_vm10 = vcmask 130048   ;;  %vm2491_vm11 = vcmask 162816   ;;  %vm2556_vm12 = vcmask 195584  }
  0x3f   :  { %2001 = vrot.lane.b32.xlu1 %v4245_v43, %s3976_s11  ;;  %1929 = vrot.lane.b32.xlu0 %v3549_v12, %s3975_s29  ;;  %v4298_v12 = vld [vmem:[%s6647_s0 + $0x58] sm:$0xf]  ;;  %v1065_v37 = vsel %vm4065_vm2, %v1063_v31, %v1064_v32  ;;  %vm2621_vm13 = vcmask 228352   ;;  %vm2686_vm14 = vcmask 261120   ;;  %vm2778_vm15 = vcmask 293888  }
  0x40   :  { %v318_v25 = vshrl.u32 %v4298_v12, 16  ;;  %v314_v0 = vshll.u32 %v4298_v12, 16  ;;  %v1054_v57 = vrot.slane %v4298_v12, 5  ;;  %vm3981_vm0 = vmmov 0  }
  0x41   :  { %vm3430_vm1 = vcmask 254976  }
  0x42   :  { %v320_v34 = vrot.slane %v318_v25, 4  ;;  %v1056_v62 = vrot.slane %v1054_v57, 4  ;;  %v1055_v8 = vsel %vm4065_vm2, %v3453_v61, %v1054_v57  ;;  %v346_v25 = vrot.slane %v345_v15, 4 }
  0x43   :  { %2071 = vrot.lane.b32.xlu1 %v4266_v52, %s3977_s12  ;;  %1999 = vrot.lane.b32.xlu0 %v4214_v24, %s3976_s11 }
  0x44   :  { %v1058_v9 = vsel %vm4065_vm2, %v1056_v62, %v1057_v63  ;;  %v1068_v63 = vrot.slane %v4379_v17, 5 }
  0x45   :  { %v3553_v18 = vcombine.low %v1055_v8, %v1058_v9 }
  0x46   :  { %v1070_v9 = vrot.slane %v1068_v63, 4 }
  0x47   :  { %1563 = vrot.lane.b32.xlu1 %v3518_v33, %s3973_s21  ;;  %2069 = vrot.lane.b32.xlu0 %v3518_v33, %s3977_s12  ;;  %v316_v33 = vrot.slane %v314_v0, 5 }
  0x49   :  { %v321_v42 = vor.u32 %v320_v34, %v316_v33  ;;  %v317_v53 = vsel %vm4090_vm5, %v312_v47, %v316_v33 }
  0x4b   :  { %1565 = vrot.lane.b32.xlu1 %v4266_v52, %s3973_s21  ;;  %2139 = vrot.lane.b32.xlu0 %v4237_v40, %s3978_s20  ;;  %v322_v49 = vrot.slane %v321_v42, 4  ;;  %v1062_v42 = vsel %vm4065_vm2, %v3454_v29, %v1061_v22 }
  0x4d   :  { %v327_v54 = vsel %vm4090_vm5, %v322_v49, %v326_v51  ;;  %v372_v51 = vshll.u32 %v54_v39, 16 }
  0x4f   :  { %1725 = vrot.lane.b32.xlu1 %v3551_v16, %s3972_s16  ;;  %2141 = vrot.lane.b32.xlu0 %v3551_v16, %s3978_s20  ;;  %v374_v56 = vrot.slane %v372_v51, 5 }
  0x53   :  { %1795 = vrot.lane.b32.xlu1 %v4311_v1, %s3971_s7  ;;  %1723 = vrot.lane.b32.xlu0 %v4237_v40, %s3972_s16  ;;  %v4339_v40 = vcombine.low %v4293_v11, %v4298_v12  ;;  %v335_v11 = vor.u32 %v334_v2, %v331_v4  ;;  %v348_v12 = vshll.u32 %v51_v5, 16  ;;  %v377_v4 = vshrl.u32 %v4428_v59, 16 }
  0x54   :  { %v380_v2 = vshll.u32 %v4428_v59, 16  ;;  %v390_v5 = vshrl.u32 %v4433_v60, 16 }
  0x55   :  { %v336_v19 = vrot.slane %v335_v11, 4  ;;  %v350_v20 = vrot.slane %v348_v12, 5  ;;  %v1071_v11 = vrot.slane %v54_v39, 5  ;;  %v379_v12 = vrot.slane %v377_v4, 4 }
  0x56   :  { %v382_v15 = vrot.slane %v380_v2, 5  ;;  %v4506_v2 = vld [vmem:[%s6647_s0 + $0x8c] sm:$0x1] }
  0x57   :  { %1865 = vrot.lane.b32.xlu1 %v3520_v36, %s3974_s26  ;;  %1793 = vrot.lane.b32.xlu0 %v4245_v43, %s3971_s7  ;;  %v341_v30 = vsel %vm4090_vm5, %v336_v19, %v340_v6  ;;  %v351_v34 = vsel %vm4090_vm5, %v346_v25, %v350_v20  ;;  %v386_v6 = vshll.u32 %v4433_v60, 16  ;;  %v392_v19 = vrot.slane %v390_v5, 4 }
  0x58   :  { %v3522_v41 = vcombine.low %v341_v30, %v351_v34  ;;  %v1072_v22 = vsel %vm4065_vm2, %v1070_v9, %v1071_v11  ;;  %v4475_v30 = vld [vmem:[%s6647_s0 + $0x88] sm:$0xf]  ;;  %v1075_v34 = vrot.slane %v4433_v60, 5  ;;  %v420_v10 = vshll.u32 %v4506_v2, 16 }
  0x59   :  { %v414_v39 = vshrl.u32 %v4475_v30, 16 }
  0x5b   :  { %1935 = vrot.lane.b32.xlu1 %v3552_v46, %s3975_s29  ;;  %1863 = vrot.lane.b32.xlu0 %v4266_v52, %s3974_s26  ;;  %v4354_v52 = vcombine.low %v317_v53, %v327_v54  ;;  %v4409_v53 = vcombine.low %v1062_v42, %v1065_v37 }
  0x5f   :  { %2005 = vrot.lane.b32.xlu1 %v4339_v40, %s3976_s11  ;;  %1933 = vrot.lane.b32.xlu0 %v3551_v16, %s3975_s29  ;;  %v4374_v16 = vld [vmem:[%s6647_s0 + $0x6c] sm:$0xf] }
  0x60   :  { %v353_v23 = vshrl.u32 %v4374_v16, 16  ;;  %v356_v0 = vshll.u32 %v4374_v16, 16  ;;  %v4419_v57 = vcombine.low %v4374_v16, %v4379_v17  ;;  %v3455_v7 = vrot.slane %v4374_v16, 9  ;;  %v57_v17 = vld [vmem:[%s6647_s0 + $0x80] sm:$0x1] }
  0x61   :  { %v396_v25 = vshll.u32 %v57_v17, 16 }
  0x62   :  { %v355_v33 = vrot.slane %v353_v23, 4  ;;  %v358_v35 = vrot.slane %v356_v0, 5  ;;  %v1069_v16 = vsel %vm4065_vm2, %v3455_v7, %v1068_v63  ;;  %v383_v23 = vor.u32 %v382_v15, %v379_v12 }
  0x63   :  { %2075 = vrot.lane.b32.xlu1 %v4354_v52, %s3977_s12  ;;  %2003 = vrot.lane.b32.xlu0 %v4311_v1, %s3976_s11  ;;  %v4477_v31 = vcombine.low %v1069_v16, %v1072_v22  ;;  %v416_v63 = vrot.slane %v414_v39, 4 }
  0x64   :  { %v359_v47 = vor.u32 %v358_v35, %v355_v33  ;;  %v384_v32 = vrot.slane %v383_v23, 4  ;;  %v398_v33 = vrot.slane %v396_v25, 5  ;;  %v401_v35 = vshrl.u32 %v4468_v26, 16 }
  0x67   :  { %1567 = vrot.lane.b32.xlu1 %v3520_v36, %s3973_s21  ;;  %2073 = vrot.lane.b32.xlu0 %v3520_v36, %s3977_s12  ;;  %v364_v36 = vrot.slane %v362_v27, 5 }
  0x69   :  { %v369_v49 = vor.u32 %v368_v38, %v364_v36  ;;  %v404_v38 = vshll.u32 %v4468_v26, 16 }
  0x6b   :  { %1569 = vrot.lane.b32.xlu1 %v4354_v52, %s3973_s21  ;;  %2143 = vrot.lane.b32.xlu0 %v3552_v46, %s3978_s20  ;;  %v370_v55 = vrot.slane %v369_v49, 4  ;;  %v3456_v49 = vrot.slane %v4428_v59, 9 }
  0x6d   :  { %v375_v44 = vsel %vm4090_vm5, %v370_v55, %v374_v56  ;;  %v1078_v55 = vrot.slane %v57_v17, 5  ;;  %v403_v56 = vrot.slane %v401_v35, 4  ;;  %v1076_v5 = vsel %vm4065_vm2, %v3456_v49, %v1075_v34 }
  0x6f   :  { %1729 = vrot.lane.b32.xlu1 %v3553_v18, %s3972_s16  ;;  %2145 = vrot.lane.b32.xlu0 %v3553_v18, %s3978_s20 }
  0x73   :  { %1799 = vrot.lane.b32.xlu1 %v4388_v28, %s3971_s7  ;;  %1727 = vrot.lane.b32.xlu0 %v3552_v46, %s3972_s16  ;;  %v360_v46 = vrot.slane %v359_v47, 4  ;;  %v4492_v47 = vcombine.low %v4428_v59, %v4433_v60 }
  0x75   :  { %v365_v58 = vsel %vm4090_vm5, %v360_v46, %v364_v36  ;;  %v1077_v46 = vrot.slane %v1075_v34, 4 }
  0x76   :  { %v4411_v54 = vpop.permute.xlu1 %1787  ;;  %v4442_v62 = vcombine.low %v365_v58, %v375_v44  ;;  %v406_v44 = vrot.slane %v404_v38, 5  ;;  %v1082_v38 = vrot.slane %v4475_v30, 5 }
  0x77   :  { %1869 = vrot.lane.b32.xlu1 %v3522_v41, %s3974_s26  ;;  %1797 = vrot.lane.b32.xlu0 %v4339_v40, %s3971_s7  ;;  %v1079_v11 = vsel %vm4065_vm2, %v1077_v46, %v1078_v55 }
  0x78   :  { %v4440_v61 = vpop.permute.xlu0 %1785  ;;  %v407_v12 = vor.u32 %v406_v44, %v403_v56  ;;  %v1084_v44 = vrot.slane %v1082_v38, 4 }
  0x7b   :  { %1939 = vrot.lane.b32.xlu1 %v4409_v53, %s3975_s29  ;;  %1867 = vrot.lane.b32.xlu0 %v4354_v52, %s3974_s26 }
  0x7e   :  { %v4435_v52 = vpop.permute.xlu1 %1715 }
  0x7f   :  { %2009 = vrot.lane.b32.xlu1 %v4419_v57, %s3976_s11  ;;  %1937 = vrot.lane.b32.xlu0 %v3553_v18, %s3975_s29  ;;  %v388_v18 = vrot.slane %v386_v6, 5 }
  0x81   :  { %v393_v0 = vor.u32 %v392_v19, %v388_v18  ;;  %v389_v51 = vsel %vm4090_vm5, %v384_v32, %v388_v18  ;;  %v408_v18 = vrot.slane %v407_v12, 4 }
  0x82   :  { %v4454_v8 = vpop.permute.xlu1 %1717 }
  0x83   :  { %2079 = vrot.lane.b32.xlu1 %v4442_v62, %s3977_s12  ;;  %2007 = vrot.lane.b32.xlu0 %v4388_v28, %s3976_s11  ;;  %v394_v36 = vrot.slane %v393_v0, 4 }
  0x85   :  { %v1556_v20 = vpop.permute.xlu0 %1555  ;;  %v399_v58 = vsel %vm4090_vm5, %v394_v36, %v398_v33 }
  0x86   :  { %v2202_v6 = vsel %vm2199_vm7, %v3482_v50, %v1556_v20  ;;  %v4520_v9 = vcombine.low %v389_v51, %v399_v58  ;;  %v422_v20 = vrot.slane %v420_v10, 5  ;;  %v3457_v58 = vrot.slane %v4468_v26, 9 }
  0x87   :  { %1571 = vrot.lane.b32.xlu1 %v3522_v41, %s3973_s21  ;;  %2077 = vrot.lane.b32.xlu0 %v3522_v41, %s3977_s12  ;;  %v410_v41 = vshll.u32 %v4475_v30, 16 }
  0x89   :  { %v4470_v27 = vpop.permute.xlu1 %1857  ;;  %v1558_v29 = vpop.permute.xlu0 %1557  ;;  %v412_v60 = vrot.slane %v410_v41, 5 }
  0x8a   :  { %v2205_v7 = vsel %vm2199_vm7, %v4048_v13, %v1558_v29  ;;  %v2298_v13 = vsel %vm2296_vm8, %v2202_v6, %v4435_v52 }
  0x8b   :  { %1573 = vrot.lane.b32.xlu1 %v4442_v62, %s3973_s21  ;;  %2147 = vrot.lane.b32.xlu0 %v4409_v53, %s3978_s20  ;;  %v417_v15 = vor.u32 %v416_v63, %v412_v60  ;;  %v2300_v17 = vsel %vm2296_vm8, %v2205_v7, %v4454_v8  ;;  %v2363_v52 = vsel %vm2361_vm9, %v2298_v13, %v4440_v61 }
  0x8c   :  { %v2365_v16 = vsel %vm2361_vm9, %v2300_v17, %v4411_v54  ;;  %v4549_v54 = vcombine.low %v4468_v26, %v4475_v30  ;;  %v413_v29 = vsel %vm4090_vm5, %v408_v18, %v412_v60  ;;  %v1085_v60 = vrot.slane %v4506_v2, 5 }
  0x8d   :  { %v4488_v42 = vpop.permute.xlu1 %1927  ;;  %v1856_v37 = vpop.permute.xlu0 %1855  ;;  %v418_v19 = vrot.slane %v417_v15, 4  ;;  %v2430_v61 = vsel %vm2426_vm10, %v2365_v16, %v4470_v27  ;;  %v4569_v27 = vld [vmem:[%s6647_s0 + $0x94] sm:$0xf]  ;;  %v1083_v2 = vsel %vm4065_vm2, %v3457_v58, %v1082_v38 }
  0x8e   :  { %v2428_v23 = vsel %vm2426_vm10, %v2363_v52, %v1856_v37  ;;  %v2495_v39 = vsel %vm2491_vm11, %v2430_v61, %v4488_v42  ;;  %v438_v30 = vshrl.u32 %v4569_v27, 16  ;;  %v434_v42 = vshll.u32 %v4569_v27, 16 }
  0x8f   :  { %1733 = vrot.lane.b32.xlu1 %v4477_v31, %s3972_s16  ;;  %2149 = vrot.lane.b32.xlu0 %v4477_v31, %s3978_s20  ;;  %v423_v32 = vsel %vm4090_vm5, %v418_v19, %v422_v20  ;;  %v1089_v20 = vrot.slane %v4569_v27, 5 }
  0x90   :  { %v4579_v41 = vcombine.low %v413_v29, %v423_v32  ;;  %v440_v6 = vrot.slane %v438_v30, 4  ;;  %v4650_v30 = vld [vmem:[%s6647_s0 + $0xa4] sm:$0x1] }
  0x91   :  { %v1998_v4 = vpop.permute.xlu1 %1997  ;;  %v1926_v59 = vpop.permute.xlu0 %1925 }
  0x92   :  { %v2493_v25 = vsel %vm2491_vm11, %v2428_v23, %v1926_v59  ;;  %v2560_v51 = vsel %vm2556_vm12, %v2495_v39, %v1998_v4  ;;  %v63_v59 = vld [vmem:[%s6647_s0 + $0x98] sm:$0x1] }
  0x93   :  { %1803 = vrot.lane.b32.xlu1 %v4492_v47, %s3971_s7  ;;  %1731 = vrot.lane.b32.xlu0 %v4409_v53, %s3972_s16  ;;  %v4533_v53 = vcombine.low %v1076_v5, %v1079_v11  ;;  %v436_v5 = vrot.slane %v434_v42, 5  ;;  %v1086_v11 = vsel %vm4065_vm2, %v1084_v44, %v1085_v60  ;;  %v444_v15 = vshll.u32 %v63_v59, 16 }
  0x94   :  { %v4623_v17 = vcombine.low %v1083_v2, %v1086_v11  ;;  %v468_v44 = vshll.u32 %v4650_v30, 16 }
  0x95   :  { %v2068_v14 = vpop.permute.xlu1 %2067  ;;  %v1996_v50 = vpop.permute.xlu0 %1995  ;;  %v441_v10 = vor.u32 %v440_v6, %v436_v5  ;;  %v446_v19 = vrot.slane %v444_v15, 5 }
  0x96   :  { %v2558_v0 = vsel %vm2556_vm12, %v2493_v25, %v1996_v50  ;;  %v2625_v46 = vsel %vm2621_vm13, %v2560_v51, %v2068_v14  ;;  %v4614_v14 = vld [vmem:[%s6647_s0 + $0x9c] sm:$0xf]  ;;  %v470_v11 = vrot.slane %v468_v44, 5  ;;  %v4760_v44 = vld [vmem:[%s6647_s0 + $0xb8] sm:$0xf] }
  0x97   :  { %1873 = vrot.lane.b32.xlu1 %v4520_v9, %s3974_s26  ;;  %1801 = vrot.lane.b32.xlu0 %v4419_v57, %s3971_s7  ;;  %v449_v16 = vshrl.u32 %v4614_v14, 16  ;;  %v442_v52 = vrot.slane %v441_v10, 4 }
  0x99   :  { %v4539_v8 = vpop.permute.xlu1 %1559  ;;  %v2066_v22 = vpop.permute.xlu0 %2065  ;;  %v451_v38 = vrot.slane %v449_v16, 4  ;;  %v447_v39 = vsel %vm4090_vm5, %v442_v52, %v446_v19  ;;  %v4709_v52 = vld [vmem:[%s6647_s0 + $0xac] sm:$0xf] }
  0x9a   :  { %v2623_v33 = vsel %vm2621_vm13, %v2558_v0, %v2066_v22  ;;  %v452_v22 = vshll.u32 %v4614_v14, 16 }
  0x9b   :  { %1943 = vrot.lane.b32.xlu1 %v4533_v53, %s3975_s29  ;;  %1871 = vrot.lane.b32.xlu0 %v4442_v62, %s3974_s26  ;;  %v4561_v62 = vld [vmem:[%s6647_s0 + $0x90] sm:$0xf] }
  0x9c   :  { %v425_v37 = vshrl.u32 %v4561_v62, 16  ;;  %v428_v49 = vshll.u32 %v4561_v62, 16  ;;  %v4636_v29 = vcombine.low %v4561_v62, %v4569_v27  ;;  %v3458_v32 = vrot.slane %v4561_v62, 9 }
  0x9d   :  { %v4564_v34 = vpop.permute.xlu1 %1561  ;;  %v2136_v35 = vpop.permute.xlu0 %2135 }
  0x9e   :  { %v2688_v36 = vsel %vm2686_vm14, %v2623_v33, %v2136_v35  ;;  %v427_v63 = vrot.slane %v425_v37, 4  ;;  %v430_v4 = vrot.slane %v428_v49, 5  ;;  %v1091_v35 = vrot.slane %v1089_v20, 4 }
  0x9f   :  { %2013 = vrot.lane.b32.xlu1 %v4549_v54, %s3976_s11  ;;  %1941 = vrot.lane.b32.xlu0 %v4477_v31, %s3975_s29  ;;  %v454_v37 = vrot.slane %v452_v22, 5 }
  0xa0   :  { %3744 = vmatprep.mubr.msk.bf16.mxu0 %vm2778_vm15, %v2688_v36  ;;  %v431_v12 = vor.u32 %v430_v4, %v427_v63  ;;  %v1092_v36 = vrot.slane %v63_v59, 5  ;;  %v2208_v4 = vsel %vm2199_vm7, %v4031_v3, %v4539_v8 }
  0xa1   :  { %v4588_v55 = vpop.permute.xlu1 %1721  ;;  %v2138_v56 = vpop.permute.xlu0 %2137 }
  0xa2   :  { %v2690_v31 = vsel %vm2686_vm14, %v2625_v46, %v2138_v56  ;;  %v432_v18 = vrot.slane %v431_v12, 4  ;;  %v1090_v46 = vsel %vm4065_vm2, %v3458_v32, %v1089_v20  ;;  %v1093_v56 = vsel %vm4065_vm2, %v1091_v35, %v1092_v36 }
  0xa3   :  { %2083 = vrot.lane.b32.xlu1 %v4579_v41, %s3977_s12  ;;  %2011 = vrot.lane.b32.xlu0 %v4492_v47, %s3976_s11  ;;  %v4673_v59 = vcombine.low %v1090_v46, %v1093_v56 }
  0xa4   :  { %3745 = vmatmul.mubr.msk.bf16.vlgmr.msra.gmra.mrb[0].mxu0 %vm2778_vm15, %v2690_v31  ;;  %v437_v33 = vsel %vm4090_vm5, %v432_v18, %v436_v5  ;;  %v455_v31 = vor.u32 %v454_v37, %v451_v38  ;;  %v4699_v18 = vld [vmem:[%s6647_s0 + $0xa8] sm:$0xf]  ;;  %v1099_v37 = vrot.slane %v4650_v30, 5 }
  0xa5   :  { %v4601_v26 = vpop.permute.xlu1 %1791  ;;  %v1720_v7 = vpop.permute.xlu0 %1719  ;;  %v4656_v42 = vcombine.low %v437_v33, %v447_v39  ;;  %v473_v32 = vshrl.u32 %v4699_v18, 16  ;;  %v3459_v39 = vrot.slane %v4614_v14, 9 }
  0xa6   :  { %v2302_v5 = vsel %vm2296_vm8, %v2208_v4, %v1720_v7  ;;  %v456_v6 = vrot.slane %v455_v31, 4 }
  0xa7   :  { %1575 = vrot.lane.b32.xlu1 %v4520_v9, %s3973_s21  ;;  %2081 = vrot.lane.b32.xlu0 %v4520_v9, %s3977_s12  ;;  %v4621_v9 = vld [vmem:[%s6647_s0 + $0xa0] sm:$0xf] }
  0xa8   :  { %v462_v23 = vshrl.u32 %v4621_v9, 16  ;;  %v458_v25 = vshll.u32 %v4621_v9, 16  ;;  %v4689_v7 = vcombine.low %v4614_v14, %v4621_v9  ;;  %v69_v14 = vld [vmem:[%s6647_s0 + $0xb0] sm:$0x1] }
  0xa9   :  { %v4616_v50 = vpop.permute.xlu1 %1861  ;;  %v1790_v13 = vpop.permute.xlu0 %1789 }
  0xaa   :  { %v460_v27 = vrot.slane %v458_v25, 5  ;;  %v464_v49 = vrot.slane %v462_v23, 4  ;;  %v2367_v12 = vsel %vm2361_vm9, %v2302_v5, %v1790_v13 }
  0xab   :  { %1577 = vrot.lane.b32.xlu1 %v4579_v41, %s3973_s21  ;;  %2151 = vrot.lane.b32.xlu0 %v4533_v53, %s3978_s20 }
  0xac   :  { %v465_v58 = vor.u32 %v464_v49, %v460_v27  ;;  %v461_v13 = vsel %vm4090_vm5, %v456_v6, %v460_v27  ;;  %v475_v49 = vrot.slane %v473_v32, 4  ;;  %v1103_v6 = vrot.slane %v4709_v52, 5 }
  0xad   :  { %v1932_v61 = vpop.permute.xlu1 %1931  ;;  %v1860_v0 = vpop.permute.xlu0 %1859  ;;  %v4788_v32 = vcombine.low %v4699_v18, %v4709_v52 }
  0xae   :  { %v466_v2 = vrot.slane %v465_v58, 4  ;;  %v4755_v58 = vld [vmem:[%s6647_s0 + $0xb4] sm:$0xf] }
  0xaf   :  { %1737 = vrot.lane.b32.xlu1 %v4623_v17, %s3972_s16  ;;  %2153 = vrot.lane.b32.xlu0 %v4623_v17, %s3978_s20 }
  0xb1   :  { %v2002_v51 = vpop.permute.xlu1 %2001  ;;  %v1930_v62 = vpop.permute.xlu0 %1929 }
  0xb3   :  { %1807 = vrot.lane.b32.xlu1 %v4636_v29, %s3971_s7  ;;  %1735 = vrot.lane.b32.xlu0 %v4533_v53, %s3972_s16  ;;  %v2211_v53 = vsel %vm2199_vm7, %v4151_v45, %v4564_v34  ;;  %v2432_v34 = vsel %vm2426_vm10, %v2367_v12, %v1860_v0  ;;  %v1096_v0 = vrot.slane %v4621_v9, 5  ;;  %v482_v9 = vshll.u32 %v4709_v52, 16 }
  0xb4   :  { %v2304_v45 = vsel %vm2296_vm8, %v2211_v53, %v4588_v55  ;;  %v2497_v15 = vsel %vm2491_vm11, %v2432_v34, %v1930_v62  ;;  %v471_v55 = vsel %vm4090_vm5, %v466_v2, %v470_v11  ;;  %v492_v53 = vshll.u32 %v69_v14, 16 }
  0xb5   :  { %v2072_v60 = vpop.permute.xlu1 %2071  ;;  %v2000_v63 = vpop.permute.xlu0 %1999  ;;  %v1098_v27 = vrot.slane %v1096_v0, 4  ;;  %v484_v62 = vrot.slane %v482_v9, 5  ;;  %v1097_v30 = vsel %vm4065_vm2, %v3459_v39, %v1096_v0  ;;  %v497_v2 = vshrl.u32 %v4755_v58, 16 }
  0xb6   :  { %v2562_v10 = vsel %vm2556_vm12, %v2497_v15, %v2000_v63  ;;  %v500_v11 = vshll.u32 %v4755_v58, 16  ;;  %v510_v12 = vshrl.u32 %v4760_v44, 16 }
  0xb7   :  { %1877 = vrot.lane.b32.xlu1 %v4656_v42, %s3974_s26  ;;  %1805 = vrot.lane.b32.xlu0 %v4549_v54, %s3971_s7 }
  0xb8   :  { %v512_v0 = vrot.slane %v510_v12, 4 }
  0xb9   :  { %v4677_v3 = vpop.permute.xlu1 %1563  ;;  %v2070_v8 = vpop.permute.xlu0 %2069 }
  0xba   :  { %v2627_v19 = vsel %vm2621_vm13, %v2562_v10, %v2070_v8  ;;  %v506_v8 = vshll.u32 %v4760_v44, 16  ;;  %v494_v10 = vrot.slane %v492_v53, 5 }
  0xbb   :  { %1947 = vrot.lane.b32.xlu1 %v4673_v59, %s3975_s29  ;;  %1875 = vrot.lane.b32.xlu0 %v4579_v41, %s3974_s26  ;;  %v2369_v41 = vsel %vm2361_vm9, %v2304_v45, %v4601_v26  ;;  %v4720_v26 = vcombine.low %v461_v13, %v471_v55 }
  0xbc   :  { %v2434_v22 = vsel %vm2426_vm10, %v2369_v41, %v4616_v50  ;;  %v476_v50 = vshll.u32 %v4699_v18, 16  ;;  %v3460_v41 = vrot.slane %v4699_v18, 9 }
  0xbd   :  { %v4704_v20 = vpop.permute.xlu1 %1565  ;;  %v2140_v16 = vpop.permute.xlu0 %2139  ;;  %v2499_v25 = vsel %vm2491_vm11, %v2434_v22, %v1932_v61  ;;  %v486_v61 = vshrl.u32 %v4709_v52, 16  ;;  %v499_v22 = vrot.slane %v497_v2, 4 }
  0xbe   :  { %v2692_v23 = vsel %vm2686_vm14, %v2627_v19, %v2140_v16  ;;  %v2564_v33 = vsel %vm2556_vm12, %v2499_v25, %v2002_v51  ;;  %v478_v51 = vrot.slane %v476_v50, 5  ;;  %v1105_v19 = vrot.slane %v1103_v6, 4 }
  0xbf   :  { %2017 = vrot.lane.b32.xlu1 %v4689_v7, %s3976_s11  ;;  %1945 = vrot.lane.b32.xlu0 %v4623_v17, %s3975_s29  ;;  %v2629_v35 = vsel %vm2621_vm13, %v2564_v33, %v2072_v60  ;;  %v488_v46 = vrot.slane %v486_v61, 4  ;;  %v1100_v60 = vsel %vm4065_vm2, %v1098_v27, %v1099_v37  ;;  %v1106_v16 = vrot.slane %v69_v14, 5  ;;  %v4793_v33 = vld [vmem:[%s6647_s0 + $0xbc] sm:$0x1]  ;;  %v4810_v37 = vld [vmem:[%s6647_s0 + $0x12c] sm:$0xf] }
  0xc0   :  { %3748 = vmatprep.mubr.msk.bf16.mxu0 %vm2778_vm15, %v2692_v23  ;;  %v479_v63 = vor.u32 %v478_v51, %v475_v49  ;;  %v4775_v45 = vcombine.low %v1097_v30, %v1100_v60  ;;  %v502_v23 = vrot.slane %v500_v11, 5  ;;  %v4780_v25 = vrot.slane %v506_v8, 5  ;;  %v4821_v49 = vld [vmem:[%s6647_s0 + $0x130] sm:$0xf]  ;;  %v4826_v51 = vld [vmem:[%s6647_s0 + $0x120] sm:$0xf] }
  0xc1   :  { %v4729_v36 = vpop.permute.xlu1 %1725  ;;  %v2142_v38 = vpop.permute.xlu0 %2141  ;;  %v489_v4 = vor.u32 %v488_v46, %v484_v62  ;;  %v1107_v18 = vsel %vm4065_vm2, %v1105_v19, %v1106_v16  ;;  %v516_v39 = vshll.u32 %v4793_v33, 16  ;;  %v689_v30 = vshrl.u32 %v4810_v37, 16 }
  0xc2   :  { %v2694_v17 = vsel %vm2686_vm14, %v2629_v35, %v2142_v38  ;;  %v480_v34 = vrot.slane %v479_v63, 4  ;;  %v1104_v38 = vsel %vm4065_vm2, %v3460_v41, %v1103_v6  ;;  %v503_v52 = vor.u32 %v502_v23, %v499_v22  ;;  %v4841_v63 = vld [vmem:[%s6647_s0 + $0x124] sm:$0xf] }
  0xc3   :  { %2087 = vrot.lane.b32.xlu1 %v4720_v26, %s3977_s12  ;;  %2015 = vrot.lane.b32.xlu0 %v4636_v29, %s3976_s11  ;;  %v490_v15 = vrot.slane %v489_v4, 4  ;;  %v4830_v14 = vcombine.low %v1104_v38, %v1107_v18  ;;  %v692_v60 = vshll.u32 %v4810_v37, 16  ;;  %v518_v6 = vrot.slane %v516_v39, 5 }
  0xc4   :  { %3749 = vmatmul.mubr.msk.bf16.gmra.mrb[4].mxu0 %vm2778_vm15, %v2694_v17  ;;  %v485_v50 = vsel %vm4090_vm5, %v480_v34, %v484_v62  ;;  %v513_v17 = vor.u32 %v512_v0, %v4780_v25  ;;  %v504_v4 = vrot.slane %v503_v52, 4  ;;  %v698_v2 = vshll.u32 %v4821_v49, 16 }
  0xc5   :  { %v4739_v56 = vpop.permute.xlu1 %1795  ;;  %v4741_v31 = vpop.permute.xlu0 %1723  ;;  %v495_v61 = vsel %vm4090_vm5, %v490_v15, %v494_v10  ;;  %v2214_v11 = vsel %vm2199_vm7, %v4214_v24, %v4677_v3  ;;  %v2217_v12 = vsel %vm2199_vm7, %v4245_v43, %v4704_v20  ;;  %v702_v8 = vshrl.u32 %v4821_v49, 16 }
  0xc6   :  { %v4816_v27 = vcombine.low %v485_v50, %v495_v61  ;;  %v514_v53 = vrot.slane %v513_v17, 4  ;;  %v665_v34 = vshrl.u32 %v4826_v51, 16  ;;  %v2306_v15 = vsel %vm2296_vm8, %v2214_v11, %v4741_v31 }
  0xc7   :  { %1579 = vrot.lane.b32.xlu1 %v4656_v42, %s3973_s21  ;;  %2085 = vrot.lane.b32.xlu0 %v4656_v42, %s3977_s12  ;;  %v668_v10 = vshll.u32 %v4826_v51, 16  ;;  %v674_v24 = vshll.u32 %v4841_v63, 16  ;;  %v678_v3 = vshrl.u32 %v4841_v63, 16  ;;  %v1110_v19 = vrot.slane %v4760_v44, 5 }
  0xc8   :  { %v691_v16 = vrot.slane %v689_v30, 4  ;;  %v694_v22 = vrot.slane %v692_v60, 5  ;;  %v2308_v23 = vsel %vm2296_vm8, %v2217_v12, %v4729_v36  ;;  %v509_v0 = vsel %vm4090_vm5, %v504_v4, %v4780_v25  ;;  %v4884_v25 = vld [vmem:[%s6647_s0 + $0x134] sm:$0x1] }
  0xc9   :  { %v4764_v42 = vpop.permute.xlu1 %1865  ;;  %v1794_v5 = vpop.permute.xlu0 %1793  ;;  %v4871_v50 = vrot.slane %v698_v2, 5  ;;  %v704_v36 = vrot.slane %v702_v8, 4  ;;  %v667_v61 = vrot.slane %v665_v34, 4  ;;  %v670_v38 = vrot.slane %v668_v10, 5 }
  0xca   :  { %v2371_v43 = vsel %vm2361_vm9, %v2306_v15, %v1794_v5  ;;  %v680_v18 = vrot.slane %v678_v3, 4  ;;  %v2373_v52 = vsel %vm2361_vm9, %v2308_v23, %v4739_v56  ;;  %v3461_v30 = vrot.slane %v4755_v58, 9 }
  0xcb   :  { %1581 = vrot.lane.b32.xlu1 %v4720_v26, %s3973_s21  ;;  %2155 = vrot.lane.b32.xlu0 %v4673_v59, %s3978_s20  ;;  %v1112_v60 = vrot.slane %v1110_v19, 4  ;;  %v2438_v4 = vsel %vm2426_vm10, %v2373_v52, %v4764_v42  ;;  %v695_v56 = vor.u32 %v694_v22, %v691_v16  ;;  %v705_v11 = vor.u32 %v704_v36, %v4871_v50 }
  0xcc   :  { %v708_v42 = vshll.u32 %v4884_v25, 16 }
  0xcd   :  { %v4777_v13 = vpop.permute.xlu1 %1935  ;;  %v1864_v55 = vpop.permute.xlu0 %1863  ;;  %v696_v3 = vrot.slane %v695_v56, 4 }
  0xce   :  { %v2436_v31 = vsel %vm2426_vm10, %v2371_v43, %v1864_v55  ;;  %v2503_v2 = vsel %vm2491_vm11, %v2438_v4, %v4777_v13  ;;  %v710_v43 = vrot.slane %v708_v42, 5  ;;  %v1169_v4 = vrot.slane %v4884_v25, 5  ;;  %v4989_v25 = vld [vmem:[%s6647_s0 + $0xc0] sm:$0xf] }
  0xcf   :  { %1741 = vrot.lane.b32.xlu1 %v4775_v45, %s3972_s16  ;;  %2157 = vrot.lane.b32.xlu0 %v4775_v45, %s3978_s20 }
  0xd1   :  { %v4799_v9 = vpop.permute.xlu1 %2005  ;;  %v1934_v35 = vpop.permute.xlu0 %1933 }
  0xd2   :  { %v2501_v5 = vsel %vm2491_vm11, %v2436_v31, %v1934_v35  ;;  %v676_v35 = vrot.slane %v674_v24, 5  ;;  %v2568_v12 = vsel %vm2556_vm12, %v2503_v2, %v4799_v9  ;;  %v1111_v24 = vsel %vm4065_vm2, %v3461_v30, %v1110_v19 }
  0xd3   :  { %1811 = vrot.lane.b32.xlu1 %v4788_v32, %s3971_s7  ;;  %1739 = vrot.lane.b32.xlu0 %v4673_v59, %s3972_s16  ;;  %v4834_v59 = vcombine.low %v4755_v58, %v4760_v44  ;;  %v519_v44 = vsel %vm4090_vm5, %v514_v53, %v518_v6  ;;  %v1113_v6 = vrot.slane %v4793_v33, 5  ;;  %v671_v33 = vor.u32 %v670_v38, %v667_v61 }
  0xd4   :  { %v4905_v58 = vcombine.low %v509_v0, %v519_v44  ;;  %v681_v8 = vor.u32 %v680_v18, %v676_v35  ;;  %v1166_v18 = vrot.slane %v4821_v49, 5 }
  0xd5   :  { %v4828_v62 = vpop.permute.xlu1 %2075  ;;  %v2004_v46 = vpop.permute.xlu0 %2003  ;;  %v1114_v9 = vsel %vm4065_vm2, %v1112_v60, %v1113_v6  ;;  %v672_v16 = vrot.slane %v671_v33, 4  ;;  %v3469_v60 = vrot.slane %v4810_v37, 9 }
  0xd6   :  { %v2566_v55 = vsel %vm2556_vm12, %v2501_v5, %v2004_v46  ;;  %v99_v46 = vld [vmem:[%s6647_s0 + $0x128] sm:$0x1]  ;;  %v2633_v34 = vsel %vm2621_vm13, %v2568_v12, %v4828_v62  ;;  %v1159_v62 = vrot.slane %v4841_v63, 5  ;;  %v682_v22 = vrot.slane %v681_v8, 4 }
  0xd7   :  { %1881 = vrot.lane.b32.xlu1 %v4816_v27, %s3974_s26  ;;  %1809 = vrot.lane.b32.xlu0 %v4689_v7, %s3971_s7  ;;  %v684_v13 = vshll.u32 %v99_v46, 16  ;;  %v4931_v0 = vcombine.low %v1111_v24, %v1114_v9  ;;  %v701_v63 = vsel %vm4090_vm5, %v696_v3, %v4871_v50  ;;  %v3468_v5 = vrot.slane %v4826_v51, 9  ;;  %v4953_v51 = vld [vmem:[%s6647_s0 + $0x138] sm:$0xf]  ;;  %v4958_v50 = vld [vmem:[%s6647_s0 + $0x13c] sm:$0xf] }
  0xd8   :  { %v1161_v44 = vrot.slane %v1159_v62, 4  ;;  %v1162_v36 = vrot.slane %v99_v46, 5  ;;  %v1168_v46 = vrot.slane %v1166_v18, 4  ;;  %v713_v56 = vshrl.u32 %v4953_v51, 16 }
  0xd9   :  { %v4862_v20 = vpop.permute.xlu1 %1567  ;;  %v2074_v41 = vpop.permute.xlu0 %2073  ;;  %v686_v23 = vrot.slane %v684_v13, 5  ;;  %v716_v2 = vshll.u32 %v4953_v51, 16  ;;  %v722_v42 = vshll.u32 %v4958_v50, 16  ;;  %v1167_v33 = vsel %vm4065_vm2, %v3469_v60, %v1166_v18  ;;  %v4998_v13 = vld [vmem:[%s6647_s0 + $0xc4] sm:$0xf] }
  0xda   :  { %v1163_v30 = vsel %vm4065_vm2, %v1161_v44, %v1162_v36  ;;  %v1170_v8 = vsel %vm4065_vm2, %v1168_v46, %v1169_v4  ;;  %v5040_v46 = vld [vmem:[%s6647_s0 + $0xc8] sm:$0x1] }
  0xdb   :  { %1951 = vrot.lane.b32.xlu1 %v4830_v14, %s3975_s29  ;;  %1879 = vrot.lane.b32.xlu0 %v4720_v26, %s3974_s26  ;;  %v2631_v26 = vsel %vm2621_vm13, %v2566_v55, %v2074_v41  ;;  %v706_v41 = vrot.slane %v705_v11, 4  ;;  %v677_v55 = vsel %vm4090_vm5, %v672_v16, %v676_v35  ;;  %v687_v38 = vsel %vm4090_vm5, %v682_v22, %v686_v23  ;;  %v5016_v22 = vld [vmem:[%s6647_s0 + $0x140] sm:$0x1] }
  0xdc   :  { %v726_v11 = vshrl.u32 %v4958_v50, 16  ;;  %v718_v24 = vrot.slane %v716_v2, 5  ;;  %v5002_v9 = vrot.slane %v722_v42, 5  ;;  %v1241_v16 = vshrl.u32 %v4998_v13, 16 }
  0xdd   :  { %v4889_v17 = vpop.permute.xlu1 %1569  ;;  %v2144_v39 = vpop.permute.xlu0 %2143  ;;  %v711_v61 = vsel %vm4090_vm5, %v706_v41, %v710_v43  ;;  %v1228_v43 = vshrl.u32 %v4989_v25, 16  ;;  %v5010_v41 = vcombine.low %v1167_v33, %v1170_v8  ;;  %v1237_v23 = vshll.u32 %v4998_v13, 16 }
  0xde   :  { %v2696_v53 = vsel %vm2686_vm14, %v2631_v26, %v2144_v39  ;;  %v4964_v35 = vcombine.low %v701_v63, %v711_v61  ;;  %v4966_v26 = vcombine.low %v677_v55, %v687_v38  ;;  %v1160_v39 = vsel %vm4065_vm2, %v3468_v5, %v1159_v62 }
  0xdf   :  { %2021 = vrot.lane.b32.xlu1 %v4834_v59, %s3976_s11  ;;  %1949 = vrot.lane.b32.xlu0 %v4775_v45, %s3975_s29  ;;  %v4984_v12 = vcombine.low %v1160_v39, %v1163_v30  ;;  %v728_v3 = vrot.slane %v726_v11, 4  ;;  %v1231_v62 = vshll.u32 %v4989_v25, 16  ;;  %6673 = vst [vmem:[#allocation8_spill] sm:$0xff] %v5010_v41  ;;  %v5022_v61 = vcombine.low %v4810_v37, %v4821_v49 }
  0xe0   :  { %3752 = vmatprep.mubr.msk.bf16.mxu0 %vm2778_vm15, %v2696_v53  ;;  %6670 = vst [vmem:[#allocation5_spill] sm:$0xff] %v4964_v35  ;;  %6671 = vst [vmem:[#allocation6_spill] sm:$0xff] %v4966_v26  ;;  %v732_v55 = vshll.u32 %v5016_v22, 16  ;;  %v1230_v38 = vrot.slane %v1228_v43, 4  ;;  %v2220_v39 = vsel %vm2199_vm7, %v4311_v1, %v4862_v20  ;;  %v2223_v30 = vsel %vm2199_vm7, %v4339_v40, %v4889_v17 }
  0xe1   :  { %v4914_v15 = vpop.permute.xlu1 %1729  ;;  %v2146_v45 = vpop.permute.xlu0 %2145  ;;  %6672 = vst [vmem:[#allocation7_spill] sm:$0xff] %v4984_v12  ;;  %v729_v36 = vor.u32 %v728_v3, %v5002_v9  ;;  %v1233_v18 = vrot.slane %v1231_v62, 5  ;;  %v1239_v37 = vrot.slane %v1237_v23, 5  ;;  %v1243_v49 = vrot.slane %v1241_v16, 4 }
  0xe2   :  { %v2698_v10 = vsel %vm2686_vm14, %v2633_v34, %v2146_v45  ;;  %v734_v2 = vrot.slane %v732_v55, 5  ;;  %v1247_v33 = vshll.u32 %v5040_v46, 16 }
  0xe3   :  { %2091 = vrot.lane.b32.xlu1 %v4905_v58, %s3977_s12  ;;  %2019 = vrot.lane.b32.xlu0 %v4788_v32, %s3976_s11  ;;  %v730_v4 = vrot.slane %v729_v36, 4  ;;  %v1234_v11 = vor.u32 %v1233_v18, %v1230_v38  ;;  %v1244_v42 = vor.u32 %v1243_v49, %v1239_v37  ;;  %v1283_v49 = vrot.slane %v4998_v13, 5 }
  0xe4   :  { %3753 = vmatmul.mubr.msk.bf16.gmra.mrb[8].mxu0 %vm2778_vm15, %v2698_v10  ;;  %v715_v10 = vrot.slane %v713_v56, 4 }
  0xe5   :  { %v4927_v19 = vpop.permute.xlu1 %1799  ;;  %v4929_v31 = vpop.permute.xlu0 %1727  ;;  %v1235_v16 = vrot.slane %v1234_v11, 4  ;;  %v1285_v11 = vrot.slane %v1283_v49, 4 }
  0xe6   :  { %v719_v44 = vor.u32 %v718_v24, %v715_v10  ;;  %v2310_v60 = vsel %vm2296_vm8, %v2220_v39, %v4929_v31  ;;  %v5066_v24 = vcombine.low %v4989_v25, %v4998_v13  ;;  %v5121_v13 = vld [vmem:[%s6647_s0 + $0xcc] sm:$0xf] }
  0xe7   :  { %1583 = vrot.lane.b32.xlu1 %v4816_v27, %s3973_s21  ;;  %2089 = vrot.lane.b32.xlu0 %v4816_v27, %s3977_s12  ;;  %v1240_v39 = vsel %vm4090_vm5, %v1235_v16, %v1239_v37  ;;  %v5106_v37 = vld [vmem:[%s6647_s0 + $0x144] sm:$0xf] }
  0xe8   :  { %v720_v17 = vrot.slane %v719_v44, 4  ;;  %v1173_v44 = vrot.slane %v4958_v50, 5 }
  0xe9   :  { %v4948_v27 = vpop.permute.xlu1 %1869  ;;  %v1798_v52 = vpop.permute.xlu0 %1797 }
  0xea   :  { %v2375_v1 = vsel %vm2361_vm9, %v2310_v60, %v1798_v52  ;;  %v5055_v52 = vcombine.low %v4953_v51, %v4958_v50  ;;  %v725_v3 = vsel %vm4090_vm5, %v720_v17, %v5002_v9  ;;  %v1249_v9 = vrot.slane %v1247_v33, 5 }
  0xeb   :  { %2161 = vrot.lane.b32.xlu1 %v4931_v0, %s3978_s20  ;;  %2159 = vrot.lane.b32.xlu0 %v4830_v14, %s3978_s20  ;;  %v737_v17 = vshrl.u32 %v5106_v37, 16  ;;  %v1296_v33 = vshrl.u32 %v5121_v13, 16 }
  0xed   :  { %v4974_v53 = vpop.permute.xlu1 %1939  ;;  %v1868_v6 = vpop.permute.xlu0 %1867 }
  0xee   :  { %v2440_v56 = vsel %vm2426_vm10, %v2375_v1, %v1868_v6  ;;  %v5116_v1 = vld [vmem:[%s6647_s0 + $0x148] sm:$0xf] }
  0xef   :  { %1601 = vrot.lane.b32.xlu1 %v4964_v35, %s3973_s21  ;;  %1599 = vrot.lane.b32.xlu0 %v4966_v26, %s3973_s21 }
  0xf1   :  { %v5000_v34 = vpop.permute.xlu1 %2009  ;;  %v1938_v45 = vpop.permute.xlu0 %1937 }
  0xf2   :  { %v2505_v31 = vsel %vm2491_vm11, %v2440_v56, %v1938_v45 }
  0xf3   :  { %1759 = vrot.lane.b32.xlu1 %v4984_v12, %s3972_s16  ;;  %1585 = vrot.lane.b32.xlu0 %v4905_v58, %s3973_s21 }
  0xf5   :  { %v2080_v63 = vpop.permute.xlu1 %2079  ;;  %v2008_v5 = vpop.permute.xlu0 %2007 }
  0xf7   :  { %1761 = vrot.lane.b32.xlu1 %v5010_v41, %s3972_s16  ;;  %1743 = vrot.lane.b32.xlu0 %v4830_v14, %s3972_s16  ;;  %v2312_v14 = vsel %vm2296_vm8, %v2223_v30, %v4914_v15  ;;  %v2570_v15 = vsel %vm2556_vm12, %v2505_v31, %v2008_v5  ;;  %v1245_v5 = vrot.slane %v1244_v42, 4  ;;  %v3470_v30 = vrot.slane %v4953_v51, 9 }
  0xf8   :  { %v2377_v6 = vsel %vm2361_vm9, %v2312_v14, %v4927_v19  ;;  %v735_v19 = vsel %vm4090_vm5, %v730_v4, %v734_v2  ;;  %v740_v4 = vshll.u32 %v5106_v37, 16  ;;  %v5132_v14 = vld [vmem:[%s6647_s0 + $0xd0] sm:$0xf]  ;;  %v3478_v2 = vrot.slane %v4989_v25, 9 }
  0xf9   :  { %v5043_v20 = vpop.permute.xlu1 %1571  ;;  %v2078_v40 = vpop.permute.xlu0 %2077  ;;  %v2442_v43 = vsel %vm2426_vm10, %v2377_v6, %v4948_v27  ;;  %v5090_v18 = vcombine.low %v725_v3, %v735_v19  ;;  %v1250_v50 = vsel %vm4090_vm5, %v1245_v5, %v1249_v9  ;;  %v1286_v31 = vrot.slane %v5040_v46, 5 }
  0xfa   :  { %v2635_v8 = vsel %vm2621_vm13, %v2570_v15, %v2078_v40  ;;  %v2507_v23 = vsel %vm2491_vm11, %v2442_v43, %v4974_v53  ;;  %v1174_v40 = vsel %vm4065_vm2, %v3470_v30, %v1173_v44  ;;  %v750_v42 = vshrl.u32 %v5116_v1, 16  ;;  %v5176_v30 = vld [vmem:[%s6647_s0 + $0xd4] sm:$0x1] }
  0xfb   :  { %1829 = vrot.lane.b32.xlu1 %v5022_v61, %s3971_s7  ;;  %1745 = vrot.lane.b32.xlu0 %v4931_v0, %s3972_s16  ;;  %v2572_v27 = vsel %vm2556_vm12, %v2507_v23, %v5000_v34  ;;  %v1175_v34 = vrot.slane %v1173_v44, 4  ;;  %v1299_v15 = vshll.u32 %v5121_v13, 16  ;;  %v746_v6 = vshll.u32 %v5116_v1, 16 }
  0xfc   :  { %v2637_v36 = vsel %vm2621_vm13, %v2572_v27, %v2080_v63  ;;  %v1176_v63 = vrot.slane %v5016_v22, 5  ;;  %v5123_v22 = vcombine.low %v1240_v39, %v1250_v50  ;;  %v1305_v3 = vshll.u32 %v5132_v14, 16 }
  0xfd   :  { %v5062_v45 = vpop.permute.xlu1 %1573  ;;  %v2148_v10 = vpop.permute.xlu0 %2147  ;;  %v739_v25 = vrot.slane %v737_v17, 4  ;;  %v742_v43 = vrot.slane %v740_v4, 5  ;;  %v1287_v19 = vsel %vm4065_vm2, %v1285_v11, %v1286_v31  ;;  %v5162_v16 = vrot.slane %v746_v6, 5  ;;  %v5194_v17 = vld [vmem:[%s6647_s0 + $0xdc] sm:$0xf] }
  0xfe   :  { %v2700_v62 = vsel %vm2686_vm14, %v2635_v8, %v2148_v10  ;;  %v1177_v56 = vsel %vm4065_vm2, %v1175_v34, %v1176_v63  ;;  %v752_v23 = vrot.slane %v750_v42, 4  ;;  %v1298_v5 = vrot.slane %v1296_v33, 4  ;;  %v5187_v34 = vld [vmem:[%s6647_s0 + $0xd8] sm:$0xf] }
  0xff   :  { %1831 = vrot.lane.b32.xlu1 %v5055_v52, %s3971_s7  ;;  %1813 = vrot.lane.b32.xlu0 %v4834_v59, %s3971_s7  ;;  %v5156_v46 = vcombine.low %v1174_v40, %v1177_v56  ;;  %v1301_v9 = vrot.slane %v1299_v15, 5  ;;  %v743_v39 = vor.u32 %v742_v43, %v739_v25  ;;  %v521_v31 = vshrl.u32 %v5187_v34, 16 }
 0x100   :  { %3756 = vmatprep.mubr.msk.bf16.mxu0 %vm2778_vm15, %v2700_v62  ;;  %v1284_v62 = vsel %vm4065_vm2, %v3478_v2, %v1283_v49  ;;  %v753_v63 = vor.u32 %v752_v23, %v5162_v16  ;;  %v1315_v2 = vshll.u32 %v5176_v30, 16  ;;  %v524_v42 = vshll.u32 %v5187_v34, 16 }
 0x101   :  { %v5087_v55 = vpop.permute.xlu1 %1733  ;;  %v2150_v53 = vpop.permute.xlu0 %2149  ;;  %v5182_v50 = vcombine.low %v1284_v62, %v1287_v19  ;;  %v1302_v40 = vor.u32 %v1301_v9, %v1298_v5  ;;  %v744_v11 = vrot.slane %v743_v39, 4  ;;  %v5208_v33 = vcombine.low %v5106_v37, %v5116_v1 }
 0x102   :  { %v2702_v38 = vsel %vm2686_vm14, %v2637_v36, %v2150_v53  ;;  %v5169_v36 = vld [vmem:[%s6647_s0 + $0x14c] sm:$0x1]  ;;  %v5171_v53 = vrot.slane %v1305_v3, 5  ;;  %v530_v15 = vshll.u32 %v5194_v17, 16  ;;  %v534_v6 = vshrl.u32 %v5194_v17, 16 }
 0x103   :  { %1899 = vrot.lane.b32.xlu1 %v4964_v35, %s3974_s26  ;;  %1815 = vrot.lane.b32.xlu0 %v5066_v24, %s3971_s7  ;;  %v756_v49 = vshll.u32 %v5169_v36, 16  ;;  %6674 = vst [vmem:[#allocation9_spill] sm:$0xff] %v5208_v33  ;;  %v1303_v25 = vrot.slane %v1302_v40, 4  ;;  %v1317_v23 = vrot.slane %v1315_v2, 5  ;;  %v1351_v5 = vrot.slane %v5132_v14, 5 }
 0x104   :  { %3757 = vmatmul.mubr.msk.bf16.gmra.mrb[12].mxu0 %vm2778_vm15, %v2702_v38  ;;  %v3584_v9 = vcombine.low %v5121_v13, %v5132_v14  ;;  %v523_v39 = vrot.slane %v521_v31, 4  ;;  %v536_v40 = vrot.slane %v534_v6, 4 }
 0x105   :  { %v5109_v51 = vpop.permute.xlu1 %1803  ;;  %v5111_v60 = vpop.permute.xlu0 %1731  ;;  %v758_v3 = vrot.slane %v756_v49, 5  ;;  %v2229_v49 = vsel %vm2199_vm7, %v4419_v57, %v5062_v45  ;;  %v3480_v45 = vrot.slane %v5121_v13, 9  ;;  %v1353_v31 = vrot.slane %v1351_v5, 4 }
 0x107   :  { %1901 = vrot.lane.b32.xlu1 %v5090_v18, %s3974_s26  ;;  %1883 = vrot.lane.b32.xlu0 %v4905_v58, %s3974_s26  ;;  %v1309_v58 = vshrl.u32 %v5132_v14, 16  ;;  %v5231_v14 = vld [vmem:[%s6647_s0 + $0xe0] sm:$0x1] }
 0x108   :  { %v540_v13 = vshll.u32 %v5231_v14, 16 }
 0x109   :  { %v5146_v8 = vpop.permute.xlu1 %1873  ;;  %v5148_v10 = vpop.permute.xlu0 %1801  ;;  %v1311_v38 = vrot.slane %v1309_v58, 4  ;;  %v754_v58 = vrot.slane %v753_v63, 4  ;;  %v2226_v63 = vsel %vm2199_vm7, %v4388_v28, %v5043_v20  ;;  %v1308_v20 = vsel %vm4090_vm5, %v1303_v25, %v5171_v53 }
 0x10a   :  { %v2314_v28 = vsel %vm2296_vm8, %v2226_v63, %v5111_v60  ;;  %v1354_v60 = vrot.slane %v5176_v30, 5 }
 0x10b   :  { %1969 = vrot.lane.b32.xlu1 %v5010_v41, %s3975_s29  ;;  %1885 = vrot.lane.b32.xlu0 %v5123_v22, %s3974_s26  ;;  %v1312_v56 = vor.u32 %v1311_v38, %v5171_v53  ;;  %v749_v38 = vsel %vm4090_vm5, %v744_v11, %v5162_v16  ;;  %v526_v41 = vrot.slane %v524_v42, 5  ;;  %v5233_v16 = vrot.slane %v530_v15, 5 }
 0x10c   :  { %v759_v57 = vsel %vm4090_vm5, %v754_v58, %v758_v3  ;;  %v2316_v42 = vsel %vm2296_vm8, %v2229_v49, %v5087_v55  ;;  %v1180_v49 = vrot.slane %v5116_v1, 5 }
 0x10d   :  { %v5164_v44 = vpop.permute.xlu1 %1943  ;;  %v1872_v27 = vpop.permute.xlu0 %1871  ;;  %v1313_v19 = vrot.slane %v1312_v56, 4  ;;  %v527_v53 = vor.u32 %v526_v41, %v523_v39  ;;  %v537_v58 = vor.u32 %v536_v40, %v5233_v16  ;;  %v5265_v41 = vld [vmem:[%s6647_s0 + $0xe4] sm:$0xf]  ;;  %v2381_v55 = vsel %vm2361_vm9, %v2316_v42, %v5109_v51 }
 0x10e   :  { %v542_v39 = vrot.slane %v540_v13, 5  ;;  %v545_v40 = vshrl.u32 %v5265_v41, 16 }
 0x10f   :  { %1971 = vrot.lane.b32.xlu1 %v5156_v46, %s3975_s29  ;;  %1953 = vrot.lane.b32.xlu0 %v4931_v0, %s3975_s29  ;;  %v1318_v11 = vsel %vm4090_vm5, %v1313_v19, %v1317_v23  ;;  %v1352_v19 = vsel %vm4065_vm2, %v3480_v45, %v1351_v5  ;;  %v5279_v23 = vld [vmem:[%s6647_s0 + $0xe8] sm:$0xf]  ;;  %v538_v5 = vrot.slane %v537_v58, 4 }
 0x110   :  { %v3586_v3 = vcombine.low %v1308_v20, %v1318_v11  ;;  %v1182_v11 = vrot.slane %v1180_v49, 4  ;;  %v547_v42 = vrot.slane %v545_v40, 4  ;;  %v5349_v40 = vld [vmem:[%s6647_s0 + $0x150] sm:$0xf] }
 0x111   :  { %v5196_v4 = vpop.permute.xlu1 %2013  ;;  %v1942_v0 = vpop.permute.xlu0 %1941 }
 0x113   :  { %2039 = vrot.lane.b32.xlu1 %v5055_v52, %s3976_s11  ;;  %1955 = vrot.lane.b32.xlu0 %v5182_v50, %s3975_s29 }
 0x115   :  { %v2084_v43 = vpop.permute.xlu1 %2083  ;;  %v2012_v62 = vpop.permute.xlu0 %2011 }
 0x117   :  { %2041 = vrot.lane.b32.xlu1 %v5208_v33, %s3976_s11  ;;  %2023 = vrot.lane.b32.xlu0 %v5066_v24, %s3976_s11  ;;  %v2379_v24 = vsel %vm2361_vm9, %v2314_v28, %v5148_v10  ;;  %v5258_v10 = vcombine.low %v749_v38, %v759_v57  ;;  %v528_v38 = vrot.slane %v527_v53, 4  ;;  %v548_v28 = vshll.u32 %v5265_v41, 16 }
 0x118   :  { %v2444_v15 = vsel %vm2426_vm10, %v2379_v24, %v1872_v27  ;;  %v558_v57 = vshrl.u32 %v5279_v23, 16 }
 0x119   :  { %v5245_v56 = vpop.permute.xlu1 %1575  ;;  %v2082_v2 = vpop.permute.xlu0 %2081  ;;  %v2509_v6 = vsel %vm2491_vm11, %v2444_v15, %v1942_v0  ;;  %v550_v15 = vrot.slane %v548_v28, 5 }
 0x11a   :  { %v2574_v30 = vsel %vm2556_vm12, %v2509_v6, %v2012_v62  ;;  %v1355_v62 = vsel %vm4065_vm2, %v1353_v31, %v1354_v60  ;;  %v1183_v31 = vrot.slane %v5169_v36, 5  ;;  %v1117_v60 = vrot.slane %v5194_v17, 5  ;;  %v84_v6 = vld [vmem:[%s6647_s0 + $0xec] sm:$0x1] }
 0x11b   :  { %2109 = vrot.lane.b32.xlu1 %v5090_v18, %s3977_s12  ;;  %2025 = vrot.lane.b32.xlu0 %v3584_v9, %s3976_s11  ;;  %v2639_v27 = vsel %vm2621_vm13, %v2574_v30, %v2082_v2  ;;  %v2446_v9 = vsel %vm2426_vm10, %v2381_v55, %v5146_v8  ;;  %v3588_v24 = vcombine.low %v1352_v19, %v1355_v62  ;;  %v3471_v2 = vrot.slane %v5106_v37, 9 }
 0x11c   :  { %v2511_v63 = vsel %vm2491_vm11, %v2446_v9, %v5164_v44  ;;  %v554_v44 = vshll.u32 %v5279_v23, 16  ;;  %v560_v53 = vrot.slane %v558_v57, 4  ;;  %v1184_v17 = vsel %vm4065_vm2, %v1182_v11, %v1183_v31  ;;  %v5375_v31 = vld [vmem:[%s6647_s0 + $0xf0] sm:$0xf] }
 0x11d   :  { %v5270_v0 = vpop.permute.xlu1 %1577  ;;  %v2152_v25 = vpop.permute.xlu0 %2151  ;;  %v2576_v8 = vsel %vm2556_vm12, %v2511_v63, %v5196_v4  ;;  %v533_v4 = vsel %vm4090_vm5, %v528_v38, %v5233_v16  ;;  %v1181_v58 = vsel %vm4065_vm2, %v3471_v2, %v1180_v49  ;;  %v3462_v30 = vrot.slane %v5187_v34, 9 }
 0x11e   :  { %v2704_v51 = vsel %vm2686_vm14, %v2639_v27, %v2152_v25  ;;  %v2641_v20 = vsel %vm2621_vm13, %v2576_v8, %v2084_v43  ;;  %v543_v43 = vsel %vm4090_vm5, %v538_v5, %v542_v39  ;;  %v556_v16 = vrot.slane %v554_v44, 5  ;;  %v5354_v8 = vld [vmem:[%s6647_s0 + $0x154] sm:$0xf] }
 0x11f   :  { %2111 = vrot.lane.b32.xlu1 %v5258_v10, %s3977_s12  ;;  %2093 = vrot.lane.b32.xlu0 %v5123_v22, %s3977_s12  ;;  %v3530_v36 = vcombine.low %v533_v4, %v543_v43  ;;  %v1120_v55 = vrot.slane %v5231_v14, 5  ;;  %v551_v27 = vor.u32 %v550_v15, %v547_v42  ;;  %v564_v19 = vshll.u32 %v84_v6, 16 }
 0x120   :  { %3760 = vmatprep.mubr.msk.bf16.mxu0 %vm2778_vm15, %v2704_v51  ;;  %v561_v25 = vor.u32 %v560_v53, %v556_v16  ;;  %v1118_v51 = vsel %vm4065_vm2, %v3462_v30, %v1117_v60  ;;  %v1124_v49 = vrot.slane %v5279_v23, 5  ;;  %v764_v4 = vshll.u32 %v5349_v40, 16  ;;  %v5386_v53 = vld [vmem:[%s6647_s0 + $0xf4] sm:$0xf] }
 0x121   :  { %v5299_v45 = vpop.permute.xlu1 %1737  ;;  %v2154_v22 = vpop.permute.xlu0 %2153  ;;  %v552_v14 = vrot.slane %v551_v27, 4  ;;  %v566_v39 = vrot.slane %v564_v19, 5  ;;  %v770_v2 = vshll.u32 %v5354_v8, 16  ;;  %v774_v11 = vshrl.u32 %v5354_v8, 16 }
 0x122   :  { %v2706_v1 = vsel %vm2686_vm14, %v2641_v20, %v2154_v22  ;;  %v562_v38 = vrot.slane %v561_v25, 4  ;;  %v3463_v20 = vrot.slane %v5265_v41, 9  ;;  %v1126_v22 = vrot.slane %v1124_v49, 4 }
 0x123   :  { %2179 = vrot.lane.b32.xlu1 %v5156_v46, %s3978_s20  ;;  %2095 = vrot.lane.b32.xlu0 %v3586_v3, %s3977_s12  ;;  %v1119_v3 = vrot.slane %v1117_v60, 4  ;;  %v557_v28 = vsel %vm4090_vm5, %v552_v14, %v556_v16  ;;  %v5379_v15 = vcombine.low %v5265_v41, %v5279_v23  ;;  %v2232_v41 = vsel %vm2199_vm7, %v4492_v47, %v5245_v56  ;;  %v5409_v47 = vld [vmem:[%s6647_s0 + $0x158] sm:$0x1] }
 0x124   :  { %3761 = vmatmul.mubr.msk.bf16.gmra.mrb[16].mxu0 %vm2778_vm15, %v2706_v1  ;;  %v1127_v1 = vrot.slane %v84_v6, 5  ;;  %v1125_v16 = vsel %vm4065_vm2, %v3463_v20, %v1124_v49  ;;  %v2235_v23 = vsel %vm2199_vm7, %v4549_v54, %v5270_v0  ;;  %v569_v30 = vshrl.u32 %v5375_v31, 16 }
 0x125   :  { %v5314_v37 = vpop.permute.xlu1 %1807  ;;  %v1736_v13 = vpop.permute.xlu0 %1735  ;;  %v1121_v34 = vsel %vm4065_vm2, %v1119_v3, %v1120_v55  ;;  %6675 = vst [vmem:[#allocation10_spill] sm:$0xff] %v5379_v15  ;;  %v776_v3 = vrot.slane %v774_v11, 4  ;;  %v572_v27 = vshll.u32 %v5375_v31, 16  ;;  %v582_v25 = vshrl.u32 %v5386_v53, 16 }
 0x126   :  { %v1128_v6 = vsel %vm4065_vm2, %v1126_v22, %v1127_v1  ;;  %v2318_v55 = vsel %vm2296_vm8, %v2232_v41, %v1736_v13  ;;  %v578_v54 = vshll.u32 %v5386_v53, 16  ;;  %v571_v49 = vrot.slane %v569_v30, 4  ;;  %v5436_v1 = vld [vmem:[%s6647_s0 + $0xf8] sm:$0x1] }
 0x127   :  { %2165 = vrot.lane.b32.xlu1 %v3588_v24, %s3978_s20  ;;  %2163 = vrot.lane.b32.xlu0 %v5182_v50, %s3978_s20  ;;  %v5333_v50 = vcombine.low %v1181_v58, %v1184_v17  ;;  %v761_v24 = vshrl.u32 %v5349_v40, 16  ;;  %v5390_v17 = vrot.slane %v770_v2, 5  ;;  %v5443_v2 = vcombine.low %v5349_v40, %v5354_v8 }
 0x129   :  { %v5328_v62 = vpop.permute.xlu1 %1877  ;;  %v1806_v9 = vpop.permute.xlu0 %1805  ;;  %v763_v58 = vrot.slane %v761_v24, 4  ;;  %6676 = vst [vmem:[#allocation11_spill] sm:$0xff] %v5443_v2 }
 0x12a   :  { %v2383_v56 = vsel %vm2361_vm9, %v2318_v55, %v1806_v9  ;;  %v777_v9 = vor.u32 %v776_v3, %v5390_v17 }
 0x12b   :  { %1587 = vrot.lane.b32.xlu1 %v3530_v36, %s3973_s21  ;;  %1603 = vrot.lane.b32.xlu0 %v5090_v18, %s3973_s21  ;;  %v3562_v18 = vcombine.low %v1118_v51, %v1121_v34  ;;  %v766_v36 = vrot.slane %v764_v4, 5  ;;  %v2320_v51 = vsel %vm2296_vm8, %v2235_v23, %v5299_v45  ;;  %v5418_v34 = vcombine.low %v1125_v16, %v1128_v6 }
 0x12d   :  { %v5339_v63 = vpop.permute.xlu1 %1947  ;;  %v1876_v5 = vpop.permute.xlu0 %1875  ;;  %v767_v14 = vor.u32 %v766_v36, %v763_v58  ;;  %v588_v36 = vshll.u32 %v5436_v1, 16 }
 0x12e   :  { %v2448_v13 = vsel %vm2426_vm10, %v2383_v56, %v1876_v5  ;;  %v580_v5 = vrot.slane %v578_v54, 5  ;;  %v3472_v56 = vrot.slane %v5349_v40, 9  ;;  %v5494_v40 = vld [vmem:[%s6647_s0 + $0x15c] sm:$0xf] }
 0x12f   :  { %1763 = vrot.lane.b32.xlu1 %v5156_v46, %s3972_s16  ;;  %2181 = vrot.lane.b32.xlu0 %v5333_v50, %s3978_s20  ;;  %v567_v46 = vsel %vm4090_vm5, %v562_v38, %v566_v39  ;;  %v780_v39 = vshll.u32 %v5409_v47, 16  ;;  %v768_v11 = vrot.slane %v767_v14, 4 }
 0x130   :  { %v5369_v43 = vcombine.low %v557_v28, %v567_v46  ;;  %v584_v28 = vrot.slane %v582_v25, 4  ;;  %v2385_v46 = vsel %vm2361_vm9, %v2320_v51, %v5314_v37  ;;  %v1190_v51 = vrot.slane %v5409_v47, 5 }
 0x131   :  { %v5360_v44 = vpop.permute.xlu1 %2017  ;;  %v1946_v57 = vpop.permute.xlu0 %1945  ;;  %v2450_v24 = vsel %vm2426_vm10, %v2385_v46, %v5328_v62  ;;  %v782_v16 = vrot.slane %v780_v39, 5  ;;  %v773_v30 = vsel %vm4090_vm5, %v768_v11, %v5390_v17  ;;  %v5482_v17 = vld [vmem:[%s6647_s0 + $0xfc] sm:$0xf]  ;;  %v5513_v39 = vld [vmem:[%s6647_s0 + $0x160] sm:$0xf] }
 0x132   :  { %v2513_v38 = vsel %vm2491_vm11, %v2448_v13, %v1946_v57  ;;  %v2515_v37 = vsel %vm2491_vm11, %v2450_v24, %v5339_v63  ;;  %v585_v58 = vor.u32 %v584_v28, %v580_v5  ;;  %v5499_v13 = vld [vmem:[%s6647_s0 + $0x100] sm:$0xf]  ;;  %v3464_v24 = vrot.slane %v5375_v31, 9 }
 0x133   :  { %1747 = vrot.lane.b32.xlu1 %v3562_v18, %s3972_s16  ;;  %1605 = vrot.lane.b32.xlu0 %v5258_v10, %s3973_s21  ;;  %v574_v18 = vrot.slane %v572_v27, 5  ;;  %v2580_v62 = vsel %vm2556_vm12, %v2515_v37, %v5360_v44  ;;  %v5465_v44 = vcombine.low %v5375_v31, %v5386_v53  ;;  %v590_v27 = vrot.slane %v588_v36, 5 }
 0x134   :  { %v606_v28 = vshrl.u32 %v5499_v13, 16  ;;  %v1134_v37 = vrot.slane %v5436_v1, 5  ;;  %v798_v11 = vshrl.u32 %v5513_v39, 16  ;;  %v5546_v1 = vld [vmem:[%s6647_s0 + $0x104] sm:$0x1] }
 0x135   :  { %v2088_v60 = vpop.permute.xlu1 %2087  ;;  %v2016_v42 = vpop.permute.xlu0 %2015  ;;  %v575_v6 = vor.u32 %v574_v18, %v571_v49  ;;  %6677 = vst [vmem:[#allocation12_spill] sm:$0xff] %v5465_v44  ;;  %v593_v49 = vshrl.u32 %v5482_v17, 16  ;;  %v785_v18 = vshrl.u32 %v5494_v40, 16 }
 0x136   :  { %v2578_v45 = vsel %vm2556_vm12, %v2513_v38, %v2016_v42  ;;  %v778_v42 = vrot.slane %v777_v9, 4  ;;  %v2645_v63 = vsel %vm2621_vm13, %v2580_v62, %v2088_v60  ;;  %v1187_v60 = vrot.slane %v5354_v8, 5 }
 0x137   :  { %1833 = vrot.lane.b32.xlu1 %v5208_v33, %s3971_s7  ;;  %1589 = vrot.lane.b32.xlu0 %v5369_v43, %s3973_s21  ;;  %v576_v55 = vrot.slane %v575_v6, 4  ;;  %v1131_v38 = vrot.slane %v5386_v53, 5  ;;  %v602_v53 = vshll.u32 %v5499_v13, 16  ;;  %v595_v62 = vrot.slane %v593_v49, 4 }
 0x138   :  { %v783_v3 = vsel %vm4090_vm5, %v778_v42, %v782_v16  ;;  %v608_v36 = vrot.slane %v606_v28, 4 }
 0x139   :  { %v5413_v0 = vpop.permute.xlu1 %1579  ;;  %v2086_v19 = vpop.permute.xlu0 %2085  ;;  %v5488_v8 = vcombine.low %v773_v30, %v783_v3  ;;  %v800_v3 = vrot.slane %v798_v11, 4 }
 0x13a   :  { %v2643_v57 = vsel %vm2621_vm13, %v2578_v45, %v2086_v19  ;;  %v1189_v19 = vrot.slane %v1187_v60, 4  ;;  %v596_v45 = vshll.u32 %v5482_v17, 16 }
 0x13b   :  { %1817 = vrot.lane.b32.xlu1 %v5379_v15, %s3971_s7  ;;  %1765 = vrot.lane.b32.xlu0 %v5333_v50, %s3972_s16 }
 0x13c   :  { %v598_v6 = vrot.slane %v596_v45, 5 }
 0x13d   :  { %v5431_v20 = vpop.permute.xlu1 %1581  ;;  %v2156_v22 = vpop.permute.xlu0 %2155 }
 0x13e   :  { %v2708_v4 = vsel %vm2686_vm14, %v2643_v57, %v2156_v22  ;;  %v1188_v57 = vsel %vm4065_vm2, %v3472_v56, %v1187_v60  ;;  %v1191_v22 = vsel %vm4065_vm2, %v1189_v19, %v1190_v51  ;;  %v114_v56 = vld [vmem:[%s6647_s0 + $0x164] sm:$0x1]  ;;  %v612_v51 = vshll.u32 %v5546_v1, 16 }
 0x13f   :  { %1903 = vrot.lane.b32.xlu1 %v5258_v10, %s3974_s26  ;;  %1749 = vrot.lane.b32.xlu0 %v5418_v34, %s3972_s16  ;;  %v5541_v31 = vcombine.low %v1188_v57, %v1191_v22  ;;  %v804_v45 = vshll.u32 %v114_v56, 16 }
 0x140   :  { %3764 = vmatprep.mubr.msk.bf16.mxu0 %vm2778_vm15, %v2708_v4  ;;  %v1133_v4 = vrot.slane %v1131_v38, 4  ;;  %v614_v22 = vrot.slane %v612_v51, 5 }
 0x141   :  { %v5456_v41 = vpop.permute.xlu1 %1741  ;;  %v2158_v10 = vpop.permute.xlu0 %2157  ;;  %v806_v11 = vrot.slane %v804_v45, 5 }
 0x142   :  { %v2710_v23 = vsel %vm2686_vm14, %v2645_v63, %v2158_v10  ;;  %v787_v63 = vrot.slane %v785_v18, 4  ;;  %v1135_v30 = vsel %vm4065_vm2, %v1133_v4, %v1134_v37  ;;  %v1194_v4 = vrot.slane %v5513_v39, 5 }
 0x143   :  { %1887 = vrot.lane.b32.xlu1 %v5369_v43, %s3974_s26  ;;  %1835 = vrot.lane.b32.xlu0 %v5443_v2, %s3971_s7  ;;  %v586_v43 = vrot.slane %v585_v58, 4  ;;  %v5535_v58 = vrot.slane %v602_v53, 5 }
 0x144   :  { %3765 = vmatmul.mubr.msk.bf16.gmra.mrb[20].mxu0 %vm2778_vm15, %v2710_v23  ;;  %v1132_v23 = vsel %vm4065_vm2, %v3464_v24, %v1131_v38 }
 0x145   :  { %v5474_v25 = vpop.permute.xlu1 %1811  ;;  %v5476_v54 = vpop.permute.xlu0 %1739  ;;  %v591_v14 = vsel %vm4090_vm5, %v586_v43, %v590_v27  ;;  %v599_v27 = vor.u32 %v598_v6, %v595_v62  ;;  %v609_v19 = vor.u32 %v608_v36, %v5535_v58  ;;  %v5564_v38 = vcombine.low %v1132_v23, %v1135_v30 }
 0x146   :  { %v5590_v6 = vcombine.low %v5482_v17, %v5499_v13 }
 0x147   :  { %1973 = vrot.lane.b32.xlu1 %v5333_v50, %s3975_s29  ;;  %1819 = vrot.lane.b32.xlu0 %v5465_v44, %s3971_s7  ;;  %v581_v50 = vsel %vm4090_vm5, %v576_v55, %v580_v5  ;;  %v788_v5 = vshll.u32 %v5494_v40, 16  ;;  %v600_v28 = vrot.slane %v599_v27, 4  ;;  %v610_v57 = vrot.slane %v609_v19, 4 }
 0x148   :  { %v5525_v46 = vcombine.low %v581_v50, %v591_v14  ;;  %v2241_v14 = vsel %vm2199_vm7, %v4689_v7, %v5431_v20  ;;  %v2238_v7 = vsel %vm2199_vm7, %v4636_v29, %v5413_v0  ;;  %v5577_v20 = vcombine.low %v5494_v40, %v5513_v39  ;;  %6679 = vst [vmem:[#allocation14_spill] sm:$0xff] %v5590_v6 }
 0x149   :  { %v5506_v9 = vpop.permute.xlu1 %1881  ;;  %v5508_v47 = vpop.permute.xlu0 %1809  ;;  %v790_v10 = vrot.slane %v788_v5, 5  ;;  %v2324_v53 = vsel %vm2296_vm8, %v2241_v14, %v5456_v41  ;;  %v2322_v41 = vsel %vm2296_vm8, %v2238_v7, %v5476_v54  ;;  %v1138_v14 = vrot.slane %v5499_v13, 5 }
 0x14a   :  { %6678 = vst [vmem:[#allocation13_spill] sm:$0xff] %v5577_v20  ;;  %v2389_v29 = vsel %vm2361_vm9, %v2324_v53, %v5474_v25  ;;  %v2387_v0 = vsel %vm2361_vm9, %v2322_v41, %v5508_v47  ;;  %v615_v25 = vsel %vm4090_vm5, %v610_v57, %v614_v22  ;;  %v1141_v53 = vrot.slane %v5546_v1, 5  ;;  %v5673_v41 = vld [vmem:[%s6647_s0 + $0x168] sm:$0xf] }
 0x14b   :  { %1957 = vrot.lane.b32.xlu1 %v5418_v34, %s3975_s29  ;;  %1905 = vrot.lane.b32.xlu0 %v5488_v8, %s3974_s26  ;;  %v794_v34 = vshll.u32 %v5513_v39, 16  ;;  %v791_v50 = vor.u32 %v790_v10, %v787_v63  ;;  %v605_v39 = vsel %vm4090_vm5, %v600_v28, %v5535_v58  ;;  %v2454_v54 = vsel %vm2426_vm10, %v2389_v29, %v5506_v9 }
 0x14c   :  { %v3473_v9 = vrot.slane %v5494_v40, 9  ;;  %v1196_v58 = vrot.slane %v1194_v4, 4  ;;  %v5621_v40 = vcombine.low %v605_v39, %v615_v25  ;;  %v1140_v28 = vrot.slane %v1138_v14, 4 }
 0x14d   :  { %v1952_v42 = vpop.permute.xlu1 %1951  ;;  %v1880_v16 = vpop.permute.xlu0 %1879  ;;  %v796_v60 = vrot.slane %v794_v34, 5  ;;  %v792_v24 = vrot.slane %v791_v50, 4  ;;  %v812_v29 = vshll.u32 %v5673_v41, 16 }
 0x14e   :  { %v2452_v36 = vsel %vm2426_vm10, %v2387_v0, %v1880_v16  ;;  %v2519_v63 = vsel %vm2491_vm11, %v2454_v54, %v1952_v42 }
 0x14f   :  { %2043 = vrot.lane.b32.xlu1 %v5443_v2, %s3976_s11  ;;  %1889 = vrot.lane.b32.xlu0 %v5525_v46, %s3974_s26  ;;  %v801_v49 = vor.u32 %v800_v3, %v796_v60  ;;  %v797_v47 = vsel %vm4090_vm5, %v792_v24, %v796_v60  ;;  %v1197_v60 = vrot.slane %v114_v56, 5  ;;  %v1195_v56 = vsel %vm4065_vm2, %v3473_v9, %v1194_v4 }
 0x150   :  { %v1142_v24 = vsel %vm4065_vm2, %v1140_v28, %v1141_v53 }
 0x151   :  { %v2022_v55 = vpop.permute.xlu1 %2021  ;;  %v1950_v43 = vpop.permute.xlu0 %1949  ;;  %v802_v37 = vrot.slane %v801_v49, 4  ;;  %v1198_v50 = vsel %vm4065_vm2, %v1196_v58, %v1197_v60 }
 0x152   :  { %v2517_v10 = vsel %vm2491_vm11, %v2452_v36, %v1950_v43  ;;  %v2584_v16 = vsel %vm2556_vm12, %v2519_v63, %v2022_v55  ;;  %v5695_v36 = vld [vmem:[%s6647_s0 + $0x108] sm:$0xf] }
 0x153   :  { %2027 = vrot.lane.b32.xlu1 %v5465_v44, %s3976_s11  ;;  %1975 = vrot.lane.b32.xlu0 %v5541_v31, %s3975_s29  ;;  %v807_v30 = vsel %vm4090_vm5, %v802_v37, %v806_v11  ;;  %v5678_v37 = vld [vmem:[%s6647_s0 + $0x16c] sm:$0xf]  ;;  %v809_v11 = vshrl.u32 %v5673_v41, 16 }
 0x154   :  { %v5623_v55 = vcombine.low %v797_v47, %v807_v30  ;;  %v822_v0 = vshrl.u32 %v5678_v37, 16  ;;  %v814_v47 = vrot.slane %v812_v29, 5  ;;  %v5721_v30 = vld [vmem:[%s6647_s0 + $0x170] sm:$0x1] }
 0x155   :  { %v2092_v18 = vpop.permute.xlu1 %2091  ;;  %v2020_v5 = vpop.permute.xlu0 %2019  ;;  %v811_v25 = vrot.slane %v809_v11, 4 }
 0x156   :  { %v2582_v23 = vsel %vm2556_vm12, %v2517_v10, %v2020_v5  ;;  %v2649_v42 = vsel %vm2621_vm13, %v2584_v16, %v2092_v18  ;;  %v5640_v18 = vcombine.low %v1195_v56, %v1198_v50  ;;  %v3465_v5 = vrot.slane %v5482_v17, 9 }
 0x157   :  { %2113 = vrot.lane.b32.xlu1 %v5488_v8, %s3977_s12  ;;  %1959 = vrot.lane.b32.xlu0 %v5564_v38, %s3975_s29  ;;  %v824_v10 = vrot.slane %v822_v0, 4  ;;  %v620_v16 = vshll.u32 %v5695_v36, 16 }
 0x158   :  { %v1139_v22 = vsel %vm4065_vm2, %v3465_v5, %v1138_v14  ;;  %v828_v14 = vshll.u32 %v5721_v30, 16 }
 0x159   :  { %v5586_v34 = vpop.permute.xlu1 %1583  ;;  %v2090_v62 = vpop.permute.xlu0 %2089  ;;  %v5664_v1 = vcombine.low %v1139_v22, %v1142_v24  ;;  %v622_v28 = vrot.slane %v620_v16, 5 }
 0x15a   :  { %v2647_v3 = vsel %vm2621_vm13, %v2582_v23, %v2090_v62  ;;  %v818_v62 = vshll.u32 %v5678_v37, 16 }
 0x15b   :  { %2097 = vrot.lane.b32.xlu1 %v5525_v46, %s3977_s12  ;;  %2045 = vrot.lane.b32.xlu0 %v5577_v20, %s3976_s11 }
 0x15c   :  { %v820_v63 = vrot.slane %v818_v62, 5  ;;  %v5744_v62 = vld [vmem:[%s6647_s0 + $0x110] sm:$0x1] }
 0x15d   :  { %v2162_v43 = vpop.permute.xlu1 %2161  ;;  %v2160_v27 = vpop.permute.xlu0 %2159  ;;  %v636_v44 = vshll.u32 %v5744_v62, 16 }
 0x15e   :  { %v2714_v19 = vsel %vm2686_vm14, %v2649_v42, %v2162_v43  ;;  %v2712_v51 = vsel %vm2686_vm14, %v2647_v3, %v2160_v27  ;;  %v815_v27 = vor.u32 %v814_v47, %v811_v25 }
 0x15f   :  { %2183 = vrot.lane.b32.xlu1 %v5541_v31, %s3978_s20  ;;  %2029 = vrot.lane.b32.xlu0 %v5590_v6, %s3976_s11 }
 0x160   :  { %3768 = vmatprep.mubr.msk.bf16.mxu0 %vm2778_vm15, %v2712_v51 }
 0x161   :  { %3769 = vmatmul.mubr.msk.bf16.gmra.mrb[24].mxu0 %vm2778_vm15, %v2714_v19  ;;  %v5632_v49 = vpop.permute.xlu1 %1601  ;;  %v5634_v45 = vpop.permute.xlu0 %1599  ;;  %v825_v19 = vor.u32 %v824_v10, %v820_v63  ;;  %v816_v10 = vrot.slane %v815_v27, 4 }
 0x163   :  { %2099 = vrot.lane.b32.xlu1 %v5621_v40, %s3977_s12  ;;  %2115 = vrot.lane.b32.xlu0 %v5623_v55, %s3977_s12 }
 0x165   :  { %v5644_v13 = vpop.permute.xlu1 %1759  ;;  %v5646_v57 = vpop.permute.xlu0 %1585 }
 0x167   :  { %2185 = vrot.lane.b32.xlu1 %v5640_v18, %s3978_s20  ;;  %1607 = vrot.lane.b32.xlu0 %v5488_v8, %s3973_s21 }
 0x169   :  { %v5656_v17 = vpop.permute.xlu1 %1761  ;;  %v5658_v7 = vpop.permute.xlu0 %1743 }
 0x16b   :  { %1609 = vrot.lane.b32.xlu1 %v5623_v55, %s3973_s21  ;;  %2167 = vrot.lane.b32.xlu0 %v5564_v38, %s3978_s20 }
 0x16d   :  { %v5666_v4 = vpop.permute.xlu1 %1829  ;;  %v5668_v8 = vpop.permute.xlu0 %1745 }
 0x16f   :  { %2169 = vrot.lane.b32.xlu1 %v5664_v1, %s3978_s20  ;;  %1591 = vrot.lane.b32.xlu0 %v5525_v46, %s3973_s21  ;;  %v5704_v46 = vld [vmem:[%s6647_s0 + $0x10c] sm:$0xf] }
 0x170   :  { %v630_v23 = vshrl.u32 %v5704_v46, 16  ;;  %v626_v60 = vshll.u32 %v5704_v46, 16 }
 0x171   :  { %v5688_v39 = vpop.permute.xlu1 %1831  ;;  %v5690_v54 = vpop.permute.xlu0 %1813 }
 0x172   :  { %v628_v11 = vrot.slane %v626_v60, 5  ;;  %v632_v29 = vrot.slane %v630_v23, 4 }
 0x173   :  { %1751 = vrot.lane.b32.xlu1 %v5564_v38, %s3972_s16  ;;  %1767 = vrot.lane.b32.xlu0 %v5541_v31, %s3972_s16  ;;  %v5713_v38 = vld [vmem:[%s6649_s2] ss:$0 sm:$0xff]  ;;  %v617_v31 = vshrl.u32 %v5695_v36, 16 }
 0x175   :  { %v5706_v9 = vpop.permute.xlu1 %1899  ;;  %v5708_v58 = vpop.permute.xlu0 %1815  ;;  %v619_v5 = vrot.slane %v617_v31, 4  ;;  %v826_v31 = vrot.slane %v825_v19, 4  ;;  %v821_v19 = vsel %vm4090_vm5, %v816_v10, %v820_v63  ;;  %v5783_v63 = vld [vmem:[%s6647_s0 + $0x114] sm:$0xf]  ;;  %v1204_v10 = vrot.slane %v5721_v30, 5 }
 0x177   :  { %v3746_v42 = vpop.f32.mrb[0].mxu0  ;;  %1837 = vrot.lane.b32.xlu1 %v5577_v20, %s3971_s7  ;;  %1593 = vrot.lane.b32.xlu0 %v5621_v40, %s3973_s21 }
 0x178   :  { %v2890_v3 = vadd.f32 %v3746_v42, %v5713_v38  ;;  %v2881_v43 = vpop.f32.mrb[1].mxu0  ;;  %v830_v42 = vrot.slane %v828_v14, 5 }
 0x179   :  { %v2882_v51 = vadd.f32 %v5713_v38, %v2881_v43  ;;  %v3747_v56 = vpop.f32.mrb[2].mxu0  ;;  %v5730_v50 = vpop.permute.xlu1 %1901  ;;  %v623_v43 = vor.u32 %v622_v28, %v619_v5  ;;  %v1201_v5 = vrot.slane %v5678_v37, 5 }
 0x17a   :  { %v2893_v53 = vadd.f32 %v3747_v56, %v5713_v38  ;;  %v2884_v22 = vpop.f32.mrb[3].mxu0  ;;  %v5734_v24 = vpop.permute.xlu0 %1883  ;;  %v3138_v25 = vmax.f32 %v2890_v3, 0.0  ;;  %v5761_v3 = vcombine.low %v5673_v41, %v5678_v37 }
 0x17b   :  { %v2885_v0 = vadd.f32 %v5713_v38, %v2884_v22  ;;  %1821 = vrot.lane.b32.xlu1 %v5590_v6, %s3971_s7  ;;  %1769 = vrot.lane.b32.xlu0 %v5640_v18, %s3972_s16  ;;  %v3136_v16 = vmax.f32 %v2882_v51, 0.0  ;;  %v633_v6 = vor.u32 %v632_v29, %v628_v11  ;;  %v831_v51 = vsel %vm4090_vm5, %v826_v31, %v830_v42 }
 0x17c   :  { %v3139_v47 = vmax.f32 %v2893_v53, 0.0  ;;  %v624_v14 = vrot.slane %v623_v43, 4  ;;  %v638_v53 = vrot.slane %v636_v44, 5  ;;  %v5778_v29 = vcombine.low %v5695_v36, %v5704_v46  ;;  %v5790_v44 = vld [vmem:[%s6647_s0 + $0x174] sm:$0xf] }
 0x17d   :  { %v3137_v60 = vmax.f32 %v2885_v0, 0.0  ;;  %v5746_v23 = vpop.permute.xlu1 %1969  ;;  %v5785_v37 = vcombine.low %v821_v19, %v831_v51  ;;  %v641_v42 = vshrl.u32 %v5783_v63, 16  ;;  %v644_v43 = vshll.u32 %v5783_v63, 16  ;;  %v3943_v51 = vld [vmem:[%s6647_s0 + $0x124] sm:$0xf] }
 0x17e   :  { %v5748_v56 = vpack.c.bf16 %v3139_v47, %v3138_v25  ;;  %v5750_v22 = vpop.permute.xlu0 %1885  ;;  %v629_v0 = vsel %vm4090_vm5, %v624_v14, %v628_v11  ;;  %v3474_v25 = vrot.slane %v5673_v41, 9  ;;  %v1203_v47 = vrot.slane %v1201_v5, 4 }
 0x17f   :  { %v5753_v20 = vpack.c.bf16 %v3137_v60, %v3136_v16  ;;  %1907 = vrot.lane.b32.xlu1 %v5623_v55, %s3974_s26  ;;  %1753 = vrot.lane.b32.xlu0 %v5664_v1, %s3972_s16  ;;  %v634_v55 = vrot.slane %v633_v6, 4  ;;  %v5795_v6 = vld [vmem:[%s6647_s0 + $0x118] sm:$0xf]  ;;  %v1145_v60 = vrot.slane %v5704_v46, 5  ;;  %v833_v41 = vshrl.u32 %v5790_v44, 16 }
 0x180   :  { %6680 = vst [vmem:[#allocation15_spill] sm:$0xff] %v5748_v56  ;;  %v836_v30 = vshll.u32 %v5790_v44, 16  ;;  %v654_v11 = vshrl.u32 %v5795_v6, 16  ;;  %v650_v19 = vshll.u32 %v5795_v6, 16  ;;  %v3942_v46 = vld [vmem:[%s6647_s0 + $0x120] sm:$0xf]  ;;  %v1205_v2 = vsel %vm4065_vm2, %v1203_v47, %v1204_v10 }
 0x181   :  { %6681 = vst [vmem:[#allocation16_spill] sm:$0xff] %v5753_v20  ;;  %v5763_v27 = vpop.permute.xlu1 %1971  ;;  %v639_v16 = vsel %vm4090_vm5, %v634_v55, %v638_v53  ;;  %v1202_v53 = vsel %vm4065_vm2, %v3474_v25, %v1201_v5  ;;  %v3466_v56 = vrot.slane %v5695_v36, 9  ;;  %v5838_v20 = vld [vmem:[%s6647_s0 + $0x178] sm:$0xf]  ;;  %v5850_v36 = vld [vmem:[%s6647_s0 + $0x11c] sm:$0x1] }
 0x182   :  { %v5770_v28 = vpop.permute.xlu0 %1953  ;;  %v5828_v55 = vcombine.low %v629_v0, %v639_v16  ;;  %v643_v0 = vrot.slane %v641_v42, 4  ;;  %v646_v16 = vrot.slane %v644_v43, 5  ;;  %v5852_v5 = vrot.slane %v650_v19, 5 }
 0x183   :  { %1891 = vrot.lane.b32.xlu1 %v5621_v40, %s3974_s26  ;;  %1839 = vrot.lane.b32.xlu0 %v5761_v3, %s3971_s7  ;;  %v656_v25 = vrot.slane %v654_v11, 4  ;;  %v835_v47 = vrot.slane %v833_v41, 4  ;;  %v838_v10 = vrot.slane %v836_v30, 5  ;;  %v842_v42 = vshll.u32 %v5838_v20, 16 }
 0x184   :  { %v5856_v15 = vcombine.low %v1202_v53, %v1205_v2  ;;  %v1146_v12 = vsel %vm4065_vm2, %v3466_v56, %v1145_v60  ;;  %v647_v26 = vor.u32 %v646_v16, %v643_v0  ;;  %v660_v19 = vshll.u32 %v5850_v36, 16  ;;  %v5874_v56 = vld [vmem:[%s6647_s0 + $0x17c] sm:$0x1] }
 0x185   :  { %v5797_v40 = vpop.permute.xlu1 %2039  ;;  %v657_v2 = vor.u32 %v656_v25, %v5852_v5  ;;  %v5878_v11 = vrot.slane %v842_v42, 5  ;;  %v5888_v0 = vcombine.low %v5790_v44, %v5838_v20  ;;  %v5892_v16 = vcombine.low %v5783_v63, %v5795_v6 }
 0x186   :  { %v5803_v31 = vpop.permute.xlu0 %1955 }
 0x187   :  { %1977 = vrot.lane.b32.xlu1 %v5640_v18, %s3975_s29  ;;  %1823 = vrot.lane.b32.xlu0 %v5778_v29, %s3971_s7  ;;  %v5824_v18 = vcombine.low %v3942_v46, %v3943_v51  ;;  %v1147_v46 = vrot.slane %v1145_v60, 4  ;;  %v1148_v51 = vrot.slane %v5744_v62, 5  ;;  %v846_v62 = vshrl.u32 %v5838_v20, 16 }
 0x188   :  { %v839_v60 = vor.u32 %v838_v10, %v835_v47  ;;  %v5896_v47 = vrot.slane %v647_v26, 4  ;;  %v5898_v10 = vrot.slane %v660_v19, 5 }
 0x189   :  { %v5826_v14 = vpop.permute.xlu1 %2041  ;;  %v1149_v33 = vsel %vm4065_vm2, %v1147_v46, %v1148_v51  ;;  %v2268_v41 = vsel %vm2199_vm7, %v5824_v18, %v5634_v45  ;;  %v848_v45 = vrot.slane %v846_v62, 4  ;;  %v2244_v62 = vsel %vm2199_vm7, %v4788_v32, %v5586_v34 }
 0x18a   :  { %v5840_v35 = vpop.permute.xlu0 %2023  ;;  %v2342_v30 = vsel %vm2296_vm8, %v2268_v41, %v5644_v13  ;;  %v5884_v51 = vcombine.low %v1146_v12, %v1149_v33  ;;  %v2247_v12 = vsel %vm2199_vm7, %v4834_v59, %v5646_v57  ;;  %v5910_v26 = vrot.slane %v839_v60, 4 }
 0x18b   :  { %1961 = vrot.lane.b32.xlu1 %v5664_v1, %s3975_s29  ;;  %1909 = vrot.lane.b32.xlu0 %v5785_v37, %s3974_s26  ;;  %v2407_v53 = vsel %vm2361_vm9, %v2342_v30, %v5666_v4  ;;  %v852_v4 = vshll.u32 %v5874_v56, 16  ;;  %v2328_v42 = vsel %vm2296_vm8, %v2247_v12, %v5668_v8  ;;  %v849_v57 = vor.u32 %v848_v45, %v5878_v11 }
 0x18c   :  { %v2472_v13 = vsel %vm2426_vm10, %v2407_v53, %v5706_v9  ;;  %v658_v9 = vrot.slane %v657_v2, 4  ;;  %v2393_v19 = vsel %vm2361_vm9, %v2328_v42, %v5708_v58  ;;  %v1208_v60 = vrot.slane %v5838_v20, 5 }
 0x18d   :  { %v2110_v43 = vpop.permute.xlu1 %2109  ;;  %v2537_v33 = vsel %vm2491_vm11, %v2472_v13, %v5746_v23  ;;  %v2326_v23 = vsel %vm2296_vm8, %v2244_v62, %v5658_v7  ;;  %v2458_v34 = vsel %vm2426_vm10, %v2393_v19, %v5750_v22  ;;  %v653_v7 = vsel %vm4090_vm5, %v5896_v47, %v5852_v5 }
 0x18e   :  { %v2026_v1 = vpop.permute.xlu0 %2025  ;;  %v2602_v59 = vsel %vm2556_vm12, %v2537_v33, %v5797_v40  ;;  %v2391_v32 = vsel %vm2361_vm9, %v2326_v23, %v5690_v54  ;;  %v2523_v20 = vsel %vm2491_vm11, %v2458_v34, %v5803_v31  ;;  %v663_v54 = vsel %vm4090_vm5, %v658_v9, %v5898_v10 }
 0x18f   :  { %2047 = vrot.lane.b32.xlu1 %v5761_v3, %s3976_s11  ;;  %1893 = vrot.lane.b32.xlu0 %v5828_v55, %s3974_s26  ;;  %v2667_v41 = vsel %vm2621_vm13, %v2602_v59, %v2110_v43  ;;  %v2456_v58 = vsel %vm2426_vm10, %v2391_v32, %v5734_v24  ;;  %v854_v22 = vrot.slane %v852_v4, 5  ;;  %v2588_v24 = vsel %vm2556_vm12, %v2523_v20, %v2026_v1 }
 0x190   :  { %v2521_v5 = vsel %vm2491_vm11, %v2456_v58, %v5770_v28  ;;  %v850_v45 = vrot.slane %v849_v57, 4  ;;  %v845_v28 = vsel %vm4090_vm5, %v5910_v26, %v5878_v11  ;;  %v1210_v11 = vrot.slane %v1208_v60, 4 }
 0x191   :  { %v5882_v46 = vpop.permute.xlu1 %2111  ;;  %v2586_v53 = vsel %vm2556_vm12, %v2521_v5, %v5840_v35  ;;  %v3475_v35 = vrot.slane %v5790_v44, 9  ;;  %v2271_v26 = vsel %vm2199_vm7, %v5022_v61, %v5632_v49 }
 0x192   :  { %v2094_v25 = vpop.permute.xlu0 %2093  ;;  %v855_v44 = vsel %vm4090_vm5, %v850_v45, %v854_v22  ;;  %v2344_v19 = vsel %vm2296_vm8, %v2271_v26, %v5656_v17  ;;  %v123_v26 = vld [vmem:[%s6647_s0 + $0x188] sm:$0x1] }
 0x193   :  { %2031 = vrot.lane.b32.xlu1 %v5778_v29, %s3976_s11  ;;  %1979 = vrot.lane.b32.xlu0 %v5856_v15, %s3975_s29  ;;  %v2651_v1 = vsel %vm2621_vm13, %v2586_v53, %v2094_v25  ;;  %v1211_v25 = vrot.slane %v5874_v56, 5  ;;  %v2409_v56 = vsel %vm2361_vm9, %v2344_v19, %v5688_v39  ;;  %v5997_v17 = vcombine.low %v845_v28, %v855_v44 }
 0x195   :  { %v2180_v2 = vpop.permute.xlu1 %2179  ;;  %v1212_v20 = vsel %vm4065_vm2, %v1210_v11, %v1211_v25 }
 0x196   :  { %v2096_v8 = vpop.permute.xlu0 %2095  ;;  %v2732_v40 = vsel %vm2686_vm14, %v2667_v41, %v2180_v2 }
 0x197   :  { %v3750_v43 = vpop.f32.mrb[4].mxu0  ;;  %2117 = vrot.lane.b32.xlu1 %v5785_v37, %s3977_s12  ;;  %1963 = vrot.lane.b32.xlu0 %v5884_v51, %s3975_s29  ;;  %v2653_v13 = vsel %vm2621_vm13, %v2588_v24, %v2096_v8  ;;  %v5987_v8 = vcombine.low %v653_v7, %v663_v54  ;;  %v1209_v7 = vsel %vm4065_vm2, %v3475_v35, %v1208_v60  ;;  %v1155_v60 = vrot.slane %v5850_v36, 5 }
 0x198   :  { %v2906_v30 = vadd.f32 %v3750_v43, %v5713_v38  ;;  %v2897_v31 = vpop.f32.mrb[5].mxu0  ;;  %3788 = vmatprep.mubr.msk.bf16.mxu1 %vm2778_vm15, %v2732_v40  ;;  %v2474_v40 = vsel %vm2426_vm10, %v2409_v56, %v5730_v50  ;;  %v1152_v50 = vrot.slane %v5795_v6, 5  ;;  %v3467_v6 = vrot.slane %v5783_v63, 9 }
 0x199   :  { %v2898_v47 = vadd.f32 %v5713_v38, %v2897_v31  ;;  %v3751_v10 = vpop.f32.mrb[6].mxu0  ;;  %v2166_v4 = vpop.permute.xlu1 %2165  ;;  %v2539_v39 = vsel %vm2491_vm11, %v2474_v40, %v5763_v27  ;;  %v6017_v27 = vcombine.low %v1209_v7, %v1212_v20  ;;  %v876_v7 = vshll.u32 %v123_v26, 16 }
 0x19a   :  { %v2909_v12 = vadd.f32 %v3751_v10, %v5713_v38  ;;  %v2718_v33 = vsel %vm2686_vm14, %v2653_v13, %v2166_v4  ;;  %v2900_v9 = vpop.f32.mrb[7].mxu0  ;;  %v2164_v62 = vpop.permute.xlu0 %2163  ;;  %v3142_v57 = vmax.f32 %v2906_v30, 0.0  ;;  %v2604_v43 = vsel %vm2556_vm12, %v2539_v39, %v5826_v14  ;;  %v6060_v10 = vld [vmem:[%s6647_s0 + $0x184] sm:$0xf] }
 0x19b   :  { %v2901_v42 = vadd.f32 %v5713_v38, %v2900_v9  ;;  %v2716_v59 = vsel %vm2686_vm14, %v2651_v1, %v2164_v62  ;;  %2101 = vrot.lane.b32.xlu1 %v5828_v55, %s3977_s12  ;;  %2049 = vrot.lane.b32.xlu0 %v5888_v0, %s3976_s11  ;;  %v3140_v41 = vmax.f32 %v2898_v47, 0.0  ;;  %v2669_v22 = vsel %vm2621_vm13, %v2604_v43, %v5882_v46  ;;  %v6055_v47 = vld [vmem:[%s6647_s0 + $0x180] sm:$0xf] }
 0x19c   :  { %v3143_v23 = vmax.f32 %v2909_v12, 0.0  ;;  %3772 = vmatprep.mubr.msk.bf16.mxu0 %vm2778_vm15, %v2716_v59  ;;  %v1154_v14 = vrot.slane %v1152_v50, 4  ;;  %v1153_v31 = vsel %vm4065_vm2, %v3467_v6, %v1152_v50  ;;  %v860_v1 = vshll.u32 %v6055_v47, 16 }
 0x19d   :  { %v3141_v2 = vmax.f32 %v2901_v42, 0.0  ;;  %3773 = vmatmul.mubr.msk.bf16.gmra.mrb[28].mxu0 %vm2778_vm15, %v2718_v33  ;;  %v5979_v32 = vpop.permute.xlu1 %1587  ;;  %v870_v12 = vshrl.u32 %v6060_v10, 16  ;;  %v866_v33 = vshll.u32 %v6060_v10, 16 }
 0x19e   :  { %v5983_v49 = vpack.c.bf16 %v3143_v23, %v3142_v57  ;;  %v5985_v34 = vpop.permute.xlu0 %1603  ;;  %v1156_v45 = vsel %vm4065_vm2, %v1154_v14, %v1155_v60  ;;  %v6105_v14 = vcombine.low %v6055_v47, %v6060_v10 }
 0x19f   :  { %v5991_v58 = vpack.c.bf16 %v3141_v2, %v3140_v41  ;;  %2187 = vrot.lane.b32.xlu1 %v5856_v15, %s3978_s20  ;;  %2033 = vrot.lane.b32.xlu0 %v5892_v16, %s3976_s11  ;;  %v6042_v36 = vcombine.low %v1153_v31, %v1156_v45  ;;  %v868_v42 = vrot.slane %v866_v33, 5  ;;  %v872_v59 = vrot.slane %v870_v12, 4  ;;  %v6116_v12 = vld [vmem:[%s6647_s0 + $0x18c] sm:$0xf]  ;;  %v6121_v33 = vld [vmem:[%s6647_s0 + $0x190] sm:$0xf] }
 0x1a1   :  { %v6008_v54 = vpop.permute.xlu1 %1763  ;;  %v873_v39 = vor.u32 %v872_v59, %v868_v42  ;;  %v881_v59 = vshrl.u32 %v6116_v12, 16 }
 0x1a2   :  { %v2182_v5 = vpop.permute.xlu0 %2181 }
 0x1a3   :  { %v2734_v24 = vsel %vm2686_vm14, %v2669_v22, %v2182_v5  ;;  %2103 = vrot.lane.b32.xlu1 %v5987_v8, %s3977_s12  ;;  %2119 = vrot.lane.b32.xlu0 %v5997_v17, %s3977_s12  ;;  %v874_v45 = vrot.slane %v873_v39, 4 }
 0x1a4   :  { %3789 = vmatmul.mubr.msk.bf16.vlgmr.msra.gmra.mrb[0].mxu1 %vm2778_vm15, %v2734_v24 }
 0x1a5   :  { %v6022_v30 = vpop.permute.xlu1 %1747 }
 0x1a6   :  { %v6024_v46 = vpop.permute.xlu0 %1605 }
 0x1a7   :  { %2189 = vrot.lane.b32.xlu1 %v6017_v27, %s3978_s20  ;;  %1611 = vrot.lane.b32.xlu0 %v5785_v37, %s3973_s21 }
 0x1a9   :  { %v6034_v63 = vpop.permute.xlu1 %1833 }
 0x1aa   :  { %v6036_v53 = vpop.permute.xlu0 %1589 }
 0x1ab   :  { %1613 = vrot.lane.b32.xlu1 %v5997_v17, %s3973_s21  ;;  %2171 = vrot.lane.b32.xlu0 %v5884_v51, %s3978_s20 }
 0x1ad   :  { %v6044_v13 = vpop.permute.xlu1 %1817 }
 0x1ae   :  { %v6046_v37 = vpop.permute.xlu0 %1765 }
 0x1af   :  { %2173 = vrot.lane.b32.xlu1 %v6042_v36, %s3978_s20  ;;  %1595 = vrot.lane.b32.xlu0 %v5828_v55, %s3973_s21  ;;  %v857_v55 = vshrl.u32 %v6055_v47, 16 }
 0x1b1   :  { %v6062_v4 = vpop.permute.xlu1 %1903 }
 0x1b2   :  { %v6064_v28 = vpop.permute.xlu0 %1749 }
 0x1b3   :  { %1755 = vrot.lane.b32.xlu1 %v5884_v51, %s3972_s16  ;;  %1771 = vrot.lane.b32.xlu0 %v5856_v15, %s3972_s16  ;;  %v859_v15 = vrot.slane %v857_v55, 4  ;;  %v862_v51 = vrot.slane %v860_v1, 5  ;;  %v878_v55 = vrot.slane %v876_v7, 5 }
 0x1b5   :  { %v6074_v9 = vpop.permute.xlu1 %1887  ;;  %v863_v40 = vor.u32 %v862_v51, %v859_v15  ;;  %v879_v15 = vsel %vm4090_vm5, %v874_v45, %v878_v55  ;;  %v1215_v51 = vrot.slane %v6060_v10, 5  ;;  %v3476_v10 = vrot.slane %v6055_v47, 9 }
 0x1b6   :  { %v6076_v62 = vpop.permute.xlu0 %1835 }
 0x1b7   :  { %v3754_v35 = vpop.f32.mrb[8].mxu0  ;;  %1841 = vrot.lane.b32.xlu1 %v5888_v0, %s3971_s7  ;;  %1597 = vrot.lane.b32.xlu0 %v5987_v8, %s3973_s21  ;;  %v864_v31 = vrot.slane %v863_v40, 4  ;;  %v1216_v47 = vsel %vm4065_vm2, %v3476_v10, %v1215_v51 }
 0x1b8   :  { %v2922_v11 = vadd.f32 %v3754_v35, %v5713_v38  ;;  %v2913_v25 = vpop.f32.mrb[9].mxu0 }
 0x1b9   :  { %v2914_v57 = vadd.f32 %v5713_v38, %v2913_v25  ;;  %v3755_v23 = vpop.f32.mrb[10].mxu0  ;;  %v6087_v44 = vpop.permute.xlu1 %1973  ;;  %v894_v25 = vshrl.u32 %v6121_v33, 16 }
 0x1ba   :  { %v2925_v19 = vadd.f32 %v3755_v23, %v5713_v38  ;;  %v2916_v41 = vpop.f32.mrb[11].mxu0  ;;  %v6090_v2 = vpop.permute.xlu0 %1819  ;;  %v3146_v20 = vmax.f32 %v2922_v11, 0.0  ;;  %v884_v11 = vshll.u32 %v6116_v12, 16 }
 0x1bb   :  { %v2917_v56 = vadd.f32 %v5713_v38, %v2916_v41  ;;  %1825 = vrot.lane.b32.xlu1 %v5892_v16, %s3971_s7  ;;  %1773 = vrot.lane.b32.xlu0 %v6017_v27, %s3972_s16  ;;  %v3144_v43 = vmax.f32 %v2914_v57, 0.0  ;;  %v890_v57 = vshll.u32 %v6121_v33, 16  ;;  %v1218_v41 = vrot.slane %v123_v26, 5 }
 0x1bc   :  { %v3147_v50 = vmax.f32 %v2925_v19, 0.0  ;;  %v1217_v19 = vrot.slane %v1215_v51, 4  ;;  %v886_v40 = vrot.slane %v884_v11, 5  ;;  %v896_v7 = vrot.slane %v894_v25, 4 }
 0x1bd   :  { %v3145_v22 = vmax.f32 %v2917_v56, 0.0  ;;  %v6097_v5 = vpop.permute.xlu1 %1957  ;;  %v883_v56 = vrot.slane %v881_v59, 4  ;;  %v892_v39 = vrot.slane %v890_v57, 5 }
 0x1be   :  { %v6099_v24 = vpack.c.bf16 %v3147_v50, %v3146_v20  ;;  %v6101_v6 = vpop.permute.xlu0 %1905  ;;  %v6150_v50 = vld [vmem:[%s6647_s0 + $0x194] sm:$0x1]  ;;  %v1219_v26 = vsel %vm4065_vm2, %v1217_v19, %v1218_v41  ;;  %v3945_v41 = vld [vmem:[%s6647_s0 + $0xdc] sm:$0xf] }
 0x1bf   :  { %v6107_v60 = vpack.c.bf16 %v3145_v22, %v3144_v43  ;;  %1911 = vrot.lane.b32.xlu1 %v5997_v17, %s3974_s26  ;;  %1757 = vrot.lane.b32.xlu0 %v6042_v36, %s3972_s16  ;;  %v869_v17 = vsel %vm4090_vm5, %v864_v31, %v868_v42  ;;  %v2274_v43 = vsel %vm2199_vm7, %v5055_v52, %v5985_v34  ;;  %v900_v55 = vshll.u32 %v6150_v50, 16 }
 0x1c0   :  { %v6144_v42 = vcombine.low %v869_v17, %v879_v15  ;;  %v2346_v22 = vsel %vm2296_vm8, %v2274_v43, %v6008_v54  ;;  %v887_v31 = vor.u32 %v886_v40, %v883_v56  ;;  %v897_v45 = vor.u32 %v896_v7, %v892_v39  ;;  %v6682_v54 = vld [vmem:[#allocation6_spill] sm:$0xff] }
 0x1c1   :  { %v2044_v1 = vpop.permute.xlu1 %2043  ;;  %v2411_v52 = vsel %vm2361_vm9, %v2346_v22, %v6034_v63  ;;  %v6180_v51 = vcombine.low %v1216_v47, %v1219_v26  ;;  %v902_v25 = vrot.slane %v900_v55, 5  ;;  %v1222_v47 = vrot.slane %v6121_v33, 5 }
 0x1c2   :  { %v6123_v35 = vpop.permute.xlu0 %1889  ;;  %v888_v63 = vrot.slane %v887_v31, 4  ;;  %v898_v11 = vrot.slane %v897_v45, 4  ;;  %v6219_v45 = vcombine.low %v6116_v12, %v6121_v33 }
 0x1c3   :  { %1895 = vrot.lane.b32.xlu1 %v5987_v8, %s3974_s26  ;;  %1843 = vrot.lane.b32.xlu0 %v6105_v14, %s3971_s7 }
 0x1c4   :  { %v903_v43 = vsel %vm4090_vm5, %v898_v11, %v902_v25 }
 0x1c5   :  { %v6138_v8 = vpop.permute.xlu1 %2027 }
 0x1c6   :  { %v1976_v23 = vpop.permute.xlu0 %1975 }
 0x1c7   :  { %1981 = vrot.lane.b32.xlu1 %v6017_v27, %s3975_s29  ;;  %1827 = vrot.lane.b32.xlu0 %v5824_v18, %s3971_s7 }
 0x1c9   :  { %v2114_v20 = vpop.permute.xlu1 %2113 }
 0x1ca   :  { %v6152_v27 = vpop.permute.xlu0 %1959 }
 0x1cb   :  { %1965 = vrot.lane.b32.xlu1 %v6042_v36, %s3975_s29  ;;  %1913 = vrot.lane.b32.xlu0 %v6144_v42, %s3974_s26  ;;  %v2476_v36 = vsel %vm2426_vm10, %v2411_v52, %v6062_v4 }
 0x1cc   :  { %v2541_v15 = vsel %vm2491_vm11, %v2476_v36, %v6087_v44  ;;  %v3944_v44 = vld [vmem:[%s6647_s0 + $0xd8] sm:$0xf] }
 0x1cd   :  { %v6170_v34 = vpop.permute.xlu1 %2097  ;;  %v2606_v59 = vsel %vm2556_vm12, %v2541_v15, %v2044_v1  ;;  %v3498_v56 = vcombine.low %v3944_v44, %v3945_v41  ;;  %v6683_v1 = vld [vmem:[#allocation9_spill] sm:$0xff]  ;;  %v6685_v41 = vld [vmem:[#allocation10_spill] sm:$0xff] }
 0x1ce   :  { %v2046_v17 = vpop.permute.xlu0 %2045  ;;  %v2671_v57 = vsel %vm2621_vm13, %v2606_v59, %v2114_v20  ;;  %v2277_v40 = vsel %vm2199_vm7, %v6683_v1, %v6024_v46  ;;  %v893_v20 = vsel %vm4090_vm5, %v888_v63, %v892_v39  ;;  %v6684_v39 = vld [vmem:[#allocation7_spill] sm:$0xff]  ;;  %v1224_v59 = vrot.slane %v1222_v47, 4 }
 0x1cf   :  { %2051 = vrot.lane.b32.xlu1 %v6105_v14, %s3976_s11  ;;  %1897 = vrot.lane.b32.xlu0 %v6682_v54, %s3974_s26  ;;  %v2348_v7 = vsel %vm2296_vm8, %v2277_v40, %v6046_v37  ;;  %v6221_v55 = vcombine.low %v893_v20, %v903_v43 }
 0x1d0   :  { %v2413_v46 = vsel %vm2361_vm9, %v2348_v7, %v6076_v62  ;;  %v3477_v62 = vrot.slane %v6116_v12, 9 }
 0x1d1   :  { %v2184_v4 = vpop.permute.xlu1 %2183  ;;  %v2478_v26 = vsel %vm2426_vm10, %v2413_v46, %v6101_v6  ;;  %v6227_v6 = vld [vmem:[%s6647_s0 + $0x198] sm:$0xf] }
 0x1d2   :  { %v2736_v10 = vsel %vm2686_vm14, %v2671_v57, %v2184_v4  ;;  %v6185_v19 = vpop.permute.xlu0 %2029  ;;  %v2543_v37 = vsel %vm2491_vm11, %v2478_v26, %v1976_v23  ;;  %v2250_v23 = vsel %vm2199_vm7, %v3498_v56, %v5979_v32  ;;  %v1225_v57 = vrot.slane %v6150_v50, 5 }
 0x1d3   :  { %2035 = vrot.lane.b32.xlu1 %v5824_v18, %s3976_s11  ;;  %1983 = vrot.lane.b32.xlu0 %v6180_v51, %s3975_s29  ;;  %v2608_v52 = vsel %vm2556_vm12, %v2543_v37, %v2046_v17  ;;  %v2330_v33 = vsel %vm2296_vm8, %v2250_v23, %v6022_v30  ;;  %v1252_v30 = vshrl.u32 %v6227_v6, 16  ;;  %v2253_v56 = vsel %vm2199_vm7, %v6685_v41, %v6036_v53  ;;  %v6328_v41 = vld [vmem:[%s6647_s0 + $0x1a8] sm:$0xf] }
 0x1d4   :  { %3792 = vmatprep.mubr.msk.bf16.mxu1 %vm2778_vm15, %v2736_v10  ;;  %v2395_v32 = vsel %vm2361_vm9, %v2330_v33, %v6044_v13  ;;  %v6258_v13 = vld [vmem:[%s6647_s0 + $0x19c] sm:$0xf]  ;;  %v1255_v40 = vshll.u32 %v6227_v6, 16  ;;  %v2332_v53 = vsel %vm2296_vm8, %v2253_v56, %v6064_v28 }
 0x1d5   :  { %v2100_v18 = vpop.permute.xlu1 %2099  ;;  %v2460_v1 = vsel %vm2426_vm10, %v2395_v32, %v6074_v9  ;;  %v1265_v23 = vshrl.u32 %v6258_v13, 16 }
 0x1d6   :  { %v2116_v22 = vpop.permute.xlu0 %2115  ;;  %v2525_v9 = vsel %vm2491_vm11, %v2460_v1, %v6097_v5 }
 0x1d7   :  { %v3758_v31 = vpop.f32.mrb[12].mxu0  ;;  %2121 = vrot.lane.b32.xlu1 %v6144_v42, %s3977_s12  ;;  %1967 = vrot.lane.b32.xlu0 %v6684_v39, %s3975_s29  ;;  %v2673_v63 = vsel %vm2621_vm13, %v2608_v52, %v2116_v22  ;;  %v2590_v43 = vsel %vm2556_vm12, %v2525_v9, %v6138_v8  ;;  %v1290_v9 = vrot.slane %v6258_v13, 5 }
 0x1d8   :  { %v2938_v36 = vadd.f32 %v3758_v31, %v5713_v38  ;;  %v2929_v15 = vpop.f32.mrb[13].mxu0  ;;  %v2655_v5 = vsel %vm2621_vm13, %v2590_v43, %v6170_v34 }
 0x1d9   :  { %v2930_v12 = vadd.f32 %v5713_v38, %v2929_v15  ;;  %v3759_v11 = vpop.f32.mrb[14].mxu0  ;;  %v2186_v25 = vpop.permute.xlu1 %2185 }
 0x1da   :  { %v2941_v17 = vadd.f32 %v3759_v11, %v5713_v38  ;;  %v2738_v4 = vsel %vm2686_vm14, %v2673_v63, %v2186_v25  ;;  %v2932_v10 = vpop.f32.mrb[15].mxu0  ;;  %v6242_v44 = vpop.permute.xlu0 %1607  ;;  %v3150_v7 = vmax.f32 %v2938_v36, 0.0  ;;  %v1226_v36 = vsel %vm4065_vm2, %v1224_v59, %v1225_v57  ;;  %v6686_v25 = vld [vmem:[#allocation5_spill] sm:$0xff] }
 0x1db   :  { %v2933_v50 = vadd.f32 %v5713_v38, %v2932_v10  ;;  %2105 = vrot.lane.b32.xlu1 %v6682_v54, %s3977_s12  ;;  %2053 = vrot.lane.b32.xlu0 %v6219_v45, %s3976_s11  ;;  %v2397_v54 = vsel %vm2361_vm9, %v2332_v53, %v6090_v2  ;;  %v3148_v46 = vmax.f32 %v2930_v12, 0.0  ;;  %v1257_v11 = vrot.slane %v1255_v40, 5  ;;  %v6321_v10 = vld [vmem:[%s6647_s0 + $0x1a4] sm:$0xf] }
 0x1dc   :  { %v3151_v20 = vmax.f32 %v2941_v17, 0.0  ;;  %3793 = vmatmul.mubr.msk.bf16.gmra.mrb[4].mxu1 %vm2778_vm15, %v2738_v4  ;;  %v2462_v28 = vsel %vm2426_vm10, %v2397_v54, %v6123_v35  ;;  %v1261_v35 = vshll.u32 %v6258_v13, 16  ;;  %v1320_v40 = vshrl.u32 %v6321_v10, 16 }
 0x1dd   :  { %v3149_v26 = vmax.f32 %v2933_v50, 0.0  ;;  %v6270_v22 = vpop.permute.xlu1 %1609  ;;  %v2527_v2 = vsel %vm2491_vm11, %v2462_v28, %v6152_v27  ;;  %v1223_v27 = vsel %vm4065_vm2, %v3477_v62, %v1222_v47  ;;  %v1267_v62 = vrot.slane %v1265_v23, 4 }
 0x1de   :  { %v6276_v37 = vpack.c.bf16 %v3151_v20, %v3150_v7  ;;  %v2168_v31 = vpop.permute.xlu0 %2167  ;;  %v2592_v34 = vsel %vm2556_vm12, %v2527_v2, %v6185_v19  ;;  %v6304_v19 = vcombine.low %v1223_v27, %v1226_v36  ;;  %v1263_v47 = vrot.slane %v1261_v35, 5  ;;  %v132_v35 = vld [vmem:[%s6647_s0 + $0x1ac] sm:$0x1]  ;;  %v6687_v27 = vld [vmem:[#allocation8_spill] sm:$0xff] }
 0x1df   :  { %v6281_v52 = vpack.c.bf16 %v3149_v26, %v3148_v46  ;;  %v2720_v8 = vsel %vm2686_vm14, %v2655_v5, %v2168_v31  ;;  %2191 = vrot.lane.b32.xlu1 %v6180_v51, %s3978_s20  ;;  %2037 = vrot.lane.b32.xlu0 %v5022_v61, %s3976_s11  ;;  %v2657_v15 = vsel %vm2621_vm13, %v2592_v34, %v2100_v18  ;;  %v1254_v61 = vrot.slane %v1252_v30, 4  ;;  %v129_v18 = vld [vmem:[%s6647_s0 + $0x1a0] sm:$0x1] }
 0x1e0   :  { %3776 = vmatprep.mubr.msk.bf16.mxu0 %vm2778_vm15, %v2720_v8  ;;  %v1268_v17 = vor.u32 %v1267_v62, %v1263_v47  ;;  %v1271_v4 = vshll.u32 %v129_v18, 16  ;;  %v1323_v53 = vshll.u32 %v6321_v10, 16  ;;  %v1333_v7 = vshrl.u32 %v6328_v41, 16 }
 0x1e1   :  { %v2170_v33 = vpop.permute.xlu1 %2169  ;;  %v1258_v32 = vor.u32 %v1257_v11, %v1254_v61  ;;  %v1329_v20 = vshll.u32 %v6328_v41, 16  ;;  %v3479_v26 = vrot.slane %v6227_v6, 9  ;;  %v1322_v28 = vrot.slane %v1320_v40, 4 }
 0x1e2   :  { %v2722_v63 = vsel %vm2686_vm14, %v2657_v15, %v2170_v33  ;;  %v6298_v12 = vpop.permute.xlu0 %1591  ;;  %v1273_v50 = vrot.slane %v1271_v4, 5  ;;  %v1325_v5 = vrot.slane %v1323_v53, 5  ;;  %v1292_v31 = vrot.slane %v1290_v9, 4 }
 0x1e3   :  { %2107 = vrot.lane.b32.xlu1 %v6686_v25, %s3977_s12  ;;  %2123 = vrot.lane.b32.xlu0 %v6221_v55, %s3977_s12  ;;  %v1259_v1 = vrot.slane %v1258_v32, 4  ;;  %v1293_v23 = vrot.slane %v129_v18, 5  ;;  %v1335_v2 = vrot.slane %v1333_v7, 4  ;;  %v1291_v15 = vsel %vm4065_vm2, %v3479_v26, %v1290_v9 }
 0x1e4   :  { %3777 = vmatmul.mubr.msk.bf16.gmra.mrb[32].mxu0 %vm2778_vm15, %v2722_v63  ;;  %v1326_v36 = vor.u32 %v1325_v5, %v1322_v28  ;;  %v1339_v61 = vshll.u32 %v132_v35, 16  ;;  %v1358_v32 = vrot.slane %v6328_v41, 5  ;;  %v3481_v28 = vrot.slane %v6321_v10, 9 }
 0x1e5   :  { %v6310_v59 = vpop.permute.xlu1 %1751  ;;  %v1294_v33 = vsel %vm4065_vm2, %v1292_v31, %v1293_v23 }
 0x1e6   :  { %v6312_v57 = vpop.permute.xlu0 %1767  ;;  %v3583_v62 = vcombine.low %v1291_v15, %v1294_v33  ;;  %v1327_v18 = vrot.slane %v1326_v36, 4  ;;  %v1360_v5 = vrot.slane %v1358_v32, 4 }
 0x1e7   :  { %2193 = vrot.lane.b32.xlu1 %v6304_v19, %s3978_s20  ;;  %1615 = vrot.lane.b32.xlu0 %v6144_v42, %s3973_s21  ;;  %v1269_v42 = vrot.slane %v1268_v17, 4 }
 0x1e9   :  { %v6323_v30 = vpop.permute.xlu1 %1837  ;;  %v1274_v46 = vsel %vm4090_vm5, %v1269_v42, %v1273_v50  ;;  %v1341_v42 = vrot.slane %v1339_v61, 5 }
 0x1ea   :  { %v6330_v56 = vpop.permute.xlu0 %1593 }
 0x1eb   :  { %1775 = vrot.lane.b32.xlu1 %v6180_v51, %s3972_s16  ;;  %2175 = vrot.lane.b32.xlu0 %v6684_v39, %s3978_s20  ;;  %v6347_v51 = vcombine.low %v6227_v6, %v6258_v13  ;;  %v1264_v39 = vsel %vm4090_vm5, %v1259_v1, %v1263_v47  ;;  %v1331_v13 = vrot.slane %v1329_v20, 5 }
 0x1ec   :  { %v3581_v6 = vcombine.low %v1264_v39, %v1274_v46  ;;  %v3585_v39 = vcombine.low %v6321_v10, %v6328_v41  ;;  %v1359_v10 = vsel %vm4065_vm2, %v3481_v28, %v1358_v32 }
 0x1ed   :  { %v6341_v54 = vpop.permute.xlu1 %1821  ;;  %v1336_v63 = vor.u32 %v1335_v2, %v1331_v13  ;;  %v1332_v26 = vsel %vm4090_vm5, %v1327_v18, %v1331_v13  ;;  %v6689_v18 = vld [vmem:[#allocation15_spill] sm:$0xff] }
 0x1ee   :  { %v6343_v43 = vpop.permute.xlu0 %1769 }
 0x1ef   :  { %1777 = vrot.lane.b32.xlu1 %v6304_v19, %s3972_s16  ;;  %1617 = vrot.lane.b32.xlu0 %v6221_v55, %s3973_s21  ;;  %v1337_v1 = vrot.slane %v1336_v63, 4 }
 0x1f1   :  { %v6358_v8 = vpop.permute.xlu1 %1907  ;;  %v1342_v2 = vsel %vm4090_vm5, %v1337_v1, %v1341_v42 }
 0x1f2   :  { %v6363_v34 = vpop.permute.xlu0 %1753 }
 0x1f3   :  { %1847 = vrot.lane.b32.xlu1 %v6347_v51, %s3971_s7  ;;  %2177 = vrot.lane.b32.xlu0 %v6687_v27, %s3978_s20  ;;  %v1361_v27 = vrot.slane %v132_v35, 5  ;;  %v6688_v35 = vld [vmem:[#allocation16_spill] sm:$0xff] }
 0x1f5   :  { %v6373_v11 = vpop.permute.xlu1 %1891  ;;  %v1362_v48 = vsel %vm4065_vm2, %v1360_v5, %v1361_v27 }
 0x1f6   :  { %v6375_v25 = vpop.permute.xlu0 %1839 }
 0x1f7   :  { %v3762_v47 = vpop.f32.mrb[16].mxu0  ;;  %1917 = vrot.lane.b32.xlu1 %v3581_v6, %s3974_s26  ;;  %1845 = vrot.lane.b32.xlu0 %v6219_v45, %s3971_s7 }
 0x1f8   :  { %v2954_v17 = vadd.f32 %v3762_v47, %v5713_v38  ;;  %v2945_v4 = vpop.f32.mrb[17].mxu0  ;;  %v3589_v47 = vcombine.low %v1359_v10, %v1362_v48 }
 0x1f9   :  { %v2946_v50 = vadd.f32 %v5713_v38, %v2945_v4  ;;  %v3763_v40 = vpop.f32.mrb[18].mxu0  ;;  %v1978_v53 = vpop.permute.xlu1 %1977  ;;  %v6690_v4 = vld [vmem:[#allocation11_spill] sm:$0xff] }
 0x1fa   :  { %v2957_v9 = vadd.f32 %v3763_v40, %v5713_v38  ;;  %v2948_v7 = vpop.f32.mrb[19].mxu0  ;;  %v6384_v20 = vpop.permute.xlu0 %1823  ;;  %v3154_v31 = vmax.f32 %v2954_v17, 0.0  ;;  %v2280_v1 = vsel %vm2199_vm7, %v6690_v4, %v6242_v44 }
 0x1fb   :  { %v2949_v46 = vadd.f32 %v5713_v38, %v2948_v7  ;;  %1987 = vrot.lane.b32.xlu1 %v3583_v62, %s3975_s29  ;;  %1915 = vrot.lane.b32.xlu0 %v6221_v55, %s3974_s26  ;;  %v3152_v41 = vmax.f32 %v2946_v50, 0.0  ;;  %v3587_v55 = vcombine.low %v1332_v26, %v1342_v2  ;;  %v2350_v42 = vsel %vm2296_vm8, %v2280_v1, %v6312_v57  ;;  %v6692_v2 = vld [vmem:[#allocation12_spill] sm:$0xff] }
 0x1fc   :  { %v3155_v23 = vmax.f32 %v2957_v9, 0.0  ;;  %v2256_v27 = vsel %vm2199_vm7, %v6692_v2, %v6298_v12 }
 0x1fd   :  { %v3153_v36 = vmax.f32 %v2949_v46, 0.0  ;;  %v6397_v38 = vpop.permute.xlu1 %1961 }
 0x1fe   :  { %v3820_v15 = vpack.c.bf16 %v3155_v23, %v3154_v31  ;;  %v1910_v33 = vpop.permute.xlu0 %1909 }
 0x1ff   :  { %v3816_v63 = vpack.c.bf16 %v3153_v36, %v3152_v41  ;;  %2057 = vrot.lane.b32.xlu1 %v3585_v39, %s3976_s11  ;;  %1985 = vrot.lane.b32.xlu0 %v6304_v19, %s3975_s29  ;;  %v2334_v36 = vsel %vm2296_vm8, %v2256_v27, %v6310_v59 }
 0x200   :  { %v2399_v12 = vsel %vm2361_vm9, %v2334_v36, %v6341_v54 }
 0x201   :  { %3817 = vmatprep.subr.bf16.mxu1 %v3816_v63  ;;  %v2048_v13 = vpop.permute.xlu1 %2047 }
 0x202   :  { %3819 = vmatpush3.bf16.msra.mxu1 %v6688_v35  ;;  %v6407_v61 = vpop.permute.xlu0 %1893 }
 0x203   :  { %3821 = vmatprep.subr.bf16.mxu1 %v3820_v15  ;;  %2127 = vrot.lane.b32.xlu1 %v3587_v55, %s3977_s12 }
 0x204   :  { %2055 = vrot.lane.b32.xlu0 %v6347_v51, %s3976_s11  ;;  %v2415_v51 = vsel %vm2361_vm9, %v2350_v42, %v6323_v30 }
 0x205   :  { %v2032_v19 = vpop.permute.xlu1 %2031  ;;  %v2480_v40 = vsel %vm2426_vm10, %v2415_v51, %v6358_v8 }
 0x206   :  { %3823 = vmatpush3.bf16.msra.mxu1 %v6689_v18  ;;  %v1980_v32 = vpop.permute.xlu0 %1979  ;;  %v2464_v18 = vsel %vm2426_vm10, %v2399_v12, %v6373_v11 }
 0x207   :  { %2197 = vrot.lane.b32.xlu1 %v3589_v47, %s3978_s20  ;;  %v6693_v47 = vld [vmem:[#allocation14_spill] sm:$0xff] }
 0x208   :  { %2125 = vrot.lane.b32.xlu0 %v3581_v6, %s3977_s12  ;;  %v2545_v6 = vsel %vm2491_vm11, %v2480_v40, %v1978_v53  ;;  %v2259_v59 = vsel %vm2199_vm7, %v6693_v47, %v6330_v56 }
 0x209   :  { %v2118_v21 = vpop.permute.xlu1 %2117  ;;  %v2610_v7 = vsel %vm2556_vm12, %v2545_v6, %v2048_v13  ;;  %v2336_v54 = vsel %vm2296_vm8, %v2259_v59, %v6363_v34 }
 0x20a   :  { %v1964_v17 = vpop.permute.xlu0 %1963  ;;  %v2675_v39 = vsel %vm2621_vm13, %v2610_v7, %v2118_v21  ;;  %v2529_v21 = vsel %vm2491_vm11, %v2464_v18, %v6397_v38  ;;  %v2401_v42 = vsel %vm2361_vm9, %v2336_v54, %v6384_v20 }
 0x20b   :  { %v2594_v56 = vsel %vm2556_vm12, %v2529_v21, %v2032_v19 }
 0x20c   :  { %2195 = vrot.lane.b32.xlu0 %v3583_v62, %s3978_s20  ;;  %v6691_v62 = vld [vmem:[#allocation13_spill] sm:$0xff]  ;;  %s3982_s20 = smov [#allocation2]  }
 0x20d   :  { %v2102_v50 = vpop.permute.xlu1 %2101  ;;  %v2283_v26 = vsel %vm2199_vm7, %v6691_v62, %v6270_v22  ;;  %s3438_s8 = sshll.u32 %s3982_s20, 4  ;;  %s3439_s8 = int_to_ptr.vmem [resolvable:$true] %s3438_s8 }
 0x20e   :  { %v2050_v9 = vpop.permute.xlu0 %2049  ;;  %v2352_v30 = vsel %vm2296_vm8, %v2283_v26, %v6343_v43  ;;  %v6446_v43 = vld [vmem:[%s6649_s2] ss:$0 sm:$0xff]  ;;  %v2659_v6 = vsel %vm2621_vm13, %v2594_v56, %v2102_v50  ;;  %p3952_p1 = scmp.lt.s32.totalorder %s3439_s8, %s3439_s8 }
 0x20f   :  { %v2417_v8 = vsel %vm2361_vm9, %v2352_v30, %v6375_v25 }
 0x210   :  { %v2482_v28 = vsel %vm2426_vm10, %v2417_v8, %v1910_v33 }
 0x211   :  { %v2188_v44 = vpop.permute.xlu1 %2187  ;;  %v2547_v31 = vsel %vm2491_vm11, %v2482_v28, %v1980_v32 }
 0x212   :  { %v2740_v46 = vsel %vm2686_vm14, %v2675_v39, %v2188_v44  ;;  %v2034_v57 = vpop.permute.xlu0 %2033  ;;  %v2612_v22 = vsel %vm2556_vm12, %v2547_v31, %v2050_v9  ;;  %v2466_v9 = vsel %vm2426_vm10, %v2401_v42, %v6407_v61 }
 0x213   :  { %3796 = vmatprep.mubr.msk.bf16.mxu1 %vm2778_vm15, %v2740_v46  ;;  %v2531_v38 = vsel %vm2491_vm11, %v2466_v9, %v1964_v17 }
 0x214   :  { %v2596_v20 = vsel %vm2556_vm12, %v2531_v38, %v2034_v57 }
 0x215   :  { %v2104_v53 = vpop.permute.xlu1 %2103 }
 0x216   :  { %v2120_v5 = vpop.permute.xlu0 %2119  ;;  %v2661_v19 = vsel %vm2621_vm13, %v2596_v20, %v2104_v53 }
 0x217   :  { %v3766_v23 = vpop.f32.mrb[20].mxu0  ;;  %v2677_v15 = vsel %vm2621_vm13, %v2612_v22, %v2120_v5 }
 0x218   :  { %v2970_v25 = vadd.f32 %v6446_v43, %v3766_v23  ;;  %v2961_v41 = vpop.f32.mrb[21].mxu0 }
 0x219   :  { %v2962_v33 = vadd.f32 %v6446_v43, %v2961_v41  ;;  %v3767_v63 = vpop.f32.mrb[22].mxu0  ;;  %v2190_v55 = vpop.permute.xlu1 %2189 }
 0x21a   :  { %v2973_v10 = vadd.f32 %v6446_v43, %v3767_v63  ;;  %v2742_v48 = vsel %vm2686_vm14, %v2677_v15, %v2190_v55  ;;  %v2964_v13 = vpop.f32.mrb[23].mxu0  ;;  %v6457_v35 = vpop.permute.xlu0 %1611  ;;  %v3158_v4 = vmax.f32 %v2970_v25, 0.0 }
 0x21b   :  { %v2965_v32 = vadd.f32 %v6446_v43, %v2964_v13  ;;  %3797 = vmatmul.mubr.msk.bf16.gmra.mrb[8].mxu1 %vm2778_vm15, %v2742_v48  ;;  %v3156_v51 = vmax.f32 %v2962_v33, 0.0 }
 0x21c   :  { %v3159_v1 = vmax.f32 %v2973_v10, 0.0 }
 0x21d   :  { %v3157_v40 = vmax.f32 %v2965_v32, 0.0  ;;  %v6473_v11 = vpop.permute.xlu1 %1613 }
 0x21e   :  { %v3828_v34 = vpack.c.bf16 %v3159_v1, %v3158_v4  ;;  %v2172_v7 = vpop.permute.xlu0 %2171  ;;  %v2286_v1 = vsel %vm2199_vm7, %v5761_v3, %v6457_v35  ;;  %v2289_v3 = vsel %vm2199_vm7, %v5888_v0, %v6473_v11 }
 0x21f   :  { %v3824_v39 = vpack.c.bf16 %v3157_v40, %v3156_v51  ;;  %v2724_v44 = vsel %vm2686_vm14, %v2659_v6, %v2172_v7 }
 0x220   :  { %3780 = vmatprep.mubr.msk.bf16.mxu0 %vm2778_vm15, %v2724_v44 }
 0x221   :  { %3825 = vmatprep.subr.bf16.mxu1 %v3824_v39  ;;  %v2174_v46 = vpop.permute.xlu1 %2173 }
 0x222   :  { %v2726_v62 = vsel %vm2686_vm14, %v2661_v19, %v2174_v46  ;;  %3827 = vmatpush3.bf16.msra.mxu1 %v5991_v58  ;;  %v6485_v61 = vpop.permute.xlu0 %1595 }
 0x223   :  { %3829 = vmatprep.subr.bf16.mxu1 %v3828_v34  ;;  %3781 = vmatmul.mubr.msk.bf16.gmra.mrb[36].mxu0 %vm2778_vm15, %v2726_v62  ;;  %v2262_v62 = vsel %vm2199_vm7, %v5778_v29, %v6485_v61 }
 0x225   :  { %v1756_v17 = vpop.permute.xlu1 %1755 }
 0x226   :  { %3831 = vmatpush3.bf16.msra.mxu1 %v5983_v49  ;;  %v1772_v50 = vpop.permute.xlu0 %1771  ;;  %v2338_v0 = vsel %vm2296_vm8, %v2262_v62, %v1756_v17 }
 0x227   :  { %v2354_v42 = vsel %vm2296_vm8, %v2286_v1, %v1772_v50 }
 0x229   :  { %v1842_v57 = vpop.permute.xlu1 %1841 }
 0x22a   :  { %v6489_v26 = vpop.permute.xlu0 %1597  ;;  %v2419_v56 = vsel %vm2361_vm9, %v2354_v42, %v1842_v57 }
 0x22d   :  { %v1826_v30 = vpop.permute.xlu1 %1825 }
 0x22e   :  { %v1774_v8 = vpop.permute.xlu0 %1773 }
 0x22f   :  { %v2356_v35 = vsel %vm2296_vm8, %v2289_v3, %v1774_v8  ;;  %v2403_v8 = vsel %vm2361_vm9, %v2338_v0, %v1826_v30  ;;  %v2265_v30 = vsel %vm2199_vm7, %v5892_v16, %v6489_v26 }
 0x231   :  { %v1912_v53 = vpop.permute.xlu1 %1911 }
 0x232   :  { %v6491_v28 = vpop.permute.xlu0 %1757 }
 0x234   :  { %v3770_v5 = vpop.f32.mrb[24].mxu0 }
 0x235   :  { %v2986_v58 = vadd.f32 %v6446_v43, %v3770_v5  ;;  %v2977_v31 = vpop.f32.mrb[25].mxu0  ;;  %v1896_v23 = vpop.permute.xlu1 %1895 }
 0x236   :  { %v2978_v2 = vadd.f32 %v6446_v43, %v2977_v31  ;;  %v3771_v27 = vpop.f32.mrb[26].mxu0  ;;  %v1844_v22 = vpop.permute.xlu0 %1843 }
 0x237   :  { %v2989_v49 = vadd.f32 %v6446_v43, %v3771_v27  ;;  %v2980_v25 = vpop.f32.mrb[27].mxu0  ;;  %v3162_v36 = vmax.f32 %v2986_v58, 0.0  ;;  %v2421_v39 = vsel %vm2361_vm9, %v2356_v35, %v1844_v22  ;;  %v2468_v58 = vsel %vm2426_vm10, %v2403_v8, %v1896_v23 }
 0x238   :  { %v2981_v41 = vadd.f32 %v6446_v43, %v2980_v25  ;;  %v3160_v63 = vmax.f32 %v2978_v2, 0.0  ;;  %v2340_v23 = vsel %vm2296_vm8, %v2265_v30, %v6491_v28 }
 0x239   :  { %v3163_v15 = vmax.f32 %v2989_v49, 0.0  ;;  %v1982_v33 = vpop.permute.xlu1 %1981 }
 0x23a   :  { %v3161_v55 = vmax.f32 %v2981_v41, 0.0  ;;  %v1828_v12 = vpop.permute.xlu0 %1827 }
 0x23b   :  { %v3836_v10 = vpack.c.bf16 %v3163_v15, %v3162_v36  ;;  %v2405_v49 = vsel %vm2361_vm9, %v2340_v23, %v1828_v12  ;;  %v3979_v12 = vmov 1983009808  }
 0x23c   :  { %v3832_v48 = vpack.c.bf16 %v3161_v55, %v3160_v63 }
 0x23d   :  { %v1966_v13 = vpop.permute.xlu1 %1965 }
 0x23e   :  { %3833 = vmatprep.subr.bf16.mxu1 %v3832_v48  ;;  %v1914_v47 = vpop.permute.xlu0 %1913  ;;  %v2533_v31 = vsel %vm2491_vm11, %v2468_v58, %v1966_v13  ;;  %v3204_v13 = vunpack.c.l.s4 %v3979_v12 }
 0x23f   :  { %3835 = vmatpush3.bf16.msra.mxu1 %v6107_v60  ;;  %v2484_v60 = vsel %vm2426_vm10, %v2419_v56, %v1912_v53  ;;  %v2486_v20 = vsel %vm2426_vm10, %v2421_v39, %v1914_v47  ;;  %v3206_v47 = vlaneseq }
 0x240   :  { %3837 = vmatprep.subr.bf16.mxu1 %v3836_v10  ;;  %v2549_v9 = vsel %vm2491_vm11, %v2484_v60, %v1982_v33  ;;  %v3205_v42 = vunpack.c.0.s8 %v3204_v13 }
 0x241   :  { %v2052_v59 = vpop.permute.xlu1 %2051  ;;  %v3207_v56 = vshrl.u32 %v3206_v47, 7 }
 0x242   :  { %v1898_v18 = vpop.permute.xlu0 %1897 }
 0x243   :  { %3839 = vmatpush3.bf16.msra.mxu1 %v6099_v24  ;;  %v2614_v24 = vsel %vm2556_vm12, %v2549_v9, %v2052_v59  ;;  %v2470_v41 = vsel %vm2426_vm10, %v2405_v49, %v1898_v18 }
 0x245   :  { %v2036_v32 = vpop.permute.xlu1 %2035 }
 0x246   :  { %v1984_v54 = vpop.permute.xlu0 %1983  ;;  %v2598_v29 = vsel %vm2556_vm12, %v2533_v31, %v2036_v32 }
 0x247   :  { %v2551_v46 = vsel %vm2491_vm11, %v2486_v20, %v1984_v54  ;;  %v6555_v20 = vld [vmem:[%s6650_s3] sm:$0xff] }
 0x249   :  { %v2122_v21 = vpop.permute.xlu1 %2121 }
 0x24a   :  { %v1968_v4 = vpop.permute.xlu0 %1967  ;;  %v2679_v6 = vsel %vm2621_vm13, %v2614_v24, %v2122_v21 }
 0x24b   :  { %v2535_v36 = vsel %vm2491_vm11, %v2470_v41, %v1968_v4 }
 0x24d   :  { %v2106_v51 = vpop.permute.xlu1 %2105 }
 0x24e   :  { %v2054_v40 = vpop.permute.xlu0 %2053  ;;  %v2663_v2 = vsel %vm2621_vm13, %v2598_v29, %v2106_v51 }
 0x24f   :  { %v2616_v50 = vsel %vm2556_vm12, %v2551_v46, %v2054_v40 }
 0x251   :  { %v2192_v34 = vpop.permute.xlu1 %2191 }
 0x252   :  { %v2744_v7 = vsel %vm2686_vm14, %v2679_v6, %v2192_v34  ;;  %v2038_v38 = vpop.permute.xlu0 %2037 }
 0x253   :  { %3800 = vmatprep.mubr.msk.bf16.mxu1 %vm2778_vm15, %v2744_v7  ;;  %v2600_v15 = vsel %vm2556_vm12, %v2535_v36, %v2038_v38  ;;  %v6548_v38 = vsub.s32 %v3205_v42, %v3207_v56 }
 0x255   :  { %v2108_v44 = vpop.permute.xlu1 %2107 }
 0x256   :  { %v2124_v19 = vpop.permute.xlu0 %2123  ;;  %v2665_v63 = vsel %vm2621_vm13, %v2600_v15, %v2108_v44 }
 0x257   :  { %v2681_v11 = vsel %vm2621_vm13, %v2616_v50, %v2124_v19 }
 0x259   :  { %v2194_v57 = vpop.permute.xlu1 %2193 }
 0x25a   :  { %v2746_v53 = vsel %vm2686_vm14, %v2681_v11, %v2194_v57  ;;  %v1616_v5 = vpop.permute.xlu0 %1615 }
 0x25b   :  { %3801 = vmatmul.mubr.msk.bf16.gmra.mrb[12].mxu1 %vm2778_vm15, %v2746_v53  ;;  %v2292_v19 = vsel %vm2199_vm7, %v6105_v14, %v1616_v5  ;;  %v3209_v14 = vrot.slane %v6555_v20, %v6548_v38 }
 0x25d   :  { %v1776_v61 = vpop.permute.xlu1 %1775 }
 0x25e   :  { %v2176_v17 = vpop.permute.xlu0 %2175  ;;  %v2358_v0 = vsel %vm2296_vm8, %v2292_v19, %v1776_v61 }
 0x25f   :  { %v2728_v27 = vsel %vm2686_vm14, %v2663_v2, %v2176_v17 }
 0x260   :  { %3784 = vmatprep.mubr.msk.bf16.mxu0 %vm2778_vm15, %v2728_v27 }
 0x261   :  { %v1778_v22 = vpop.permute.xlu1 %1777 }
 0x262   :  { %v1618_v25 = vpop.permute.xlu0 %1617 }
 0x263   :  { %v2295_v3 = vsel %vm2199_vm7, %v6219_v45, %v1618_v25 }
 0x264   :  { %v2360_v57 = vsel %vm2296_vm8, %v2295_v3, %v1778_v22 }
 0x265   :  { %v1848_v33 = vpop.permute.xlu1 %1847 }
 0x266   :  { %v2178_v55 = vpop.permute.xlu0 %2177  ;;  %v2425_v5 = vsel %vm2361_vm9, %v2360_v57, %v1848_v33 }
 0x267   :  { %v2730_v16 = vsel %vm2686_vm14, %v2665_v63, %v2178_v55  ;;  %v3217_v63 = vcombine.high %v3209_v14, %v3209_v14 }
 0x268   :  { %3785 = vmatmul.mubr.msk.bf16.gmra.mrb[40].mxu0 %vm2778_vm15, %v2730_v16 }
 0x269   :  { %v1918_v26 = vpop.permute.xlu1 %1917 }
 0x26a   :  { %v1846_v28 = vpop.permute.xlu0 %1845  ;;  %v2490_v2 = vsel %vm2426_vm10, %v2425_v5, %v1918_v26 }
 0x26b   :  { %v2423_v8 = vsel %vm2361_vm9, %v2358_v0, %v1846_v28 }
 0x26d   :  { %v1988_v10 = vpop.permute.xlu1 %1987 }
 0x26e   :  { %v1916_v48 = vpop.permute.xlu0 %1915  ;;  %v2555_v23 = vsel %vm2491_vm11, %v2490_v2, %v1988_v10 }
 0x26f   :  { %v2488_v29 = vsel %vm2426_vm10, %v2423_v8, %v1916_v48 }
 0x270   :  { %v3774_v59 = vpop.f32.mrb[28].mxu0 }
 0x271   :  { %v3002_v18 = vadd.f32 %v6446_v43, %v3774_v59  ;;  %v2993_v32 = vpop.f32.mrb[29].mxu0  ;;  %v2058_v54 = vpop.permute.xlu1 %2057 }
 0x272   :  { %v2994_v21 = vadd.f32 %v6446_v43, %v2993_v32  ;;  %v3775_v4 = vpop.f32.mrb[30].mxu0  ;;  %v1986_v1 = vpop.permute.xlu0 %1985  ;;  %v2620_v36 = vsel %vm2556_vm12, %v2555_v23, %v2058_v54 }
 0x273   :  { %v3005_v51 = vadd.f32 %v6446_v43, %v3775_v4  ;;  %v2996_v60 = vpop.f32.mrb[31].mxu0  ;;  %v3166_v9 = vmax.f32 %v3002_v18, 0.0  ;;  %v2553_v17 = vsel %vm2491_vm11, %v2488_v29, %v1986_v1 }
 0x274   :  { %v2997_v40 = vadd.f32 %v6446_v43, %v2996_v60  ;;  %v3164_v6 = vmax.f32 %v2994_v21, 0.0 }
 0x275   :  { %v3167_v24 = vmax.f32 %v3005_v51, 0.0  ;;  %v2128_v39 = vpop.permute.xlu1 %2127 }
 0x276   :  { %v3165_v34 = vmax.f32 %v2997_v40, 0.0  ;;  %v2056_v7 = vpop.permute.xlu0 %2055  ;;  %v2685_v55 = vsel %vm2621_vm13, %v2620_v36, %v2128_v39 }
 0x277   :  { %v3844_v35 = vpack.c.bf16 %v3167_v24, %v3166_v9  ;;  %v3790_v44 = vpop.f32.mrb[0].mxu1  ;;  %v2618_v22 = vsel %vm2556_vm12, %v2553_v17, %v2056_v7 }
 0x278   :  { %v3840_v46 = vpack.c.bf16 %v3165_v34, %v3164_v6  ;;  %v3066_v62 = vadd.f32 %v6446_v43, %v3790_v44  ;;  %v3057_v50 = vpop.f32.mrb[1].mxu1 }
 0x279   :  { %v3058_v11 = vadd.f32 %v6446_v43, %v3057_v50  ;;  %v3791_v45 = vpop.f32.mrb[2].mxu1  ;;  %v2198_v25 = vpop.permute.xlu1 %2197 }
 0x27a   :  { %v3069_v53 = vadd.f32 %v6446_v43, %v3791_v45  ;;  %v3060_v58 = vpop.f32.mrb[3].mxu1  ;;  %3841 = vmatprep.subr.bf16.mxu1 %v3840_v46  ;;  %v2126_v31 = vpop.permute.xlu0 %2125  ;;  %v3182_v27 = vmax.f32 %v3066_v62, 0.0  ;;  %v2750_v28 = vsel %vm2686_vm14, %v2685_v55, %v2198_v25  ;;  %v3202_v46 = vcombine.high %v6555_v20, %v6555_v20 }
 0x27b   :  { %v3061_v61 = vadd.f32 %v6446_v43, %v3060_v58  ;;  %3843 = vmatpush3.bf16.msra.mxu1 %v6281_v52  ;;  %v3180_v49 = vmax.f32 %v3058_v11, 0.0  ;;  %v2683_v52 = vsel %vm2621_vm13, %v2618_v22, %v2126_v31 }
 0x27c   :  { %v3183_v30 = vmax.f32 %v3069_v53, 0.0  ;;  %3845 = vmatprep.subr.bf16.mxu1 %v3844_v35  ;;  %v6598_v62 = vrot.slane %v3202_v46, %v6548_v38 }
 0x27d   :  { %v3181_v41 = vmax.f32 %v3061_v61, 0.0 }
 0x27e   :  { %v6576_v15 = vpack.c.bf16 %v3183_v30, %v3182_v27  ;;  %v2196_v33 = vpop.permute.xlu0 %2195  ;;  %v3218_v50 = vcombine.high %v6598_v62, %v6598_v62 }
 0x27f   :  { %v6580_v16 = vpack.c.bf16 %v3181_v41, %v3180_v49  ;;  %v2748_v26 = vsel %vm2686_vm14, %v2683_v52, %v2196_v33  ;;  %3847 = vmatpush3.bf16.msra.mxu1 %v6276_v37 }
 0x280   :  { %3804 = vmatprep.mubr.msk.bf16.mxu1 %vm2778_vm15, %v2748_v26 }
 0x281   :  { %3805 = vmatmul.mubr.msk.bf16.gmra.mrb[16].mxu1 %vm2778_vm15, %v2750_v28 }
 0x282   :  { %3287 = vmatprep.mubr.f32.mxu1 %v3217_v63 }
 0x289   :  { %3288 = vmatmul.mubr.f32.vlgmr.msra.gmra.mrb[20].mxu1 %v3209_v14 }
 0x28a   :  { %3357 = vmatprep.mubr.f32.mxu1 %v3218_v50 }
 0x2af   :  { %v3794_v10 = vpop.f32.mrb[4].mxu1 }
 0x2b0   :  { %v3082_v48 = vadd.f32 %v6446_v43, %v3794_v10  ;;  %v3073_v12 = vpop.f32.mrb[5].mxu1 }
 0x2b1   :  { %v3074_v13 = vadd.f32 %v6446_v43, %v3073_v12  ;;  %v3795_v47 = vpop.f32.mrb[6].mxu1 }
 0x2b2   :  { %v3085_v59 = vadd.f32 %v6446_v43, %v3795_v47  ;;  %v3076_v18 = vpop.f32.mrb[7].mxu1  ;;  %v3186_v32 = vmax.f32 %v3082_v48, 0.0 }
 0x2b3   :  { %v3077_v37 = vadd.f32 %v6446_v43, %v3076_v18  ;;  %v3184_v21 = vmax.f32 %v3074_v13, 0.0 }
 0x2b4   :  { %v3187_v54 = vmax.f32 %v3085_v59, 0.0 }
 0x2b5   :  { %v3185_v4 = vmax.f32 %v3077_v37, 0.0 }
 0x2b6   :  { %v3852_v1 = vpack.c.bf16 %v3187_v54, %v3186_v32 }
 0x2b7   :  { %v3848_v42 = vpack.c.bf16 %v3185_v4, %v3184_v21  ;;  %v3778_v56 = vpop.f32.mrb[32].mxu0 }
 0x2b8   :  { %v3018_v51 = vadd.f32 %v6446_v43, %v3778_v56  ;;  %v3009_v60 = vpop.f32.mrb[33].mxu0 }
 0x2b9   :  { %v3010_v40 = vadd.f32 %v6446_v43, %v3009_v60  ;;  %v3779_v9 = vpop.f32.mrb[34].mxu0  ;;  %3849 = vmatprep.subr.bf16.mxu1 %v3848_v42 }
 0x2ba   :  { %v3021_v24 = vadd.f32 %v6446_v43, %v3779_v9  ;;  %v3012_v6 = vpop.f32.mrb[35].mxu0  ;;  %v3170_v7 = vmax.f32 %v3018_v51, 0.0 }
 0x2bb   :  { %v3013_v34 = vadd.f32 %v6446_v43, %v3012_v6  ;;  %v3168_v35 = vmax.f32 %v3010_v40, 0.0 }
 0x2bc   :  { %v3171_v3 = vmax.f32 %v3021_v24, 0.0 }
 0x2bd   :  { %v3169_v39 = vmax.f32 %v3013_v34, 0.0 }
 0x2be   :  { %v3854_v44 = vpack.c.bf16 %v3171_v3, %v3170_v7 }
 0x2bf   :  { %v3850_v19 = vpack.c.bf16 %v3169_v39, %v3168_v35 }
 0x2c1   :  { %3851 = vmatpush3.bf16.msra.mxu1 %v3850_v19 }
 0x2c2   :  { %3853 = vmatprep.subr.bf16.mxu1 %v3852_v1 }
 0x2c5   :  { %3855 = vmatpush3.bf16.msra.mxu1 %v3854_v44 }
 0x2ee   :  { %v3798_v0 = vpop.f32.mrb[8].mxu1 }
 0x2ef   :  { %v3098_v11 = vadd.f32 %v6446_v43, %v3798_v0  ;;  %v3089_v45 = vpop.f32.mrb[9].mxu1 }
 0x2f0   :  { %v3090_v57 = vadd.f32 %v6446_v43, %v3089_v45  ;;  %v3799_v8 = vpop.f32.mrb[10].mxu1 }
 0x2f1   :  { %v3101_v53 = vadd.f32 %v6446_v43, %v3799_v8  ;;  %v3092_v58 = vpop.f32.mrb[11].mxu1  ;;  %v3190_v20 = vmax.f32 %v3098_v11, 0.0 }
 0x2f2   :  { %v3093_v31 = vadd.f32 %v6446_v43, %v3092_v58  ;;  %v3188_v38 = vmax.f32 %v3090_v57, 0.0 }
 0x2f3   :  { %v3191_v14 = vmax.f32 %v3101_v53, 0.0 }
 0x2f4   :  { %v3189_v5 = vmax.f32 %v3093_v31, 0.0 }
 0x2f5   :  { %v3860_v29 = vpack.c.bf16 %v3191_v14, %v3190_v20 }
 0x2f6   :  { %v3856_v61 = vpack.c.bf16 %v3189_v5, %v3188_v38  ;;  %v3782_v2 = vpop.f32.mrb[36].mxu0 }
 0x2f7   :  { %v3034_v17 = vadd.f32 %v6446_v43, %v3782_v2  ;;  %v3025_v27 = vpop.f32.mrb[37].mxu0  ;;  %v3941_v2 = vld [vmem:[%s6651_s4 + $0x8] sm:$0xff]  }
 0x2f8   :  { %v3026_v30 = vadd.f32 %v6446_v43, %v3025_v27  ;;  %v3783_v23 = vpop.f32.mrb[38].mxu0  ;;  %3857 = vmatprep.subr.bf16.mxu1 %v3856_v61  ;;  %v3980_v61 = vmov 0.0  }
 0x2f9   :  { %v3037_v22 = vadd.f32 %v6446_v43, %v3783_v23  ;;  %v3028_v49 = vpop.f32.mrb[39].mxu0  ;;  %v3174_v41 = vmax.f32 %v3034_v17, 0.0 }
 0x2fa   :  { %v3029_v25 = vadd.f32 %v6446_v43, %v3028_v49  ;;  %v3172_v52 = vmax.f32 %v3026_v30, 0.0  ;;  %v3626_v30 = vld [vmem:[%s6652_s5] ss:$0 sm:$0xff] }
 0x2fb   :  { %v3175_v36 = vmax.f32 %v3037_v22, 0.0 }
 0x2fc   :  { %v3173_v33 = vmax.f32 %v3029_v25, 0.0 }
 0x2fd   :  { %v3862_v63 = vpack.c.bf16 %v3175_v36, %v3174_v41 }
 0x2fe   :  { %v3858_v55 = vpack.c.bf16 %v3173_v33, %v3172_v52 }
 0x300   :  { %3859 = vmatpush3.bf16.msra.mxu1 %v3858_v55 }
 0x301   :  { %3861 = vmatprep.subr.bf16.mxu1 %v3860_v29 }
 0x304   :  { %3863 = vmatpush3.bf16.msra.mxu1 %v3862_v63 }
 0x32e   :  { %v3802_v26 = vpop.f32.mrb[12].mxu1 }
 0x32f   :  { %v3114_v28 = vadd.f32 %v6446_v43, %v3802_v26  ;;  %v3105_v10 = vpop.f32.mrb[13].mxu1 }
 0x330   :  { %v3106_v48 = vadd.f32 %v6446_v43, %v3105_v10  ;;  %v3803_v12 = vpop.f32.mrb[14].mxu1 }
 0x331   :  { %v3117_v13 = vadd.f32 %v6446_v43, %v3803_v12  ;;  %v3108_v47 = vpop.f32.mrb[15].mxu1  ;;  %v3194_v18 = vmax.f32 %v3114_v28, 0.0 }
 0x332   :  { %v3109_v59 = vadd.f32 %v6446_v43, %v3108_v47  ;;  %v3192_v32 = vmax.f32 %v3106_v48, 0.0 }
 0x333   :  { %v3195_v37 = vmax.f32 %v3117_v13, 0.0 }
 0x334   :  { %v3193_v54 = vmax.f32 %v3109_v59, 0.0 }
 0x335   :  { %v3868_v21 = vpack.c.bf16 %v3195_v37, %v3194_v18 }
 0x336   :  { %v3864_v4 = vpack.c.bf16 %v3193_v54, %v3192_v32 }
 0x338   :  { %3865 = vmatprep.subr.bf16.mxu1 %v3864_v4 }
 0x33b   :  { %v3786_v1 = vpop.f32.mrb[40].mxu0 }
 0x33c   :  { %v3050_v42 = vadd.f32 %v6446_v43, %v3786_v1  ;;  %v3041_v56 = vpop.f32.mrb[41].mxu0 }
 0x33d   :  { %v3042_v51 = vadd.f32 %v6446_v43, %v3041_v56  ;;  %v3787_v60 = vpop.f32.mrb[42].mxu0 }
 0x33e   :  { %v3053_v40 = vadd.f32 %v6446_v43, %v3787_v60  ;;  %v3044_v9 = vpop.f32.mrb[43].mxu0  ;;  %v3178_v6 = vmax.f32 %v3050_v42, 0.0 }
 0x33f   :  { %v3045_v24 = vadd.f32 %v6446_v43, %v3044_v9  ;;  %v3176_v7 = vmax.f32 %v3042_v51, 0.0 }
 0x340   :  { %v3179_v34 = vmax.f32 %v3053_v40, 0.0 }
 0x341   :  { %v3177_v3 = vmax.f32 %v3045_v24, 0.0 }
 0x342   :  { %v3870_v35 = vpack.c.bf16 %v3179_v34, %v3178_v6 }
 0x343   :  { %v3866_v39 = vpack.c.bf16 %v3177_v3, %v3176_v7 }
 0x345   :  { %3867 = vmatpush3.bf16.msra.mxu1 %v3866_v39 }
 0x346   :  { %3869 = vmatprep.subr.bf16.mxu1 %v3868_v21 }
 0x349   :  { %3871 = vmatpush3.bf16.msra.mxu1 %v3870_v35 }
 0x354   :  { %v3806_v44 = vpop.f32.mrb[16].mxu1 }
 0x355   :  { %v3130_v19 = vadd.f32 %v6446_v43, %v3806_v44  ;;  %v3121_v46 = vpop.f32.mrb[17].mxu1 }
 0x356   :  { %v3122_v50 = vadd.f32 %v6446_v43, %v3121_v46  ;;  %v3807_v0 = vpop.f32.mrb[18].mxu1 }
 0x357   :  { %v3133_v11 = vadd.f32 %v6446_v43, %v3807_v0  ;;  %v3124_v45 = vpop.f32.mrb[19].mxu1  ;;  %v3198_v8 = vmax.f32 %v3130_v19, 0.0 }
 0x358   :  { %v3125_v57 = vadd.f32 %v6446_v43, %v3124_v45  ;;  %v3196_v58 = vmax.f32 %v3122_v50, 0.0  ;;  %v3940_v43 = vld [vmem:[%s6651_s4] sm:$0xff]   ;;  %s3947_s4 = scalar_lea.vmem %s3439_s8, 32 }
 0x359   :  { %v3199_v53 = vmax.f32 %v3133_v11, 0.0  ;;  %p3948_p0 = scmp.ne.s32.totalorder %s3439_s8, %s3947_s4  ;;  %p3953_p2 = scmp.lt.s32.totalorder %s3947_s4, %s3947_s4 }
 0x35a   :  { %v3197_v31 = vmax.f32 %v3125_v57, 0.0 }
 0x35b   :  { %v3876_v20 = vpack.c.bf16 %v3199_v53, %v3198_v8  ;;  %p3954_p3 = por %p3953_p2, %p3952_p1 }
 0x35c   :  { %v3872_v14 = vpack.c.bf16 %v3197_v31, %v3196_v58  ;;  %v3697_v38 = vpop.f32.mrb[20].mxu1 }
 0x35d   :  { %v3698_v5 = vpop.f32.mrb[21].mxu1  ;;  %p3955_p4 = pnand %p3954_p3, %p3948_p0 }
 0x35e   :  { %3873 = vmatprep.subr.bf16.mxu1 %v3872_v14  ;;  %v3699_v29 = vadd.f32 %v3698_v5, %v3697_v38 }
 0x35f   :  { %3875 = vmatpush3.bf16.msra.mxu1 %v6580_v16 }
 0x360   :  { %3877 = vmatprep.subr.bf16.mxu1 %v3876_v20 }
 0x363   :  { %3879 = vmatpush3.bf16.msra.mxu1 %v6576_v15 }
 0x364   :  { %3808 = vmatprep.subr.bf16.mxu1 %v3980_v61 }
 0x366   :  { %3358 = vmatmul.mubr.f32.vlgmr.msra.gmra.mrb[22].mxu1 %v6598_v62 }
 0x367   :  { %3809 = vmatpush3.bf16.msra.mxu1 %v3940_v43  ;;  %3812 = vmatprep.mubr.msk.bf16.mxu1 %vm3981_vm0, %v3980_v61 }
 0x368   :  { %3810 = vmatprep.subr.bf16.mxu1 %v3980_v61 }
 0x36b   :  { %3811 = vmatpush3.bf16.msra.mxu1 %v3941_v2 }
 0x439   :  { %v3732_v16 = vpop.f32.mrb[22].mxu1 }
 0x43a   :  { %v3733_v17 = vpop.f32.mrb[23].mxu1 }
 0x43b   :  { %v3734_v15 = vadd.f32 %v3733_v17, %v3732_v16 }
 0x43d   :  { %v3360_v27 = vadd.f32 %v3734_v15, %v3699_v29 }
 0x43f   :  { %v3363_v62 = vpack.c.bf16 %v3360_v27, %v3360_v27 }
 0x441   :  { %3813 = vmatmul.mubr.msk.bf16.vlgmr.msra.gmra.mrb[24].mxu1 %vm2686_vm14, %v3363_v62 }
 0x514   :  { %v3424_v23 = vpop.f32.mrb[24].mxu1 }
 0x515   :  { %v3425_v22 = vadd.f32 %v3626_v30, %v3424_v23  ;;  %v3814_v49 = vpop.f32.mrb[25].mxu1 }
 0x516   :  { %v3427_v25 = vpop.f32.mrb[26].mxu1 }
 0x517   :  { %v3815_v41 = vpop.f32.mrb[27].mxu1  ;;  %3431 = vst.msk [vmem:[#allocation2] sm:$0x3] %vm3430_vm1, %v3425_v22 }
 0x518   :  { %3958 = shalt.err (!%p3955_p4)
}
 0x519   :  { %s3959_s5 = scalar_lea.hbm %s6653_s6, 32 }
 0x51a   :  { %p3960_p5 = scmp.ne.s32.totalorder %s6653_s6, %s3959_s5  ;;  %p3963_p6 = scmp.lt.u32.totalorder %s3959_s5, %s6653_s6 }
 0x51c   :  { %p3965_p7 = pnand %p3963_p6, %p3960_p5 }
 0x51e   :  { %3968 = shalt.err (!%p3965_p7)
}
 0x51f   :  { %3441 = dma.vmem_to_hbm [thread:$0]  %s3439_s8, 32, %s6653_s6, [#allocation3]  }
 0x520   :  { %3969 = dma.done.wait [#allocation3], 32  }
 0x521   :  { %3970 = vsyncadd [#allocation3], 4294967264 }
 0x522   :  { %3445 = vsyncpa [#allocation3], 1 }

</bundles_post_ra>
